<compile_context>
chip_gen: v6e
topology: v6e:2x2x1
jax: 0.10.0
libtpu: 0.0.40
codegen_flags: <defaults>
</compile_context>

<pallas_src>
import numpy as np
import jax
import jax.numpy as jnp
from jax import lax
from jax.experimental import pallas as pl
from jax.experimental.pallas import tpu as pltpu

# ----------------------------- config (small shapes) ------------------------
B = 2
IN_FEATURES = 2
SEQ_LEN = 64                   # divisible by 8 (three MaxPool1d(2) stages)
CNN_CH = 8                     # conv channels: 8 -> 16 -> 32
RNN_HIDDEN = 16
EMBED_DIM = 16
NUM_KEYPOINTS = 2
BN_EPS = 1e-5
T_RNN = SEQ_LEN // 8           # sequence length seen by the LSTM (= 8)
PAD_CONV = 4                   # uniform zero padding kept around every conv input
H = RNN_HIDDEN


# ============================================================================
# In-kernel building blocks (operate on VMEM-resident jnp values).
# ============================================================================
def _conv_block(xpad, w_packed, bias, scale, shift, psel, K, pad, L):
    """Conv1d('same') + bias + ReLU + BatchNorm(eval, folded) + MaxPool1d(2,2).

    xpad:     (B, L + 2*PAD_CONV, Cin) channels-last, zero padded.
    w_packed: (K*Cin, Cout) im2col-packed weight (row order k*Cin + ci).
    psel:     (2*R, B*L) stacked even/odd pooling selection matrix; the first
              R rows pick the even source row, the last R rows the odd one.
    Returns (R, Cout) = max(even, odd) rows (layout is encoded in psel).
    """
    Bv, _, Cin = xpad.shape
    start = PAD_CONV - pad
    taps = [xpad[:, start + k:start + k + L, :] for k in range(K)]
    im = jnp.concatenate(taps, axis=-1).reshape(Bv * L, K * Cin)
    y = jnp.dot(im, w_packed, preferred_element_type=jnp.float32)
    y = jnp.maximum(y + bias, 0.0) * scale + shift          # Conv -> ReLU -> BN
    sel = jnp.dot(psel, y, preferred_element_type=jnp.float32)
    half = psel.shape[0] // 2
    return jnp.maximum(sel[0:half], sel[half:2 * half])     # MaxPool1d(2, 2)


def _bilstm_layer(x_rows, wih, whh, bias, gmask, store):
    """One bidirectional LSTM layer with the two directions fused per step.

    x_rows: (T*B, Cin) time-major (row = t*B + b).
    wih (Cin, 8H), whh (2H, 8H), bias/gmask (1, 8H): gate columns interleaved
    as [i_f, i_b, f_f, f_b, g_f, g_b, o_f, o_b]; whh is block-diagonal so the
    carried state h = [h_f | h_b] (B, 2H) drives both directions in one matmul.
    `store(s, h)` scatters the step-s hidden state into the caller's scratch.
    Returns sum over steps of h  (= [sum_t h_f(t) | sum_t h_b(t)]).
    """
    TB = x_rows.shape[0]
    T = TB // B
    # Hoisted input projection (+ bias) for all timesteps, both directions.
    pre = jnp.dot(x_rows, wih, preferred_element_type=jnp.float32) + bias
    gmask_c = 1.0 - gmask
    h = jnp.zeros((B, 2 * H), jnp.float32)
    c = jnp.zeros((B, 2 * H), jnp.float32)
    hsum = jnp.zeros((B, 2 * H), jnp.float32)
    for s in range(T):                                   # fully unrolled, T = 8
        tf, tb = s, T - 1 - s
        zin = (pre[tf * B:(tf + 1) * B, :] * gmask
               + pre[tb * B:(tb + 1) * B, :] * gmask_c)
        z = zin + jnp.dot(h, whh, preferred_element_type=jnp.float32)
        sig = jax.nn.sigmoid(z)                          # one EUP pass, 128 lanes
        i_g = sig[:, 0:2 * H]
        f_g = sig[:, 2 * H:4 * H]
        o_g = sig[:, 6 * H:8 * H]
        g_g = jnp.tanh(z[:, 4 * H:6 * H])
        c = f_g * c + i_g * g_g
        h = o_g * jnp.tanh(c)
        hsum = hsum + h
        store(s, h)
    return hsum


# ============================================================================
# The single fused forward-pass kernel.
# ============================================================================
def fused_forward_kernel(
        x_ref, cw0_ref, cw1_ref, cw2_ref, aff_ref,
        p0_ref, p1_ref, p2_ref,
        wih_ref, whh_ref, misc_ref,
        embw_ref, embb_ref,
        wkp1_ref, wkp2_ref, kpb_ref, mtk_ref,
        emb_ref, logits_ref,
        out1_ref, out2_ref):
    aff = aff_ref[...]                                    # (9, 32) packed affines

    # ---------------- CNN encoder: 3 x (Conv -> ReLU -> BN -> MaxPool) ------
    x1 = _conv_block(x_ref[...], cw0_ref[...],
                     aff[0:1, 0:CNN_CH], aff[1:2, 0:CNN_CH], aff[2:3, 0:CNN_CH],
                     p0_ref[...], 7, 3, SEQ_LEN)
    x1 = x1.reshape(B, SEQ_LEN // 2 + 2 * PAD_CONV, CNN_CH)          # padded
    x2 = _conv_block(x1, cw1_ref[...],
                     aff[3:4, 0:2 * CNN_CH], aff[4:5, 0:2 * CNN_CH],
                     aff[5:6, 0:2 * CNN_CH],
                     p1_ref[...], 5, 2, SEQ_LEN // 2)
    x2 = x2.reshape(B, SEQ_LEN // 4 + 2 * PAD_CONV, 2 * CNN_CH)      # padded
    x_lstm = _conv_block(x2, cw2_ref[...],
                         aff[6:7, 0:4 * CNN_CH], aff[7:8, 0:4 * CNN_CH],
                         aff[8:9, 0:4 * CNN_CH],
                         p2_ref[...], 3, 1, SEQ_LEN // 4)  # (T*B, 32) time-major

    # ---------------- 2-layer bidirectional LSTM (fused directions) ---------
    gmask = misc_ref[2:3, :]

    def store1(s, h):                                      # time-major (T*B, 2H)
        tf, tb = s, T_RNN - 1 - s
        out1_ref[B * tf:B * tf + B, 0:H] = h[:, 0:H]
        out1_ref[B * tb:B * tb + B, H:2 * H] = h[:, H:2 * H]

    _bilstm_layer(x_lstm, wih_ref[0:32, :], whh_ref[0:32, :],
                  misc_ref[0:1, :], gmask, store1)
    # TODO(synk): nn.LSTM inter-layer dropout (p=0.2) is a no-op in eval mode; omitted.

    def store2(s, h):                                      # lane-dense (B, T*2H)
        tf, tb = s, T_RNN - 1 - s
        out2_ref[:, 2 * H * tf:2 * H * tf + H] = h[:, 0:H]
        out2_ref[:, 2 * H * tb + H:2 * H * tb + 2 * H] = h[:, H:2 * H]

    hsum = _bilstm_layer(out1_ref[...], wih_ref[32:64, :], whh_ref[32:64, :],
                         misc_ref[1:2, :], gmask, store2)

    # ---------------- embedding head: mean over time -> Linear/ReLU/Linear --
    agg = hsum * (1.0 / T_RNN)                             # (B, 2H)
    he = jnp.maximum(jnp.dot(agg, embw_ref[0:32, :],
                             preferred_element_type=jnp.float32)
                     + embb_ref[0:1, :], 0.0)
    emb_ref[...] = (jnp.dot(he, embw_ref[32:48, :],
                            preferred_element_type=jnp.float32)
                    + embb_ref[1:2, :])

    # ---------------- keypoint head (block-diag over time) + interpolation --
    rnn_wide = out2_ref[...]                               # (B, T*2H) lane-dense
    hk = jnp.maximum(jnp.dot(rnn_wide, wkp1_ref[...],
                             preferred_element_type=jnp.float32)
                     + kpb_ref[0:1, :], 0.0)               # (B, T*H)
    kf = (jnp.dot(hk, wkp2_ref[...], preferred_element_type=jnp.float32)
          + kpb_ref[1:2, 0:T_RNN * NUM_KEYPOINTS])         # (B, T*K)
    logits_ref[...] = jnp.dot(kf, mtk_ref[...],
                              preferred_element_type=jnp.float32)  # (B, S*K)


# ============================================================================
# Host-side glue: params, packing, interpolation / pooling matrices, wrapper.
# ============================================================================
def build_interp_matrix(T, S):
    """(S, T) matrix reproducing F.interpolate(mode='linear', align_corners=False)."""
    mt = np.zeros((S, T), np.float32)
    scale = T / S
    for s in range(S):
        src = max((s + 0.5) * scale - 0.5, 0.0)
        i0 = min(int(np.floor(src)), T - 1)
        i1 = min(i0 + 1, T - 1)
        w1 = src - i0
        mt[s, i0] += 1.0 - w1
        mt[s, i1] += w1
    return mt


def build_pool_matrix_bmajor(Bv, Lin, pad_out):
    """Stacked even/odd selection for MaxPool(2,2); output rows are the
    zero-padded, channels-last flattened input of the NEXT conv block."""
    half = Lin // 2
    Lp = half + 2 * pad_out
    rows = Bv * Lp
    P = np.zeros((2 * rows, Bv * Lin), np.float32)
    for r in range(rows):
        b, lp = divmod(r, Lp)
        l = lp - pad_out
        if 0 <= l < half:
            src = b * Lin + 2 * l
            P[r, src] = 1.0
            P[rows + r, src + 1] = 1.0
    return P


def build_pool_matrix_tmajor(Bv, Lin):
    """Stacked even/odd selection; output rows are time-major (t*B + b)."""
    half = Lin // 2
    rows = half * Bv
    P = np.zeros((2 * rows, Bv * Lin), np.float32)
    for r in range(rows):
        t, b = divmod(r, Bv)
        src = b * Lin + 2 * t
        P[r, src] = 1.0
        P[rows + r, src + 1] = 1.0
    return P


def init_params(key):
    keys = iter(jax.random.split(key, 64))

    def nrm(shape, s):
        return jax.random.normal(next(keys), shape, jnp.float32) * s

    params = {"conv": [], "lstm": []}
    conv_defs = [(IN_FEATURES, CNN_CH, 7), (CNN_CH, CNN_CH * 2, 5),
                 (CNN_CH * 2, CNN_CH * 4, 3)]
    for cin, cout, k in conv_defs:
        w = nrm((k, cin, cout), 1.0 / np.sqrt(cin * k))    # (K, Cin, Cout)
        b = nrm((1, cout), 0.05)
        gamma = 1.0 + nrm((1, cout), 0.05)
        beta = nrm((1, cout), 0.05)
        rmean = nrm((1, cout), 0.05)
        rvar = 1.0 + jnp.abs(nrm((1, cout), 0.05))
        scale = gamma / jnp.sqrt(rvar + BN_EPS)            # eval-mode BN, folded
        shift = beta - rmean * scale
        params["conv"].append(dict(w=w, b=b, scale=scale, shift=shift))

    for layer in range(2):
        cin = CNN_CH * 4 if layer == 0 else 2 * H
        s = 1.0 / np.sqrt(H)
        dirs = []
        for _direction in range(2):                        # forward, backward
            dirs.append(dict(wih=nrm((cin, 4 * H), s),     # fused gates (i,f,g,o)
                             whh=nrm((H, 4 * H), s),
                             b=nrm((1, 4 * H), s)))        # b_ih + b_hh combined
        params["lstm"].append(dirs)

    D = 2 * H
    params["emb"] = dict(w1=nrm((D, H), 1 / np.sqrt(D)), b1=nrm((1, H), 0.05),
                         w2=nrm((H, EMBED_DIM), 1 / np.sqrt(H)),
                         b2=nrm((1, EMBED_DIM), 0.05))
    params["kp"] = dict(w1=nrm((D, H), 1 / np.sqrt(D)), b1=nrm((1, H), 0.05),
                        w2=nrm((H, NUM_KEYPOINTS), 1 / np.sqrt(H)),
                        b2=nrm((1, NUM_KEYPOINTS), 0.05))
    return params


def pack_params(params):
    """Host-side packing: im2col conv weights, pool matrices, fused-direction
    LSTM weights, block-diagonal keypoint weights, packed small biases."""
    f32 = np.float32
    pk = {}

    # --- conv: im2col weights + packed (bias, scale, shift) rows ------------
    aff = np.zeros((9, 4 * CNN_CH), f32)
    for i, cp in enumerate(params["conv"]):
        w = np.asarray(cp["w"], f32)                       # (K, Cin, Cout)
        cout = w.shape[2]
        pk[f"cw{i}"] = jnp.asarray(w.reshape(-1, cout))    # (K*Cin, Cout)
        aff[3 * i + 0, :cout] = np.asarray(cp["b"], f32)[0]
        aff[3 * i + 1, :cout] = np.asarray(cp["scale"], f32)[0]
        aff[3 * i + 2, :cout] = np.asarray(cp["shift"], f32)[0]
    pk["aff"] = jnp.asarray(aff)

    # --- host-precomputed MaxPool even/odd selection matrices ---------------
    pk["p0"] = jnp.asarray(build_pool_matrix_bmajor(B, SEQ_LEN, PAD_CONV))
    pk["p1"] = jnp.asarray(build_pool_matrix_bmajor(B, SEQ_LEN // 2, PAD_CONV))
    pk["p2"] = jnp.asarray(build_pool_matrix_tmajor(B, SEQ_LEN // 4))

    # --- LSTM: fused fwd/bwd weights, gate columns interleaved per gate -----
    def interleave(wf, wb):
        parts = []
        for g in range(4):
            parts.append(wf[..., g * H:(g + 1) * H])
            parts.append(wb[..., g * H:(g + 1) * H])
        return np.concatenate(parts, axis=-1)

    wih_all = np.zeros((64, 8 * H), f32)
    whh_all = np.zeros((64, 8 * H), f32)
    misc = np.zeros((3, 8 * H), f32)
    for layer, dirs in enumerate(params["lstm"]):
        wf, wb = dirs[0], dirs[1]
        wih_all[32 * layer:32 * layer + 32, :] = interleave(
            np.asarray(wf["wih"], f32), np.asarray(wb["wih"], f32))
        whh_f = np.asarray(wf["whh"], f32)
        whh_b = np.asarray(wb["whh"], f32)
        blk = np.zeros((2 * H, 8 * H), f32)
        for g in range(4):
            blk[0:H, (2 * g) * H:(2 * g + 1) * H] = whh_f[:, g * H:(g + 1) * H]
            blk[H:2 * H, (2 * g + 1) * H:(2 * g + 2) * H] = whh_b[:, g * H:(g + 1) * H]
        whh_all[32 * layer:32 * layer + 32, :] = blk
        misc[layer, :] = interleave(np.asarray(wf["b"], f32),
                                    np.asarray(wb["b"], f32))[0]
    for g in range(4):
        misc[2, (2 * g) * H:(2 * g + 1) * H] = 1.0         # forward-gate mask
    pk["wih"] = jnp.asarray(wih_all)
    pk["whh"] = jnp.asarray(whh_all)
    pk["misc"] = jnp.asarray(misc)

    # --- heads ---------------------------------------------------------------
    ep, kp = params["emb"], params["kp"]
    pk["emb_w"] = jnp.asarray(np.concatenate(
        [np.asarray(ep["w1"], f32), np.asarray(ep["w2"], f32)], axis=0))  # (48,16)
    pk["emb_b"] = jnp.asarray(np.concatenate(
        [np.asarray(ep["b1"], f32), np.asarray(ep["b2"], f32)], axis=0))  # (2,16)
    eye_t = np.eye(T_RNN, dtype=f32)
    pk["kp_w1"] = jnp.asarray(np.kron(eye_t, np.asarray(kp["w1"], f32)))  # (256,128)
    pk["kp_w2"] = jnp.asarray(np.kron(eye_t, np.asarray(kp["w2"], f32)))  # (128,16)
    kpb = np.zeros((2, 8 * H), f32)
    kpb[0, :] = np.tile(np.asarray(kp["b1"], f32)[0], T_RNN)
    kpb[1, :T_RNN * NUM_KEYPOINTS] = np.tile(np.asarray(kp["b2"], f32)[0], T_RNN)
    pk["kp_b"] = jnp.asarray(kpb)

    # --- linear-interpolation matrix, kron'd with I_K for lane-dense output --
    mt = build_interp_matrix(T_RNN, SEQ_LEN)
    pk["mtk"] = jnp.asarray(np.kron(mt.T, np.eye(NUM_KEYPOINTS, dtype=f32)))
    return pk


@jax.jit
def hierarchical_signal_net(x_ncl, pk):
    """x_ncl: (B, IN_FEATURES, SEQ_LEN) — same layout as the PyTorch module."""
    x_cl = jnp.transpose(x_ncl, (0, 2, 1)).astype(jnp.float32)    # channels-last
    xpad = jnp.pad(x_cl, ((0, 0), (PAD_CONV, PAD_CONV), (0, 0)))  # pre-padded
    args = (xpad, pk["cw0"], pk["cw1"], pk["cw2"], pk["aff"],
            pk["p0"], pk["p1"], pk["p2"],
            pk["wih"], pk["whh"], pk["misc"],
            pk["emb_w"], pk["emb_b"],
            pk["kp_w1"], pk["kp_w2"], pk["kp_b"], pk["mtk"])
    emb, logits_flat = pl.pallas_call(
        fused_forward_kernel,
        out_shape=(jax.ShapeDtypeStruct((B, EMBED_DIM), jnp.float32),
                   jax.ShapeDtypeStruct((B, SEQ_LEN * NUM_KEYPOINTS),
                                        jnp.float32)),
        scratch_shapes=[
            pltpu.VMEM((T_RNN * B, 2 * RNN_HIDDEN), jnp.float32),   # layer-1 out
            pltpu.VMEM((B, T_RNN * 2 * RNN_HIDDEN), jnp.float32),   # layer-2 out
        ],
    )(*args)
    return emb, logits_flat.reshape(B, SEQ_LEN, NUM_KEYPOINTS)


def reference_forward(x_ncl, params, mt):
    """Pure-JAX reference with identical math, for validation."""
    PH = lax.Precision.HIGHEST
    x = jnp.transpose(x_ncl, (0, 2, 1))
    for cp in params["conv"]:
        w = cp["w"]
        k = w.shape[0]
        pad = (k - 1) // 2
        L = x.shape[1]
        xp = jnp.pad(x, ((0, 0), (pad, pad), (0, 0)))
        y = jnp.zeros((x.shape[0], L, w.shape[2]), jnp.float32)
        for i in range(k):
            y = y + jnp.einsum("blc,cd->bld", xp[:, i:i + L, :], w[i],
                               precision=PH)
        y = jnp.maximum(y + cp["b"], 0.0) * cp["scale"] + cp["shift"]
        x = jnp.max(y.reshape(y.shape[0], L // 2, 2, y.shape[2]), axis=2)

    def run_dir(x_tm, wih, whh, b):
        def step(carry, x_t):
            h, c = carry
            z = (jnp.dot(x_t, wih, precision=PH)
                 + jnp.dot(h, whh, precision=PH) + b)
            i = jax.nn.sigmoid(z[:, 0:H])
            f = jax.nn.sigmoid(z[:, H:2 * H])
            g = jnp.tanh(z[:, 2 * H:3 * H])
            o = jax.nn.sigmoid(z[:, 3 * H:4 * H])
            c = f * c + i * g
            h = o * jnp.tanh(c)
            return (h, c), h

        init = (jnp.zeros((x_tm.shape[1], H)), jnp.zeros((x_tm.shape[1], H)))
        _, hs = lax.scan(step, init, x_tm)
        return hs

    for dirs in params["lstm"]:
        x_tm = jnp.transpose(x, (1, 0, 2))
        of = run_dir(x_tm, dirs[0]["wih"], dirs[0]["whh"], dirs[0]["b"])
        ob = jnp.flip(run_dir(jnp.flip(x_tm, 0),
                              dirs[1]["wih"], dirs[1]["whh"], dirs[1]["b"]), 0)
        x = jnp.transpose(jnp.concatenate([of, ob], -1), (1, 0, 2))

    agg = jnp.mean(x, axis=1)
    ep, kp = params["emb"], params["kp"]
    emb = (jnp.dot(jnp.maximum(jnp.dot(agg, ep["w1"], precision=PH)
                               + ep["b1"], 0.0),
                   ep["w2"], precision=PH) + ep["b2"])
    hk = jnp.maximum(jnp.dot(x, kp["w1"], precision=PH) + kp["b1"], 0.0)
    kf = jnp.dot(hk, kp["w2"], precision=PH) + kp["b2"]
    logits = jnp.einsum("st,btk->bsk", mt, kf, precision=PH)
    return emb, logits


if __name__ == "__main__":
    key = jax.random.PRNGKey(0)
    pkey, xkey = jax.random.split(key)
    params = init_params(pkey)
    packed = pack_params(params)
    x = jax.random.normal(xkey, (B, IN_FEATURES, SEQ_LEN), jnp.float32)  # NCL

    emb, logits = jax.block_until_ready(hierarchical_signal_net(x, packed))

    assert emb.shape == (B, EMBED_DIM)
    assert logits.shape == (B, SEQ_LEN, NUM_KEYPOINTS)

    mt = jnp.asarray(build_interp_matrix(T_RNN, SEQ_LEN))
    ref_emb, ref_logits = reference_forward(x, params, mt)
    np.testing.assert_allclose(np.asarray(emb), np.asarray(ref_emb),
                               rtol=2e-3, atol=2e-3)
    np.testing.assert_allclose(np.asarray(logits), np.asarray(ref_logits),
                               rtol=2e-3, atol=2e-3)
    print("KERNEL_OK")
</pallas_src>

<mosaic_0001>
module attributes {stable_mosaic.version = 11 : i64} {
  func.func @fused_forward_kernel(%arg0: memref<2x72x2xf32, #tpu.memory_space<vmem>>, %arg1: memref<14x8xf32, #tpu.memory_space<vmem>>, %arg2: memref<40x16xf32, #tpu.memory_space<vmem>>, %arg3: memref<48x32xf32, #tpu.memory_space<vmem>>, %arg4: memref<9x32xf32, #tpu.memory_space<vmem>>, %arg5: memref<160x128xf32, #tpu.memory_space<vmem>>, %arg6: memref<96x64xf32, #tpu.memory_space<vmem>>, %arg7: memref<32x32xf32, #tpu.memory_space<vmem>>, %arg8: memref<64x128xf32, #tpu.memory_space<vmem>>, %arg9: memref<64x128xf32, #tpu.memory_space<vmem>>, %arg10: memref<3x128xf32, #tpu.memory_space<vmem>>, %arg11: memref<48x16xf32, #tpu.memory_space<vmem>>, %arg12: memref<2x16xf32, #tpu.memory_space<vmem>>, %arg13: memref<256x128xf32, #tpu.memory_space<vmem>>, %arg14: memref<128x16xf32, #tpu.memory_space<vmem>>, %arg15: memref<2x128xf32, #tpu.memory_space<vmem>>, %arg16: memref<16x128xf32, #tpu.memory_space<vmem>>, %arg17: memref<2x16xf32, #tpu.memory_space<vmem>>, %arg18: memref<2x128xf32, #tpu.memory_space<vmem>>, %arg19: memref<16x32xf32, #tpu.memory_space<vmem>>, %arg20: memref<2x256xf32, #tpu.memory_space<vmem>>) attributes {dimension_semantics = [], scalar_prefetch = 0 : i64, scratch_operands = 2 : i64, tpu.core_type = #tpu.core_type<tc>} {
    %c0 = arith.constant 0 : index
    %c0_0 = arith.constant 0 : index
    %0 = vector.load %arg4[%c0, %c0_0] : memref<9x32xf32, #tpu.memory_space<vmem>>, vector<9x32xf32>
    %c0_1 = arith.constant 0 : index
    %c0_2 = arith.constant 0 : index
    %c0_3 = arith.constant 0 : index
    %1 = vector.load %arg0[%c0_1, %c0_2, %c0_3] : memref<2x72x2xf32, #tpu.memory_space<vmem>>, vector<2x72x2xf32>
    %c0_4 = arith.constant 0 : index
    %c0_5 = arith.constant 0 : index
    %2 = vector.load %arg1[%c0_4, %c0_5] : memref<14x8xf32, #tpu.memory_space<vmem>>, vector<14x8xf32>
    %3 = vector.extract_strided_slice %0 {offsets = [0, 0], sizes = [1, 8], strides = [1, 1]} : vector<9x32xf32> to vector<1x8xf32>
    %4 = vector.extract_strided_slice %0 {offsets = [1, 0], sizes = [1, 8], strides = [1, 1]} : vector<9x32xf32> to vector<1x8xf32>
    %5 = vector.extract_strided_slice %0 {offsets = [2, 0], sizes = [1, 8], strides = [1, 1]} : vector<9x32xf32> to vector<1x8xf32>
    %c0_6 = arith.constant 0 : index
    %c0_7 = arith.constant 0 : index
    %6 = vector.load %arg5[%c0_6, %c0_7] : memref<160x128xf32, #tpu.memory_space<vmem>>, vector<160x128xf32>
    %7 = vector.extract_strided_slice %1 {offsets = [0, 1, 0], sizes = [2, 64, 2], strides = [1, 1, 1]} : vector<2x72x2xf32> to vector<2x64x2xf32>
    %8 = vector.extract_strided_slice %1 {offsets = [0, 2, 0], sizes = [2, 64, 2], strides = [1, 1, 1]} : vector<2x72x2xf32> to vector<2x64x2xf32>
    %9 = vector.extract_strided_slice %1 {offsets = [0, 3, 0], sizes = [2, 64, 2], strides = [1, 1, 1]} : vector<2x72x2xf32> to vector<2x64x2xf32>
    %10 = vector.extract_strided_slice %1 {offsets = [0, 4, 0], sizes = [2, 64, 2], strides = [1, 1, 1]} : vector<2x72x2xf32> to vector<2x64x2xf32>
    %11 = vector.extract_strided_slice %1 {offsets = [0, 5, 0], sizes = [2, 64, 2], strides = [1, 1, 1]} : vector<2x72x2xf32> to vector<2x64x2xf32>
    %12 = vector.extract_strided_slice %1 {offsets = [0, 6, 0], sizes = [2, 64, 2], strides = [1, 1, 1]} : vector<2x72x2xf32> to vector<2x64x2xf32>
    %13 = vector.extract_strided_slice %1 {offsets = [0, 7, 0], sizes = [2, 64, 2], strides = [1, 1, 1]} : vector<2x72x2xf32> to vector<2x64x2xf32>
    %14 = tpu.concatenate %7, %8, %9, %10, %11, %12, %13 in 2 : vector<2x64x2xf32>, vector<2x64x2xf32>, vector<2x64x2xf32>, vector<2x64x2xf32>, vector<2x64x2xf32>, vector<2x64x2xf32>, vector<2x64x2xf32> -> vector<2x64x14xf32>
    %15 = vector.shape_cast %14 : vector<2x64x14xf32> to vector<128x14xf32>
    %cst = arith.constant dense<0.000000e+00> : vector<128x8xf32>
    %16 = tpu.matmul %15, %2, %cst {dimension_numbers = #tpu.dot_dimension_numbers<[1], [0], [0], [1], [0, 0, 1, 1], [], []>} : vector<128x14xf32>, vector<14x8xf32>, vector<128x8xf32> -> vector<128x8xf32>
    %17 = vector.broadcast %3 : vector<1x8xf32> to vector<128x8xf32>
    %18 = arith.addf %16, %17 : vector<128x8xf32>
    %cst_8 = arith.constant 0.000000e+00 : f32
    %19 = vector.broadcast %cst_8 : f32 to vector<128x8xf32>
    %20 = arith.maximumf %18, %19 : vector<128x8xf32>
    %21 = vector.broadcast %4 : vector<1x8xf32> to vector<128x8xf32>
    %22 = arith.mulf %20, %21 : vector<128x8xf32>
    %23 = vector.broadcast %5 : vector<1x8xf32> to vector<128x8xf32>
    %24 = arith.addf %22, %23 : vector<128x8xf32>
    %cst_9 = arith.constant dense<0.000000e+00> : vector<160x8xf32>
    %25 = tpu.matmul %6, %24, %cst_9 {dimension_numbers = #tpu.dot_dimension_numbers<[1], [0], [0], [1], [0, 0, 1, 1], [], []>} : vector<160x128xf32>, vector<128x8xf32>, vector<160x8xf32> -> vector<160x8xf32>
    %26 = vector.extract_strided_slice %25 {offsets = [0, 0], sizes = [80, 8], strides = [1, 1]} : vector<160x8xf32> to vector<80x8xf32>
    %27 = vector.extract_strided_slice %25 {offsets = [80, 0], sizes = [80, 8], strides = [1, 1]} : vector<160x8xf32> to vector<80x8xf32>
    %28 = arith.maximumf %26, %27 : vector<80x8xf32>
    %29 = vector.shape_cast %28 : vector<80x8xf32> to vector<2x40x8xf32>
    %c0_10 = arith.constant 0 : index
    %c0_11 = arith.constant 0 : index
    %30 = vector.load %arg2[%c0_10, %c0_11] : memref<40x16xf32, #tpu.memory_space<vmem>>, vector<40x16xf32>
    %31 = vector.extract_strided_slice %0 {offsets = [3, 0], sizes = [1, 16], strides = [1, 1]} : vector<9x32xf32> to vector<1x16xf32>
    %32 = vector.extract_strided_slice %0 {offsets = [4, 0], sizes = [1, 16], strides = [1, 1]} : vector<9x32xf32> to vector<1x16xf32>
    %33 = vector.extract_strided_slice %0 {offsets = [5, 0], sizes = [1, 16], strides = [1, 1]} : vector<9x32xf32> to vector<1x16xf32>
    %c0_12 = arith.constant 0 : index
    %c0_13 = arith.constant 0 : index
    %34 = vector.load %arg6[%c0_12, %c0_13] : memref<96x64xf32, #tpu.memory_space<vmem>>, vector<96x64xf32>
    %35 = vector.extract_strided_slice %29 {offsets = [0, 2, 0], sizes = [2, 32, 8], strides = [1, 1, 1]} : vector<2x40x8xf32> to vector<2x32x8xf32>
    %36 = vector.extract_strided_slice %29 {offsets = [0, 3, 0], sizes = [2, 32, 8], strides = [1, 1, 1]} : vector<2x40x8xf32> to vector<2x32x8xf32>
    %37 = vector.extract_strided_slice %29 {offsets = [0, 4, 0], sizes = [2, 32, 8], strides = [1, 1, 1]} : vector<2x40x8xf32> to vector<2x32x8xf32>
    %38 = vector.extract_strided_slice %29 {offsets = [0, 5, 0], sizes = [2, 32, 8], strides = [1, 1, 1]} : vector<2x40x8xf32> to vector<2x32x8xf32>
    %39 = vector.extract_strided_slice %29 {offsets = [0, 6, 0], sizes = [2, 32, 8], strides = [1, 1, 1]} : vector<2x40x8xf32> to vector<2x32x8xf32>
    %40 = tpu.concatenate %35, %36, %37, %38, %39 in 2 : vector<2x32x8xf32>, vector<2x32x8xf32>, vector<2x32x8xf32>, vector<2x32x8xf32>, vector<2x32x8xf32> -> vector<2x32x40xf32>
    %41 = vector.shape_cast %40 : vector<2x32x40xf32> to vector<64x40xf32>
    %cst_14 = arith.constant dense<0.000000e+00> : vector<64x16xf32>
    %42 = tpu.matmul %41, %30, %cst_14 {dimension_numbers = #tpu.dot_dimension_numbers<[1], [0], [0], [1], [0, 0, 1, 1], [], []>} : vector<64x40xf32>, vector<40x16xf32>, vector<64x16xf32> -> vector<64x16xf32>
    %43 = vector.broadcast %31 : vector<1x16xf32> to vector<64x16xf32>
    %44 = arith.addf %42, %43 : vector<64x16xf32>
    %cst_15 = arith.constant 0.000000e+00 : f32
    %45 = vector.broadcast %cst_15 : f32 to vector<64x16xf32>
    %46 = arith.maximumf %44, %45 : vector<64x16xf32>
    %47 = vector.broadcast %32 : vector<1x16xf32> to vector<64x16xf32>
    %48 = arith.mulf %46, %47 : vector<64x16xf32>
    %49 = vector.broadcast %33 : vector<1x16xf32> to vector<64x16xf32>
    %50 = arith.addf %48, %49 : vector<64x16xf32>
    %cst_16 = arith.constant dense<0.000000e+00> : vector<96x16xf32>
    %51 = tpu.matmul %34, %50, %cst_16 {dimension_numbers = #tpu.dot_dimension_numbers<[1], [0], [0], [1], [0, 0, 1, 1], [], []>} : vector<96x64xf32>, vector<64x16xf32>, vector<96x16xf32> -> vector<96x16xf32>
    %52 = vector.extract_strided_slice %51 {offsets = [0, 0], sizes = [48, 16], strides = [1, 1]} : vector<96x16xf32> to vector<48x16xf32>
    %53 = vector.extract_strided_slice %51 {offsets = [48, 0], sizes = [48, 16], strides = [1, 1]} : vector<96x16xf32> to vector<48x16xf32>
    %54 = arith.maximumf %52, %53 : vector<48x16xf32>
    %55 = vector.shape_cast %54 : vector<48x16xf32> to vector<2x24x16xf32>
    %c0_17 = arith.constant 0 : index
    %c0_18 = arith.constant 0 : index
    %56 = vector.load %arg3[%c0_17, %c0_18] : memref<48x32xf32, #tpu.memory_space<vmem>>, vector<48x32xf32>
    %57 = vector.extract_strided_slice %0 {offsets = [6, 0], sizes = [1, 32], strides = [1, 1]} : vector<9x32xf32> to vector<1x32xf32>
    %58 = vector.extract_strided_slice %0 {offsets = [7, 0], sizes = [1, 32], strides = [1, 1]} : vector<9x32xf32> to vector<1x32xf32>
    %59 = vector.extract_strided_slice %0 {offsets = [8, 0], sizes = [1, 32], strides = [1, 1]} : vector<9x32xf32> to vector<1x32xf32>
    %c0_19 = arith.constant 0 : index
    %c0_20 = arith.constant 0 : index
    %60 = vector.load %arg7[%c0_19, %c0_20] : memref<32x32xf32, #tpu.memory_space<vmem>>, vector<32x32xf32>
    %61 = vector.extract_strided_slice %55 {offsets = [0, 3, 0], sizes = [2, 16, 16], strides = [1, 1, 1]} : vector<2x24x16xf32> to vector<2x16x16xf32>
    %62 = vector.extract_strided_slice %55 {offsets = [0, 4, 0], sizes = [2, 16, 16], strides = [1, 1, 1]} : vector<2x24x16xf32> to vector<2x16x16xf32>
    %63 = vector.extract_strided_slice %55 {offsets = [0, 5, 0], sizes = [2, 16, 16], strides = [1, 1, 1]} : vector<2x24x16xf32> to vector<2x16x16xf32>
    %64 = tpu.concatenate %61, %62, %63 in 2 : vector<2x16x16xf32>, vector<2x16x16xf32>, vector<2x16x16xf32> -> vector<2x16x48xf32>
    %65 = vector.shape_cast %64 : vector<2x16x48xf32> to vector<32x48xf32>
    %cst_21 = arith.constant dense<0.000000e+00> : vector<32x32xf32>
    %66 = tpu.matmul %65, %56, %cst_21 {dimension_numbers = #tpu.dot_dimension_numbers<[1], [0], [0], [1], [0, 0, 1, 1], [], []>} : vector<32x48xf32>, vector<48x32xf32>, vector<32x32xf32> -> vector<32x32xf32>
    %67 = vector.broadcast %57 : vector<1x32xf32> to vector<32x32xf32>
    %68 = arith.addf %66, %67 : vector<32x32xf32>
    %cst_22 = arith.constant 0.000000e+00 : f32
    %69 = vector.broadcast %cst_22 : f32 to vector<32x32xf32>
    %70 = arith.maximumf %68, %69 : vector<32x32xf32>
    %71 = vector.broadcast %58 : vector<1x32xf32> to vector<32x32xf32>
    %72 = arith.mulf %70, %71 : vector<32x32xf32>
    %73 = vector.broadcast %59 : vector<1x32xf32> to vector<32x32xf32>
    %74 = arith.addf %72, %73 : vector<32x32xf32>
    %cst_23 = arith.constant dense<0.000000e+00> : vector<32x32xf32>
    %75 = tpu.matmul %60, %74, %cst_23 {dimension_numbers = #tpu.dot_dimension_numbers<[1], [0], [0], [1], [0, 0, 1, 1], [], []>} : vector<32x32xf32>, vector<32x32xf32>, vector<32x32xf32> -> vector<32x32xf32>
    %76 = vector.extract_strided_slice %75 {offsets = [0, 0], sizes = [16, 32], strides = [1, 1]} : vector<32x32xf32> to vector<16x32xf32>
    %77 = vector.extract_strided_slice %75 {offsets = [16, 0], sizes = [16, 32], strides = [1, 1]} : vector<32x32xf32> to vector<16x32xf32>
    %78 = arith.maximumf %76, %77 : vector<16x32xf32>
    %c2 = arith.constant 2 : index
    %c0_24 = arith.constant 0 : index
    %79 = vector.load %arg10[%c2, %c0_24] : memref<3x128xf32, #tpu.memory_space<vmem>>, vector<1x128xf32>
    %c0_25 = arith.constant 0 : index
    %c0_26 = arith.constant 0 : index
    %80 = vector.load %arg8[%c0_25, %c0_26] : memref<64x128xf32, #tpu.memory_space<vmem>>, vector<32x128xf32>
    %c0_27 = arith.constant 0 : index
    %c0_28 = arith.constant 0 : index
    %81 = vector.load %arg9[%c0_27, %c0_28] : memref<64x128xf32, #tpu.memory_space<vmem>>, vector<32x128xf32>
    %c0_29 = arith.constant 0 : index
    %c0_30 = arith.constant 0 : index
    %82 = vector.load %arg10[%c0_29, %c0_30] : memref<3x128xf32, #tpu.memory_space<vmem>>, vector<1x128xf32>
    %cst_31 = arith.constant dense<0.000000e+00> : vector<16x128xf32>
    %83 = tpu.matmul %78, %80, %cst_31 {dimension_numbers = #tpu.dot_dimension_numbers<[1], [0], [0], [1], [0, 0, 1, 1], [], []>} : vector<16x32xf32>, vector<32x128xf32>, vector<16x128xf32> -> vector<16x128xf32>
    %84 = vector.broadcast %82 : vector<1x128xf32> to vector<16x128xf32>
    %85 = arith.addf %83, %84 : vector<16x128xf32>
    %cst_32 = arith.constant 1.000000e+00 : f32
    %86 = vector.broadcast %cst_32 : f32 to vector<1x128xf32>
    %87 = arith.subf %86, %79 : vector<1x128xf32>
    %cst_33 = arith.constant 0.000000e+00 : f32
    %88 = vector.broadcast %cst_33 : f32 to vector<2x32xf32>
    %cst_34 = arith.constant 0.000000e+00 : f32
    %89 = vector.broadcast %cst_34 : f32 to vector<2x32xf32>
    %90 = vector.extract_strided_slice %85 {offsets = [0, 0], sizes = [2, 128], strides = [1, 1]} : vector<16x128xf32> to vector<2x128xf32>
    %91 = vector.broadcast %79 : vector<1x128xf32> to vector<2x128xf32>
    %92 = arith.mulf %90, %91 : vector<2x128xf32>
    %93 = vector.extract_strided_slice %85 {offsets = [14, 0], sizes = [2, 128], strides = [1, 1]} : vector<16x128xf32> to vector<2x128xf32>
    %94 = vector.broadcast %87 : vector<1x128xf32> to vector<2x128xf32>
    %95 = arith.mulf %93, %94 : vector<2x128xf32>
    %96 = arith.addf %92, %95 : vector<2x128xf32>
    %cst_35 = arith.constant dense<0.000000e+00> : vector<2x128xf32>
    %97 = tpu.matmul %88, %81, %cst_35 {dimension_numbers = #tpu.dot_dimension_numbers<[1], [0], [0], [1], [0, 0, 1, 1], [], []>} : vector<2x32xf32>, vector<32x128xf32>, vector<2x128xf32> -> vector<2x128xf32>
    %98 = arith.addf %96, %97 : vector<2x128xf32>
    %99 = arith.negf %98 : vector<2x128xf32>
    %100 = math.exp %99 : vector<2x128xf32>
    %cst_36 = arith.constant 1.000000e+00 : f32
    %101 = vector.broadcast %cst_36 : f32 to vector<2x128xf32>
    %102 = arith.addf %101, %100 : vector<2x128xf32>
    %103 = arith.divf %101, %102 : vector<2x128xf32>
    %104 = vector.extract_strided_slice %103 {offsets = [0, 0], sizes = [2, 32], strides = [1, 1]} : vector<2x128xf32> to vector<2x32xf32>
    %105 = vector.extract_strided_slice %103 {offsets = [0, 32], sizes = [2, 32], strides = [1, 1]} : vector<2x128xf32> to vector<2x32xf32>
    %106 = vector.extract_strided_slice %103 {offsets = [0, 96], sizes = [2, 32], strides = [1, 1]} : vector<2x128xf32> to vector<2x32xf32>
    %107 = vector.extract_strided_slice %98 {offsets = [0, 64], sizes = [2, 32], strides = [1, 1]} : vector<2x128xf32> to vector<2x32xf32>
    %108 = math.tanh %107 : vector<2x32xf32>
    %109 = arith.mulf %105, %89 : vector<2x32xf32>
    %110 = arith.mulf %104, %108 : vector<2x32xf32>
    %111 = arith.addf %109, %110 : vector<2x32xf32>
    %112 = math.tanh %111 : vector<2x32xf32>
    %113 = arith.mulf %106, %112 : vector<2x32xf32>
    %114 = vector.extract_strided_slice %113 {offsets = [0, 0], sizes = [2, 16], strides = [1, 1]} : vector<2x32xf32> to vector<2x16xf32>
    %c0_37 = arith.constant 0 : index
    %c0_38 = arith.constant 0 : index
    %115 = vector.load %arg19[%c0_37, %c0_38] : memref<16x32xf32, #tpu.memory_space<vmem>>, vector<2x16xf32>
    tpu.vector_store %arg19[%c0_37, %c0_38], %114 {strides = array<i32>} : memref<16x32xf32, #tpu.memory_space<vmem>>, vector<2x16xf32>,
    %116 = vector.extract_strided_slice %113 {offsets = [0, 16], sizes = [2, 16], strides = [1, 1]} : vector<2x32xf32> to vector<2x16xf32>
    %c14 = arith.constant 14 : index
    %c16 = arith.constant 16 : index
    %117 = vector.load %arg19[%c14, %c16] : memref<16x32xf32, #tpu.memory_space<vmem>>, vector<2x16xf32>
    tpu.vector_store %arg19[%c14, %c16], %116 {strides = array<i32>} : memref<16x32xf32, #tpu.memory_space<vmem>>, vector<2x16xf32>,
    %118 = vector.extract_strided_slice %85 {offsets = [2, 0], sizes = [2, 128], strides = [1, 1]} : vector<16x128xf32> to vector<2x128xf32>
    %119 = vector.broadcast %79 : vector<1x128xf32> to vector<2x128xf32>
    %120 = arith.mulf %118, %119 : vector<2x128xf32>
    %121 = vector.extract_strided_slice %85 {offsets = [12, 0], sizes = [2, 128], strides = [1, 1]} : vector<16x128xf32> to vector<2x128xf32>
    %122 = vector.broadcast %87 : vector<1x128xf32> to vector<2x128xf32>
    %123 = arith.mulf %121, %122 : vector<2x128xf32>
    %124 = arith.addf %120, %123 : vector<2x128xf32>
    %cst_39 = arith.constant dense<0.000000e+00> : vector<2x128xf32>
    %125 = tpu.matmul %113, %81, %cst_39 {dimension_numbers = #tpu.dot_dimension_numbers<[1], [0], [0], [1], [0, 0, 1, 1], [], []>} : vector<2x32xf32>, vector<32x128xf32>, vector<2x128xf32> -> vector<2x128xf32>
    %126 = arith.addf %124, %125 : vector<2x128xf32>
    %127 = arith.negf %126 : vector<2x128xf32>
    %128 = math.exp %127 : vector<2x128xf32>
    %cst_40 = arith.constant 1.000000e+00 : f32
    %129 = vector.broadcast %cst_40 : f32 to vector<2x128xf32>
    %130 = arith.addf %129, %128 : vector<2x128xf32>
    %131 = arith.divf %129, %130 : vector<2x128xf32>
    %132 = vector.extract_strided_slice %131 {offsets = [0, 0], sizes = [2, 32], strides = [1, 1]} : vector<2x128xf32> to vector<2x32xf32>
    %133 = vector.extract_strided_slice %131 {offsets = [0, 32], sizes = [2, 32], strides = [1, 1]} : vector<2x128xf32> to vector<2x32xf32>
    %134 = vector.extract_strided_slice %131 {offsets = [0, 96], sizes = [2, 32], strides = [1, 1]} : vector<2x128xf32> to vector<2x32xf32>
    %135 = vector.extract_strided_slice %126 {offsets = [0, 64], sizes = [2, 32], strides = [1, 1]} : vector<2x128xf32> to vector<2x32xf32>
    %136 = math.tanh %135 : vector<2x32xf32>
    %137 = arith.mulf %133, %111 : vector<2x32xf32>
    %138 = arith.mulf %132, %136 : vector<2x32xf32>
    %139 = arith.addf %137, %138 : vector<2x32xf32>
    %140 = math.tanh %139 : vector<2x32xf32>
    %141 = arith.mulf %134, %140 : vector<2x32xf32>
    %142 = vector.extract_strided_slice %141 {offsets = [0, 0], sizes = [2, 16], strides = [1, 1]} : vector<2x32xf32> to vector<2x16xf32>
    %c2_41 = arith.constant 2 : index
    %c0_42 = arith.constant 0 : index
    %143 = vector.load %arg19[%c2_41, %c0_42] : memref<16x32xf32, #tpu.memory_space<vmem>>, vector<2x16xf32>
    tpu.vector_store %arg19[%c2_41, %c0_42], %142 {strides = array<i32>} : memref<16x32xf32, #tpu.memory_space<vmem>>, vector<2x16xf32>,
    %144 = vector.extract_strided_slice %141 {offsets = [0, 16], sizes = [2, 16], strides = [1, 1]} : vector<2x32xf32> to vector<2x16xf32>
    %c12 = arith.constant 12 : index
    %c16_43 = arith.constant 16 : index
    %145 = vector.load %arg19[%c12, %c16_43] : memref<16x32xf32, #tpu.memory_space<vmem>>, vector<2x16xf32>
    tpu.vector_store %arg19[%c12, %c16_43], %144 {strides = array<i32>} : memref<16x32xf32, #tpu.memory_space<vmem>>, vector<2x16xf32>,
    %146 = vector.extract_strided_slice %85 {offsets = [4, 0], sizes = [2, 128], strides = [1, 1]} : vector<16x128xf32> to vector<2x128xf32>
    %147 = vector.broadcast %79 : vector<1x128xf32> to vector<2x128xf32>
    %148 = arith.mulf %146, %147 : vector<2x128xf32>
    %149 = vector.extract_strided_slice %85 {offsets = [10, 0], sizes = [2, 128], strides = [1, 1]} : vector<16x128xf32> to vector<2x128xf32>
    %150 = vector.broadcast %87 : vector<1x128xf32> to vector<2x128xf32>
    %151 = arith.mulf %149, %150 : vector<2x128xf32>
    %152 = arith.addf %148, %151 : vector<2x128xf32>
    %cst_44 = arith.constant dense<0.000000e+00> : vector<2x128xf32>
    %153 = tpu.matmul %141, %81, %cst_44 {dimension_numbers = #tpu.dot_dimension_numbers<[1], [0], [0], [1], [0, 0, 1, 1], [], []>} : vector<2x32xf32>, vector<32x128xf32>, vector<2x128xf32> -> vector<2x128xf32>
    %154 = arith.addf %152, %153 : vector<2x128xf32>
    %155 = arith.negf %154 : vector<2x128xf32>
    %156 = math.exp %155 : vector<2x128xf32>
    %cst_45 = arith.constant 1.000000e+00 : f32
    %157 = vector.broadcast %cst_45 : f32 to vector<2x128xf32>
    %158 = arith.addf %157, %156 : vector<2x128xf32>
    %159 = arith.divf %157, %158 : vector<2x128xf32>
    %160 = vector.extract_strided_slice %159 {offsets = [0, 0], sizes = [2, 32], strides = [1, 1]} : vector<2x128xf32> to vector<2x32xf32>
    %161 = vector.extract_strided_slice %159 {offsets = [0, 32], sizes = [2, 32], strides = [1, 1]} : vector<2x128xf32> to vector<2x32xf32>
    %162 = vector.extract_strided_slice %159 {offsets = [0, 96], sizes = [2, 32], strides = [1, 1]} : vector<2x128xf32> to vector<2x32xf32>
    %163 = vector.extract_strided_slice %154 {offsets = [0, 64], sizes = [2, 32], strides = [1, 1]} : vector<2x128xf32> to vector<2x32xf32>
    %164 = math.tanh %163 : vector<2x32xf32>
    %165 = arith.mulf %161, %139 : vector<2x32xf32>
    %166 = arith.mulf %160, %164 : vector<2x32xf32>
    %167 = arith.addf %165, %166 : vector<2x32xf32>
    %168 = math.tanh %167 : vector<2x32xf32>
    %169 = arith.mulf %162, %168 : vector<2x32xf32>
    %170 = vector.extract_strided_slice %169 {offsets = [0, 0], sizes = [2, 16], strides = [1, 1]} : vector<2x32xf32> to vector<2x16xf32>
    %c4 = arith.constant 4 : index
    %c0_46 = arith.constant 0 : index
    %171 = vector.load %arg19[%c4, %c0_46] : memref<16x32xf32, #tpu.memory_space<vmem>>, vector<2x16xf32>
    tpu.vector_store %arg19[%c4, %c0_46], %170 {strides = array<i32>} : memref<16x32xf32, #tpu.memory_space<vmem>>, vector<2x16xf32>,
    %172 = vector.extract_strided_slice %169 {offsets = [0, 16], sizes = [2, 16], strides = [1, 1]} : vector<2x32xf32> to vector<2x16xf32>
    %c10 = arith.constant 10 : index
    %c16_47 = arith.constant 16 : index
    %173 = vector.load %arg19[%c10, %c16_47] : memref<16x32xf32, #tpu.memory_space<vmem>>, vector<2x16xf32>
    tpu.vector_store %arg19[%c10, %c16_47], %172 {strides = array<i32>} : memref<16x32xf32, #tpu.memory_space<vmem>>, vector<2x16xf32>,
    %174 = vector.extract_strided_slice %85 {offsets = [6, 0], sizes = [2, 128], strides = [1, 1]} : vector<16x128xf32> to vector<2x128xf32>
    %175 = vector.broadcast %79 : vector<1x128xf32> to vector<2x128xf32>
    %176 = arith.mulf %174, %175 : vector<2x128xf32>
    %177 = vector.extract_strided_slice %85 {offsets = [8, 0], sizes = [2, 128], strides = [1, 1]} : vector<16x128xf32> to vector<2x128xf32>
    %178 = vector.broadcast %87 : vector<1x128xf32> to vector<2x128xf32>
    %179 = arith.mulf %177, %178 : vector<2x128xf32>
    %180 = arith.addf %176, %179 : vector<2x128xf32>
    %cst_48 = arith.constant dense<0.000000e+00> : vector<2x128xf32>
    %181 = tpu.matmul %169, %81, %cst_48 {dimension_numbers = #tpu.dot_dimension_numbers<[1], [0], [0], [1], [0, 0, 1, 1], [], []>} : vector<2x32xf32>, vector<32x128xf32>, vector<2x128xf32> -> vector<2x128xf32>
    %182 = arith.addf %180, %181 : vector<2x128xf32>
    %183 = arith.negf %182 : vector<2x128xf32>
    %184 = math.exp %183 : vector<2x128xf32>
    %cst_49 = arith.constant 1.000000e+00 : f32
    %185 = vector.broadcast %cst_49 : f32 to vector<2x128xf32>
    %186 = arith.addf %185, %184 : vector<2x128xf32>
    %187 = arith.divf %185, %186 : vector<2x128xf32>
    %188 = vector.extract_strided_slice %187 {offsets = [0, 0], sizes = [2, 32], strides = [1, 1]} : vector<2x128xf32> to vector<2x32xf32>
    %189 = vector.extract_strided_slice %187 {offsets = [0, 32], sizes = [2, 32], strides = [1, 1]} : vector<2x128xf32> to vector<2x32xf32>
    %190 = vector.extract_strided_slice %187 {offsets = [0, 96], sizes = [2, 32], strides = [1, 1]} : vector<2x128xf32> to vector<2x32xf32>
    %191 = vector.extract_strided_slice %182 {offsets = [0, 64], sizes = [2, 32], strides = [1, 1]} : vector<2x128xf32> to vector<2x32xf32>
    %192 = math.tanh %191 : vector<2x32xf32>
    %193 = arith.mulf %189, %167 : vector<2x32xf32>
    %194 = arith.mulf %188, %192 : vector<2x32xf32>
    %195 = arith.addf %193, %194 : vector<2x32xf32>
    %196 = math.tanh %195 : vector<2x32xf32>
    %197 = arith.mulf %190, %196 : vector<2x32xf32>
    %198 = vector.extract_strided_slice %197 {offsets = [0, 0], sizes = [2, 16], strides = [1, 1]} : vector<2x32xf32> to vector<2x16xf32>
    %c6 = arith.constant 6 : index
    %c0_50 = arith.constant 0 : index
    %199 = vector.load %arg19[%c6, %c0_50] : memref<16x32xf32, #tpu.memory_space<vmem>>, vector<2x16xf32>
    tpu.vector_store %arg19[%c6, %c0_50], %198 {strides = array<i32>} : memref<16x32xf32, #tpu.memory_space<vmem>>, vector<2x16xf32>,
    %200 = vector.extract_strided_slice %197 {offsets = [0, 16], sizes = [2, 16], strides = [1, 1]} : vector<2x32xf32> to vector<2x16xf32>
    %c8 = arith.constant 8 : index
    %c16_51 = arith.constant 16 : index
    %201 = vector.load %arg19[%c8, %c16_51] : memref<16x32xf32, #tpu.memory_space<vmem>>, vector<2x16xf32>
    tpu.vector_store %arg19[%c8, %c16_51], %200 {strides = array<i32>} : memref<16x32xf32, #tpu.memory_space<vmem>>, vector<2x16xf32>,
    %202 = vector.extract_strided_slice %85 {offsets = [8, 0], sizes = [2, 128], strides = [1, 1]} : vector<16x128xf32> to vector<2x128xf32>
    %203 = vector.broadcast %79 : vector<1x128xf32> to vector<2x128xf32>
    %204 = arith.mulf %202, %203 : vector<2x128xf32>
    %205 = vector.extract_strided_slice %85 {offsets = [6, 0], sizes = [2, 128], strides = [1, 1]} : vector<16x128xf32> to vector<2x128xf32>
    %206 = vector.broadcast %87 : vector<1x128xf32> to vector<2x128xf32>
    %207 = arith.mulf %205, %206 : vector<2x128xf32>
    %208 = arith.addf %204, %207 : vector<2x128xf32>
    %cst_52 = arith.constant dense<0.000000e+00> : vector<2x128xf32>
    %209 = tpu.matmul %197, %81, %cst_52 {dimension_numbers = #tpu.dot_dimension_numbers<[1], [0], [0], [1], [0, 0, 1, 1], [], []>} : vector<2x32xf32>, vector<32x128xf32>, vector<2x128xf32> -> vector<2x128xf32>
    %210 = arith.addf %208, %209 : vector<2x128xf32>
    %211 = arith.negf %210 : vector<2x128xf32>
    %212 = math.exp %211 : vector<2x128xf32>
    %cst_53 = arith.constant 1.000000e+00 : f32
    %213 = vector.broadcast %cst_53 : f32 to vector<2x128xf32>
    %214 = arith.addf %213, %212 : vector<2x128xf32>
    %215 = arith.divf %213, %214 : vector<2x128xf32>
    %216 = vector.extract_strided_slice %215 {offsets = [0, 0], sizes = [2, 32], strides = [1, 1]} : vector<2x128xf32> to vector<2x32xf32>
    %217 = vector.extract_strided_slice %215 {offsets = [0, 32], sizes = [2, 32], strides = [1, 1]} : vector<2x128xf32> to vector<2x32xf32>
    %218 = vector.extract_strided_slice %215 {offsets = [0, 96], sizes = [2, 32], strides = [1, 1]} : vector<2x128xf32> to vector<2x32xf32>
    %219 = vector.extract_strided_slice %210 {offsets = [0, 64], sizes = [2, 32], strides = [1, 1]} : vector<2x128xf32> to vector<2x32xf32>
    %220 = math.tanh %219 : vector<2x32xf32>
    %221 = arith.mulf %217, %195 : vector<2x32xf32>
    %222 = arith.mulf %216, %220 : vector<2x32xf32>
    %223 = arith.addf %221, %222 : vector<2x32xf32>
    %224 = math.tanh %223 : vector<2x32xf32>
    %225 = arith.mulf %218, %224 : vector<2x32xf32>
    %226 = vector.extract_strided_slice %225 {offsets = [0, 0], sizes = [2, 16], strides = [1, 1]} : vector<2x32xf32> to vector<2x16xf32>
    %c8_54 = arith.constant 8 : index
    %c0_55 = arith.constant 0 : index
    %227 = vector.load %arg19[%c8_54, %c0_55] : memref<16x32xf32, #tpu.memory_space<vmem>>, vector<2x16xf32>
    tpu.vector_store %arg19[%c8_54, %c0_55], %226 {strides = array<i32>} : memref<16x32xf32, #tpu.memory_space<vmem>>, vector<2x16xf32>,
    %228 = vector.extract_strided_slice %225 {offsets = [0, 16], sizes = [2, 16], strides = [1, 1]} : vector<2x32xf32> to vector<2x16xf32>
    %c6_56 = arith.constant 6 : index
    %c16_57 = arith.constant 16 : index
    %229 = vector.load %arg19[%c6_56, %c16_57] : memref<16x32xf32, #tpu.memory_space<vmem>>, vector<2x16xf32>
    tpu.vector_store %arg19[%c6_56, %c16_57], %228 {strides = array<i32>} : memref<16x32xf32, #tpu.memory_space<vmem>>, vector<2x16xf32>,
    %230 = vector.extract_strided_slice %85 {offsets = [10, 0], sizes = [2, 128], strides = [1, 1]} : vector<16x128xf32> to vector<2x128xf32>
    %231 = vector.broadcast %79 : vector<1x128xf32> to vector<2x128xf32>
    %232 = arith.mulf %230, %231 : vector<2x128xf32>
    %233 = vector.extract_strided_slice %85 {offsets = [4, 0], sizes = [2, 128], strides = [1, 1]} : vector<16x128xf32> to vector<2x128xf32>
    %234 = vector.broadcast %87 : vector<1x128xf32> to vector<2x128xf32>
    %235 = arith.mulf %233, %234 : vector<2x128xf32>
    %236 = arith.addf %232, %235 : vector<2x128xf32>
    %cst_58 = arith.constant dense<0.000000e+00> : vector<2x128xf32>
    %237 = tpu.matmul %225, %81, %cst_58 {dimension_numbers = #tpu.dot_dimension_numbers<[1], [0], [0], [1], [0, 0, 1, 1], [], []>} : vector<2x32xf32>, vector<32x128xf32>, vector<2x128xf32> -> vector<2x128xf32>
    %238 = arith.addf %236, %237 : vector<2x128xf32>
    %239 = arith.negf %238 : vector<2x128xf32>
    %240 = math.exp %239 : vector<2x128xf32>
    %cst_59 = arith.constant 1.000000e+00 : f32
    %241 = vector.broadcast %cst_59 : f32 to vector<2x128xf32>
    %242 = arith.addf %241, %240 : vector<2x128xf32>
    %243 = arith.divf %241, %242 : vector<2x128xf32>
    %244 = vector.extract_strided_slice %243 {offsets = [0, 0], sizes = [2, 32], strides = [1, 1]} : vector<2x128xf32> to vector<2x32xf32>
    %245 = vector.extract_strided_slice %243 {offsets = [0, 32], sizes = [2, 32], strides = [1, 1]} : vector<2x128xf32> to vector<2x32xf32>
    %246 = vector.extract_strided_slice %243 {offsets = [0, 96], sizes = [2, 32], strides = [1, 1]} : vector<2x128xf32> to vector<2x32xf32>
    %247 = vector.extract_strided_slice %238 {offsets = [0, 64], sizes = [2, 32], strides = [1, 1]} : vector<2x128xf32> to vector<2x32xf32>
    %248 = math.tanh %247 : vector<2x32xf32>
    %249 = arith.mulf %245, %223 : vector<2x32xf32>
    %250 = arith.mulf %244, %248 : vector<2x32xf32>
    %251 = arith.addf %249, %250 : vector<2x32xf32>
    %252 = math.tanh %251 : vector<2x32xf32>
    %253 = arith.mulf %246, %252 : vector<2x32xf32>
    %254 = vector.extract_strided_slice %253 {offsets = [0, 0], sizes = [2, 16], strides = [1, 1]} : vector<2x32xf32> to vector<2x16xf32>
    %c10_60 = arith.constant 10 : index
    %c0_61 = arith.constant 0 : index
    %255 = vector.load %arg19[%c10_60, %c0_61] : memref<16x32xf32, #tpu.memory_space<vmem>>, vector<2x16xf32>
    tpu.vector_store %arg19[%c10_60, %c0_61], %254 {strides = array<i32>} : memref<16x32xf32, #tpu.memory_space<vmem>>, vector<2x16xf32>,
    %256 = vector.extract_strided_slice %253 {offsets = [0, 16], sizes = [2, 16], strides = [1, 1]} : vector<2x32xf32> to vector<2x16xf32>
    %c4_62 = arith.constant 4 : index
    %c16_63 = arith.constant 16 : index
    %257 = vector.load %arg19[%c4_62, %c16_63] : memref<16x32xf32, #tpu.memory_space<vmem>>, vector<2x16xf32>
    tpu.vector_store %arg19[%c4_62, %c16_63], %256 {strides = array<i32>} : memref<16x32xf32, #tpu.memory_space<vmem>>, vector<2x16xf32>,
    %258 = vector.extract_strided_slice %85 {offsets = [12, 0], sizes = [2, 128], strides = [1, 1]} : vector<16x128xf32> to vector<2x128xf32>
    %259 = vector.broadcast %79 : vector<1x128xf32> to vector<2x128xf32>
    %260 = arith.mulf %258, %259 : vector<2x128xf32>
    %261 = vector.extract_strided_slice %85 {offsets = [2, 0], sizes = [2, 128], strides = [1, 1]} : vector<16x128xf32> to vector<2x128xf32>
    %262 = vector.broadcast %87 : vector<1x128xf32> to vector<2x128xf32>
    %263 = arith.mulf %261, %262 : vector<2x128xf32>
    %264 = arith.addf %260, %263 : vector<2x128xf32>
    %cst_64 = arith.constant dense<0.000000e+00> : vector<2x128xf32>
    %265 = tpu.matmul %253, %81, %cst_64 {dimension_numbers = #tpu.dot_dimension_numbers<[1], [0], [0], [1], [0, 0, 1, 1], [], []>} : vector<2x32xf32>, vector<32x128xf32>, vector<2x128xf32> -> vector<2x128xf32>
    %266 = arith.addf %264, %265 : vector<2x128xf32>
    %267 = arith.negf %266 : vector<2x128xf32>
    %268 = math.exp %267 : vector<2x128xf32>
    %cst_65 = arith.constant 1.000000e+00 : f32
    %269 = vector.broadcast %cst_65 : f32 to vector<2x128xf32>
    %270 = arith.addf %269, %268 : vector<2x128xf32>
    %271 = arith.divf %269, %270 : vector<2x128xf32>
    %272 = vector.extract_strided_slice %271 {offsets = [0, 0], sizes = [2, 32], strides = [1, 1]} : vector<2x128xf32> to vector<2x32xf32>
    %273 = vector.extract_strided_slice %271 {offsets = [0, 32], sizes = [2, 32], strides = [1, 1]} : vector<2x128xf32> to vector<2x32xf32>
    %274 = vector.extract_strided_slice %271 {offsets = [0, 96], sizes = [2, 32], strides = [1, 1]} : vector<2x128xf32> to vector<2x32xf32>
    %275 = vector.extract_strided_slice %266 {offsets = [0, 64], sizes = [2, 32], strides = [1, 1]} : vector<2x128xf32> to vector<2x32xf32>
    %276 = math.tanh %275 : vector<2x32xf32>
    %277 = arith.mulf %273, %251 : vector<2x32xf32>
    %278 = arith.mulf %272, %276 : vector<2x32xf32>
    %279 = arith.addf %277, %278 : vector<2x32xf32>
    %280 = math.tanh %279 : vector<2x32xf32>
    %281 = arith.mulf %274, %280 : vector<2x32xf32>
    %282 = vector.extract_strided_slice %281 {offsets = [0, 0], sizes = [2, 16], strides = [1, 1]} : vector<2x32xf32> to vector<2x16xf32>
    %c12_66 = arith.constant 12 : index
    %c0_67 = arith.constant 0 : index
    %283 = vector.load %arg19[%c12_66, %c0_67] : memref<16x32xf32, #tpu.memory_space<vmem>>, vector<2x16xf32>
    tpu.vector_store %arg19[%c12_66, %c0_67], %282 {strides = array<i32>} : memref<16x32xf32, #tpu.memory_space<vmem>>, vector<2x16xf32>,
    %284 = vector.extract_strided_slice %281 {offsets = [0, 16], sizes = [2, 16], strides = [1, 1]} : vector<2x32xf32> to vector<2x16xf32>
    %c2_68 = arith.constant 2 : index
    %c16_69 = arith.constant 16 : index
    %285 = vector.load %arg19[%c2_68, %c16_69] : memref<16x32xf32, #tpu.memory_space<vmem>>, vector<2x16xf32>
    tpu.vector_store %arg19[%c2_68, %c16_69], %284 {strides = array<i32>} : memref<16x32xf32, #tpu.memory_space<vmem>>, vector<2x16xf32>,
    %286 = vector.extract_strided_slice %85 {offsets = [14, 0], sizes = [2, 128], strides = [1, 1]} : vector<16x128xf32> to vector<2x128xf32>
    %287 = vector.broadcast %79 : vector<1x128xf32> to vector<2x128xf32>
    %288 = arith.mulf %286, %287 : vector<2x128xf32>
    %289 = vector.extract_strided_slice %85 {offsets = [0, 0], sizes = [2, 128], strides = [1, 1]} : vector<16x128xf32> to vector<2x128xf32>
    %290 = vector.broadcast %87 : vector<1x128xf32> to vector<2x128xf32>
    %291 = arith.mulf %289, %290 : vector<2x128xf32>
    %292 = arith.addf %288, %291 : vector<2x128xf32>
    %cst_70 = arith.constant dense<0.000000e+00> : vector<2x128xf32>
    %293 = tpu.matmul %281, %81, %cst_70 {dimension_numbers = #tpu.dot_dimension_numbers<[1], [0], [0], [1], [0, 0, 1, 1], [], []>} : vector<2x32xf32>, vector<32x128xf32>, vector<2x128xf32> -> vector<2x128xf32>
    %294 = arith.addf %292, %293 : vector<2x128xf32>
    %295 = arith.negf %294 : vector<2x128xf32>
    %296 = math.exp %295 : vector<2x128xf32>
    %cst_71 = arith.constant 1.000000e+00 : f32
    %297 = vector.broadcast %cst_71 : f32 to vector<2x128xf32>
    %298 = arith.addf %297, %296 : vector<2x128xf32>
    %299 = arith.divf %297, %298 : vector<2x128xf32>
    %300 = vector.extract_strided_slice %299 {offsets = [0, 0], sizes = [2, 32], strides = [1, 1]} : vector<2x128xf32> to vector<2x32xf32>
    %301 = vector.extract_strided_slice %299 {offsets = [0, 32], sizes = [2, 32], strides = [1, 1]} : vector<2x128xf32> to vector<2x32xf32>
    %302 = vector.extract_strided_slice %299 {offsets = [0, 96], sizes = [2, 32], strides = [1, 1]} : vector<2x128xf32> to vector<2x32xf32>
    %303 = vector.extract_strided_slice %294 {offsets = [0, 64], sizes = [2, 32], strides = [1, 1]} : vector<2x128xf32> to vector<2x32xf32>
    %304 = math.tanh %303 : vector<2x32xf32>
    %305 = arith.mulf %301, %279 : vector<2x32xf32>
    %306 = arith.mulf %300, %304 : vector<2x32xf32>
    %307 = arith.addf %305, %306 : vector<2x32xf32>
    %308 = math.tanh %307 : vector<2x32xf32>
    %309 = arith.mulf %302, %308 : vector<2x32xf32>
    %310 = vector.extract_strided_slice %309 {offsets = [0, 0], sizes = [2, 16], strides = [1, 1]} : vector<2x32xf32> to vector<2x16xf32>
    %c14_72 = arith.constant 14 : index
    %c0_73 = arith.constant 0 : index
    %311 = vector.load %arg19[%c14_72, %c0_73] : memref<16x32xf32, #tpu.memory_space<vmem>>, vector<2x16xf32>
    tpu.vector_store %arg19[%c14_72, %c0_73], %310 {strides = array<i32>} : memref<16x32xf32, #tpu.memory_space<vmem>>, vector<2x16xf32>,
    %312 = vector.extract_strided_slice %309 {offsets = [0, 16], sizes = [2, 16], strides = [1, 1]} : vector<2x32xf32> to vector<2x16xf32>
    %c0_74 = arith.constant 0 : index
    %c16_75 = arith.constant 16 : index
    %313 = vector.load %arg19[%c0_74, %c16_75] : memref<16x32xf32, #tpu.memory_space<vmem>>, vector<2x16xf32>
    tpu.vector_store %arg19[%c0_74, %c16_75], %312 {strides = array<i32>} : memref<16x32xf32, #tpu.memory_space<vmem>>, vector<2x16xf32>,
    %c0_76 = arith.constant 0 : index
    %c0_77 = arith.constant 0 : index
    %314 = vector.load %arg19[%c0_76, %c0_77] : memref<16x32xf32, #tpu.memory_space<vmem>>, vector<16x32xf32>
    %c32 = arith.constant 32 : index
    %c0_78 = arith.constant 0 : index
    %315 = vector.load %arg8[%c32, %c0_78] : memref<64x128xf32, #tpu.memory_space<vmem>>, vector<32x128xf32>
    %c32_79 = arith.constant 32 : index
    %c0_80 = arith.constant 0 : index
    %316 = vector.load %arg9[%c32_79, %c0_80] : memref<64x128xf32, #tpu.memory_space<vmem>>, vector<32x128xf32>
    %c1 = arith.constant 1 : index
    %c0_81 = arith.constant 0 : index
    %317 = vector.load %arg10[%c1, %c0_81] : memref<3x128xf32, #tpu.memory_space<vmem>>, vector<1x128xf32>
    %cst_82 = arith.constant dense<0.000000e+00> : vector<16x128xf32>
    %318 = tpu.matmul %314, %315, %cst_82 {dimension_numbers = #tpu.dot_dimension_numbers<[1], [0], [0], [1], [0, 0, 1, 1], [], []>} : vector<16x32xf32>, vector<32x128xf32>, vector<16x128xf32> -> vector<16x128xf32>
    %319 = vector.broadcast %317 : vector<1x128xf32> to vector<16x128xf32>
    %320 = arith.addf %318, %319 : vector<16x128xf32>
    %cst_83 = arith.constant 1.000000e+00 : f32
    %321 = vector.broadcast %cst_83 : f32 to vector<1x128xf32>
    %322 = arith.subf %321, %79 : vector<1x128xf32>
    %cst_84 = arith.constant 0.000000e+00 : f32
    %323 = vector.broadcast %cst_84 : f32 to vector<2x32xf32>
    %cst_85 = arith.constant 0.000000e+00 : f32
    %324 = vector.broadcast %cst_85 : f32 to vector<2x32xf32>
    %cst_86 = arith.constant 0.000000e+00 : f32
    %325 = vector.broadcast %cst_86 : f32 to vector<2x32xf32>
    %326 = vector.extract_strided_slice %320 {offsets = [0, 0], sizes = [2, 128], strides = [1, 1]} : vector<16x128xf32> to vector<2x128xf32>
    %327 = vector.broadcast %79 : vector<1x128xf32> to vector<2x128xf32>
    %328 = arith.mulf %326, %327 : vector<2x128xf32>
    %329 = vector.extract_strided_slice %320 {offsets = [14, 0], sizes = [2, 128], strides = [1, 1]} : vector<16x128xf32> to vector<2x128xf32>
    %330 = vector.broadcast %322 : vector<1x128xf32> to vector<2x128xf32>
    %331 = arith.mulf %329, %330 : vector<2x128xf32>
    %332 = arith.addf %328, %331 : vector<2x128xf32>
    %cst_87 = arith.constant dense<0.000000e+00> : vector<2x128xf32>
    %333 = tpu.matmul %323, %316, %cst_87 {dimension_numbers = #tpu.dot_dimension_numbers<[1], [0], [0], [1], [0, 0, 1, 1], [], []>} : vector<2x32xf32>, vector<32x128xf32>, vector<2x128xf32> -> vector<2x128xf32>
    %334 = arith.addf %332, %333 : vector<2x128xf32>
    %335 = arith.negf %334 : vector<2x128xf32>
    %336 = math.exp %335 : vector<2x128xf32>
    %cst_88 = arith.constant 1.000000e+00 : f32
    %337 = vector.broadcast %cst_88 : f32 to vector<2x128xf32>
    %338 = arith.addf %337, %336 : vector<2x128xf32>
    %339 = arith.divf %337, %338 : vector<2x128xf32>
    %340 = vector.extract_strided_slice %339 {offsets = [0, 0], sizes = [2, 32], strides = [1, 1]} : vector<2x128xf32> to vector<2x32xf32>
    %341 = vector.extract_strided_slice %339 {offsets = [0, 32], sizes = [2, 32], strides = [1, 1]} : vector<2x128xf32> to vector<2x32xf32>
    %342 = vector.extract_strided_slice %339 {offsets = [0, 96], sizes = [2, 32], strides = [1, 1]} : vector<2x128xf32> to vector<2x32xf32>
    %343 = vector.extract_strided_slice %334 {offsets = [0, 64], sizes = [2, 32], strides = [1, 1]} : vector<2x128xf32> to vector<2x32xf32>
    %344 = math.tanh %343 : vector<2x32xf32>
    %345 = arith.mulf %341, %324 : vector<2x32xf32>
    %346 = arith.mulf %340, %344 : vector<2x32xf32>
    %347 = arith.addf %345, %346 : vector<2x32xf32>
    %348 = math.tanh %347 : vector<2x32xf32>
    %349 = arith.mulf %342, %348 : vector<2x32xf32>
    %350 = arith.addf %325, %349 : vector<2x32xf32>
    %351 = vector.extract_strided_slice %349 {offsets = [0, 0], sizes = [2, 16], strides = [1, 1]} : vector<2x32xf32> to vector<2x16xf32>
    %c0_89 = arith.constant 0 : index
    %c0_90 = arith.constant 0 : index
    %352 = vector.load %arg20[%c0_89, %c0_90] : memref<2x256xf32, #tpu.memory_space<vmem>>, vector<2x16xf32>
    tpu.vector_store %arg20[%c0_89, %c0_90], %351 {strides = array<i32>} : memref<2x256xf32, #tpu.memory_space<vmem>>, vector<2x16xf32>,
    %353 = vector.extract_strided_slice %349 {offsets = [0, 16], sizes = [2, 16], strides = [1, 1]} : vector<2x32xf32> to vector<2x16xf32>
    %c0_91 = arith.constant 0 : index
    %c240 = arith.constant 240 : index
    %354 = vector.load %arg20[%c0_91, %c240] : memref<2x256xf32, #tpu.memory_space<vmem>>, vector<2x16xf32>
    tpu.vector_store %arg20[%c0_91, %c240], %353 {strides = array<i32>} : memref<2x256xf32, #tpu.memory_space<vmem>>, vector<2x16xf32>,
    %355 = vector.extract_strided_slice %320 {offsets = [2, 0], sizes = [2, 128], strides = [1, 1]} : vector<16x128xf32> to vector<2x128xf32>
    %356 = vector.broadcast %79 : vector<1x128xf32> to vector<2x128xf32>
    %357 = arith.mulf %355, %356 : vector<2x128xf32>
    %358 = vector.extract_strided_slice %320 {offsets = [12, 0], sizes = [2, 128], strides = [1, 1]} : vector<16x128xf32> to vector<2x128xf32>
    %359 = vector.broadcast %322 : vector<1x128xf32> to vector<2x128xf32>
    %360 = arith.mulf %358, %359 : vector<2x128xf32>
    %361 = arith.addf %357, %360 : vector<2x128xf32>
    %cst_92 = arith.constant dense<0.000000e+00> : vector<2x128xf32>
    %362 = tpu.matmul %349, %316, %cst_92 {dimension_numbers = #tpu.dot_dimension_numbers<[1], [0], [0], [1], [0, 0, 1, 1], [], []>} : vector<2x32xf32>, vector<32x128xf32>, vector<2x128xf32> -> vector<2x128xf32>
    %363 = arith.addf %361, %362 : vector<2x128xf32>
    %364 = arith.negf %363 : vector<2x128xf32>
    %365 = math.exp %364 : vector<2x128xf32>
    %cst_93 = arith.constant 1.000000e+00 : f32
    %366 = vector.broadcast %cst_93 : f32 to vector<2x128xf32>
    %367 = arith.addf %366, %365 : vector<2x128xf32>
    %368 = arith.divf %366, %367 : vector<2x128xf32>
    %369 = vector.extract_strided_slice %368 {offsets = [0, 0], sizes = [2, 32], strides = [1, 1]} : vector<2x128xf32> to vector<2x32xf32>
    %370 = vector.extract_strided_slice %368 {offsets = [0, 32], sizes = [2, 32], strides = [1, 1]} : vector<2x128xf32> to vector<2x32xf32>
    %371 = vector.extract_strided_slice %368 {offsets = [0, 96], sizes = [2, 32], strides = [1, 1]} : vector<2x128xf32> to vector<2x32xf32>
    %372 = vector.extract_strided_slice %363 {offsets = [0, 64], sizes = [2, 32], strides = [1, 1]} : vector<2x128xf32> to vector<2x32xf32>
    %373 = math.tanh %372 : vector<2x32xf32>
    %374 = arith.mulf %370, %347 : vector<2x32xf32>
    %375 = arith.mulf %369, %373 : vector<2x32xf32>
    %376 = arith.addf %374, %375 : vector<2x32xf32>
    %377 = math.tanh %376 : vector<2x32xf32>
    %378 = arith.mulf %371, %377 : vector<2x32xf32>
    %379 = arith.addf %350, %378 : vector<2x32xf32>
    %380 = vector.extract_strided_slice %378 {offsets = [0, 0], sizes = [2, 16], strides = [1, 1]} : vector<2x32xf32> to vector<2x16xf32>
    %c0_94 = arith.constant 0 : index
    %c32_95 = arith.constant 32 : index
    %381 = vector.load %arg20[%c0_94, %c32_95] : memref<2x256xf32, #tpu.memory_space<vmem>>, vector<2x16xf32>
    tpu.vector_store %arg20[%c0_94, %c32_95], %380 {strides = array<i32>} : memref<2x256xf32, #tpu.memory_space<vmem>>, vector<2x16xf32>,
    %382 = vector.extract_strided_slice %378 {offsets = [0, 16], sizes = [2, 16], strides = [1, 1]} : vector<2x32xf32> to vector<2x16xf32>
    %c0_96 = arith.constant 0 : index
    %c208 = arith.constant 208 : index
    %383 = vector.load %arg20[%c0_96, %c208] : memref<2x256xf32, #tpu.memory_space<vmem>>, vector<2x16xf32>
    tpu.vector_store %arg20[%c0_96, %c208], %382 {strides = array<i32>} : memref<2x256xf32, #tpu.memory_space<vmem>>, vector<2x16xf32>,
    %384 = vector.extract_strided_slice %320 {offsets = [4, 0], sizes = [2, 128], strides = [1, 1]} : vector<16x128xf32> to vector<2x128xf32>
    %385 = vector.broadcast %79 : vector<1x128xf32> to vector<2x128xf32>
    %386 = arith.mulf %384, %385 : vector<2x128xf32>
    %387 = vector.extract_strided_slice %320 {offsets = [10, 0], sizes = [2, 128], strides = [1, 1]} : vector<16x128xf32> to vector<2x128xf32>
    %388 = vector.broadcast %322 : vector<1x128xf32> to vector<2x128xf32>
    %389 = arith.mulf %387, %388 : vector<2x128xf32>
    %390 = arith.addf %386, %389 : vector<2x128xf32>
    %cst_97 = arith.constant dense<0.000000e+00> : vector<2x128xf32>
    %391 = tpu.matmul %378, %316, %cst_97 {dimension_numbers = #tpu.dot_dimension_numbers<[1], [0], [0], [1], [0, 0, 1, 1], [], []>} : vector<2x32xf32>, vector<32x128xf32>, vector<2x128xf32> -> vector<2x128xf32>
    %392 = arith.addf %390, %391 : vector<2x128xf32>
    %393 = arith.negf %392 : vector<2x128xf32>
    %394 = math.exp %393 : vector<2x128xf32>
    %cst_98 = arith.constant 1.000000e+00 : f32
    %395 = vector.broadcast %cst_98 : f32 to vector<2x128xf32>
    %396 = arith.addf %395, %394 : vector<2x128xf32>
    %397 = arith.divf %395, %396 : vector<2x128xf32>
    %398 = vector.extract_strided_slice %397 {offsets = [0, 0], sizes = [2, 32], strides = [1, 1]} : vector<2x128xf32> to vector<2x32xf32>
    %399 = vector.extract_strided_slice %397 {offsets = [0, 32], sizes = [2, 32], strides = [1, 1]} : vector<2x128xf32> to vector<2x32xf32>
    %400 = vector.extract_strided_slice %397 {offsets = [0, 96], sizes = [2, 32], strides = [1, 1]} : vector<2x128xf32> to vector<2x32xf32>
    %401 = vector.extract_strided_slice %392 {offsets = [0, 64], sizes = [2, 32], strides = [1, 1]} : vector<2x128xf32> to vector<2x32xf32>
    %402 = math.tanh %401 : vector<2x32xf32>
    %403 = arith.mulf %399, %376 : vector<2x32xf32>
    %404 = arith.mulf %398, %402 : vector<2x32xf32>
    %405 = arith.addf %403, %404 : vector<2x32xf32>
    %406 = math.tanh %405 : vector<2x32xf32>
    %407 = arith.mulf %400, %406 : vector<2x32xf32>
    %408 = arith.addf %379, %407 : vector<2x32xf32>
    %409 = vector.extract_strided_slice %407 {offsets = [0, 0], sizes = [2, 16], strides = [1, 1]} : vector<2x32xf32> to vector<2x16xf32>
    %c0_99 = arith.constant 0 : index
    %c64 = arith.constant 64 : index
    %410 = vector.load %arg20[%c0_99, %c64] : memref<2x256xf32, #tpu.memory_space<vmem>>, vector<2x16xf32>
    tpu.vector_store %arg20[%c0_99, %c64], %409 {strides = array<i32>} : memref<2x256xf32, #tpu.memory_space<vmem>>, vector<2x16xf32>,
    %411 = vector.extract_strided_slice %407 {offsets = [0, 16], sizes = [2, 16], strides = [1, 1]} : vector<2x32xf32> to vector<2x16xf32>
    %c0_100 = arith.constant 0 : index
    %c176 = arith.constant 176 : index
    %412 = vector.load %arg20[%c0_100, %c176] : memref<2x256xf32, #tpu.memory_space<vmem>>, vector<2x16xf32>
    tpu.vector_store %arg20[%c0_100, %c176], %411 {strides = array<i32>} : memref<2x256xf32, #tpu.memory_space<vmem>>, vector<2x16xf32>,
    %413 = vector.extract_strided_slice %320 {offsets = [6, 0], sizes = [2, 128], strides = [1, 1]} : vector<16x128xf32> to vector<2x128xf32>
    %414 = vector.broadcast %79 : vector<1x128xf32> to vector<2x128xf32>
    %415 = arith.mulf %413, %414 : vector<2x128xf32>
    %416 = vector.extract_strided_slice %320 {offsets = [8, 0], sizes = [2, 128], strides = [1, 1]} : vector<16x128xf32> to vector<2x128xf32>
    %417 = vector.broadcast %322 : vector<1x128xf32> to vector<2x128xf32>
    %418 = arith.mulf %416, %417 : vector<2x128xf32>
    %419 = arith.addf %415, %418 : vector<2x128xf32>
    %cst_101 = arith.constant dense<0.000000e+00> : vector<2x128xf32>
    %420 = tpu.matmul %407, %316, %cst_101 {dimension_numbers = #tpu.dot_dimension_numbers<[1], [0], [0], [1], [0, 0, 1, 1], [], []>} : vector<2x32xf32>, vector<32x128xf32>, vector<2x128xf32> -> vector<2x128xf32>
    %421 = arith.addf %419, %420 : vector<2x128xf32>
    %422 = arith.negf %421 : vector<2x128xf32>
    %423 = math.exp %422 : vector<2x128xf32>
    %cst_102 = arith.constant 1.000000e+00 : f32
    %424 = vector.broadcast %cst_102 : f32 to vector<2x128xf32>
    %425 = arith.addf %424, %423 : vector<2x128xf32>
    %426 = arith.divf %424, %425 : vector<2x128xf32>
    %427 = vector.extract_strided_slice %426 {offsets = [0, 0], sizes = [2, 32], strides = [1, 1]} : vector<2x128xf32> to vector<2x32xf32>
    %428 = vector.extract_strided_slice %426 {offsets = [0, 32], sizes = [2, 32], strides = [1, 1]} : vector<2x128xf32> to vector<2x32xf32>
    %429 = vector.extract_strided_slice %426 {offsets = [0, 96], sizes = [2, 32], strides = [1, 1]} : vector<2x128xf32> to vector<2x32xf32>
    %430 = vector.extract_strided_slice %421 {offsets = [0, 64], sizes = [2, 32], strides = [1, 1]} : vector<2x128xf32> to vector<2x32xf32>
    %431 = math.tanh %430 : vector<2x32xf32>
    %432 = arith.mulf %428, %405 : vector<2x32xf32>
    %433 = arith.mulf %427, %431 : vector<2x32xf32>
    %434 = arith.addf %432, %433 : vector<2x32xf32>
    %435 = math.tanh %434 : vector<2x32xf32>
    %436 = arith.mulf %429, %435 : vector<2x32xf32>
    %437 = arith.addf %408, %436 : vector<2x32xf32>
    %438 = vector.extract_strided_slice %436 {offsets = [0, 0], sizes = [2, 16], strides = [1, 1]} : vector<2x32xf32> to vector<2x16xf32>
    %c0_103 = arith.constant 0 : index
    %c96 = arith.constant 96 : index
    %439 = vector.load %arg20[%c0_103, %c96] : memref<2x256xf32, #tpu.memory_space<vmem>>, vector<2x16xf32>
    tpu.vector_store %arg20[%c0_103, %c96], %438 {strides = array<i32>} : memref<2x256xf32, #tpu.memory_space<vmem>>, vector<2x16xf32>,
    %440 = vector.extract_strided_slice %436 {offsets = [0, 16], sizes = [2, 16], strides = [1, 1]} : vector<2x32xf32> to vector<2x16xf32>
    %c0_104 = arith.constant 0 : index
    %c144 = arith.constant 144 : index
    %441 = vector.load %arg20[%c0_104, %c144] : memref<2x256xf32, #tpu.memory_space<vmem>>, vector<2x16xf32>
    tpu.vector_store %arg20[%c0_104, %c144], %440 {strides = array<i32>} : memref<2x256xf32, #tpu.memory_space<vmem>>, vector<2x16xf32>,
    %442 = vector.extract_strided_slice %320 {offsets = [8, 0], sizes = [2, 128], strides = [1, 1]} : vector<16x128xf32> to vector<2x128xf32>
    %443 = vector.broadcast %79 : vector<1x128xf32> to vector<2x128xf32>
    %444 = arith.mulf %442, %443 : vector<2x128xf32>
    %445 = vector.extract_strided_slice %320 {offsets = [6, 0], sizes = [2, 128], strides = [1, 1]} : vector<16x128xf32> to vector<2x128xf32>
    %446 = vector.broadcast %322 : vector<1x128xf32> to vector<2x128xf32>
    %447 = arith.mulf %445, %446 : vector<2x128xf32>
    %448 = arith.addf %444, %447 : vector<2x128xf32>
    %cst_105 = arith.constant dense<0.000000e+00> : vector<2x128xf32>
    %449 = tpu.matmul %436, %316, %cst_105 {dimension_numbers = #tpu.dot_dimension_numbers<[1], [0], [0], [1], [0, 0, 1, 1], [], []>} : vector<2x32xf32>, vector<32x128xf32>, vector<2x128xf32> -> vector<2x128xf32>
    %450 = arith.addf %448, %449 : vector<2x128xf32>
    %451 = arith.negf %450 : vector<2x128xf32>
    %452 = math.exp %451 : vector<2x128xf32>
    %cst_106 = arith.constant 1.000000e+00 : f32
    %453 = vector.broadcast %cst_106 : f32 to vector<2x128xf32>
    %454 = arith.addf %453, %452 : vector<2x128xf32>
    %455 = arith.divf %453, %454 : vector<2x128xf32>
    %456 = vector.extract_strided_slice %455 {offsets = [0, 0], sizes = [2, 32], strides = [1, 1]} : vector<2x128xf32> to vector<2x32xf32>
    %457 = vector.extract_strided_slice %455 {offsets = [0, 32], sizes = [2, 32], strides = [1, 1]} : vector<2x128xf32> to vector<2x32xf32>
    %458 = vector.extract_strided_slice %455 {offsets = [0, 96], sizes = [2, 32], strides = [1, 1]} : vector<2x128xf32> to vector<2x32xf32>
    %459 = vector.extract_strided_slice %450 {offsets = [0, 64], sizes = [2, 32], strides = [1, 1]} : vector<2x128xf32> to vector<2x32xf32>
    %460 = math.tanh %459 : vector<2x32xf32>
    %461 = arith.mulf %457, %434 : vector<2x32xf32>
    %462 = arith.mulf %456, %460 : vector<2x32xf32>
    %463 = arith.addf %461, %462 : vector<2x32xf32>
    %464 = math.tanh %463 : vector<2x32xf32>
    %465 = arith.mulf %458, %464 : vector<2x32xf32>
    %466 = arith.addf %437, %465 : vector<2x32xf32>
    %467 = vector.extract_strided_slice %465 {offsets = [0, 0], sizes = [2, 16], strides = [1, 1]} : vector<2x32xf32> to vector<2x16xf32>
    %c0_107 = arith.constant 0 : index
    %c128 = arith.constant 128 : index
    %468 = vector.load %arg20[%c0_107, %c128] : memref<2x256xf32, #tpu.memory_space<vmem>>, vector<2x16xf32>
    tpu.vector_store %arg20[%c0_107, %c128], %467 {strides = array<i32>} : memref<2x256xf32, #tpu.memory_space<vmem>>, vector<2x16xf32>,
    %469 = vector.extract_strided_slice %465 {offsets = [0, 16], sizes = [2, 16], strides = [1, 1]} : vector<2x32xf32> to vector<2x16xf32>
    %c0_108 = arith.constant 0 : index
    %c112 = arith.constant 112 : index
    %470 = vector.load %arg20[%c0_108, %c112] : memref<2x256xf32, #tpu.memory_space<vmem>>, vector<2x16xf32>
    tpu.vector_store %arg20[%c0_108, %c112], %469 {strides = array<i32>} : memref<2x256xf32, #tpu.memory_space<vmem>>, vector<2x16xf32>,
    %471 = vector.extract_strided_slice %320 {offsets = [10, 0], sizes = [2, 128], strides = [1, 1]} : vector<16x128xf32> to vector<2x128xf32>
    %472 = vector.broadcast %79 : vector<1x128xf32> to vector<2x128xf32>
    %473 = arith.mulf %471, %472 : vector<2x128xf32>
    %474 = vector.extract_strided_slice %320 {offsets = [4, 0], sizes = [2, 128], strides = [1, 1]} : vector<16x128xf32> to vector<2x128xf32>
    %475 = vector.broadcast %322 : vector<1x128xf32> to vector<2x128xf32>
    %476 = arith.mulf %474, %475 : vector<2x128xf32>
    %477 = arith.addf %473, %476 : vector<2x128xf32>
    %cst_109 = arith.constant dense<0.000000e+00> : vector<2x128xf32>
    %478 = tpu.matmul %465, %316, %cst_109 {dimension_numbers = #tpu.dot_dimension_numbers<[1], [0], [0], [1], [0, 0, 1, 1], [], []>} : vector<2x32xf32>, vector<32x128xf32>, vector<2x128xf32> -> vector<2x128xf32>
    %479 = arith.addf %477, %478 : vector<2x128xf32>
    %480 = arith.negf %479 : vector<2x128xf32>
    %481 = math.exp %480 : vector<2x128xf32>
    %cst_110 = arith.constant 1.000000e+00 : f32
    %482 = vector.broadcast %cst_110 : f32 to vector<2x128xf32>
    %483 = arith.addf %482, %481 : vector<2x128xf32>
    %484 = arith.divf %482, %483 : vector<2x128xf32>
    %485 = vector.extract_strided_slice %484 {offsets = [0, 0], sizes = [2, 32], strides = [1, 1]} : vector<2x128xf32> to vector<2x32xf32>
    %486 = vector.extract_strided_slice %484 {offsets = [0, 32], sizes = [2, 32], strides = [1, 1]} : vector<2x128xf32> to vector<2x32xf32>
    %487 = vector.extract_strided_slice %484 {offsets = [0, 96], sizes = [2, 32], strides = [1, 1]} : vector<2x128xf32> to vector<2x32xf32>
    %488 = vector.extract_strided_slice %479 {offsets = [0, 64], sizes = [2, 32], strides = [1, 1]} : vector<2x128xf32> to vector<2x32xf32>
    %489 = math.tanh %488 : vector<2x32xf32>
    %490 = arith.mulf %486, %463 : vector<2x32xf32>
    %491 = arith.mulf %485, %489 : vector<2x32xf32>
    %492 = arith.addf %490, %491 : vector<2x32xf32>
    %493 = math.tanh %492 : vector<2x32xf32>
    %494 = arith.mulf %487, %493 : vector<2x32xf32>
    %495 = arith.addf %466, %494 : vector<2x32xf32>
    %496 = vector.extract_strided_slice %494 {offsets = [0, 0], sizes = [2, 16], strides = [1, 1]} : vector<2x32xf32> to vector<2x16xf32>
    %c0_111 = arith.constant 0 : index
    %c160 = arith.constant 160 : index
    %497 = vector.load %arg20[%c0_111, %c160] : memref<2x256xf32, #tpu.memory_space<vmem>>, vector<2x16xf32>
    tpu.vector_store %arg20[%c0_111, %c160], %496 {strides = array<i32>} : memref<2x256xf32, #tpu.memory_space<vmem>>, vector<2x16xf32>,
    %498 = vector.extract_strided_slice %494 {offsets = [0, 16], sizes = [2, 16], strides = [1, 1]} : vector<2x32xf32> to vector<2x16xf32>
    %c0_112 = arith.constant 0 : index
    %c80 = arith.constant 80 : index
    %499 = vector.load %arg20[%c0_112, %c80] : memref<2x256xf32, #tpu.memory_space<vmem>>, vector<2x16xf32>
    tpu.vector_store %arg20[%c0_112, %c80], %498 {strides = array<i32>} : memref<2x256xf32, #tpu.memory_space<vmem>>, vector<2x16xf32>,
    %500 = vector.extract_strided_slice %320 {offsets = [12, 0], sizes = [2, 128], strides = [1, 1]} : vector<16x128xf32> to vector<2x128xf32>
    %501 = vector.broadcast %79 : vector<1x128xf32> to vector<2x128xf32>
    %502 = arith.mulf %500, %501 : vector<2x128xf32>
    %503 = vector.extract_strided_slice %320 {offsets = [2, 0], sizes = [2, 128], strides = [1, 1]} : vector<16x128xf32> to vector<2x128xf32>
    %504 = vector.broadcast %322 : vector<1x128xf32> to vector<2x128xf32>
    %505 = arith.mulf %503, %504 : vector<2x128xf32>
    %506 = arith.addf %502, %505 : vector<2x128xf32>
    %cst_113 = arith.constant dense<0.000000e+00> : vector<2x128xf32>
    %507 = tpu.matmul %494, %316, %cst_113 {dimension_numbers = #tpu.dot_dimension_numbers<[1], [0], [0], [1], [0, 0, 1, 1], [], []>} : vector<2x32xf32>, vector<32x128xf32>, vector<2x128xf32> -> vector<2x128xf32>
    %508 = arith.addf %506, %507 : vector<2x128xf32>
    %509 = arith.negf %508 : vector<2x128xf32>
    %510 = math.exp %509 : vector<2x128xf32>
    %cst_114 = arith.constant 1.000000e+00 : f32
    %511 = vector.broadcast %cst_114 : f32 to vector<2x128xf32>
    %512 = arith.addf %511, %510 : vector<2x128xf32>
    %513 = arith.divf %511, %512 : vector<2x128xf32>
    %514 = vector.extract_strided_slice %513 {offsets = [0, 0], sizes = [2, 32], strides = [1, 1]} : vector<2x128xf32> to vector<2x32xf32>
    %515 = vector.extract_strided_slice %513 {offsets = [0, 32], sizes = [2, 32], strides = [1, 1]} : vector<2x128xf32> to vector<2x32xf32>
    %516 = vector.extract_strided_slice %513 {offsets = [0, 96], sizes = [2, 32], strides = [1, 1]} : vector<2x128xf32> to vector<2x32xf32>
    %517 = vector.extract_strided_slice %508 {offsets = [0, 64], sizes = [2, 32], strides = [1, 1]} : vector<2x128xf32> to vector<2x32xf32>
    %518 = math.tanh %517 : vector<2x32xf32>
    %519 = arith.mulf %515, %492 : vector<2x32xf32>
    %520 = arith.mulf %514, %518 : vector<2x32xf32>
    %521 = arith.addf %519, %520 : vector<2x32xf32>
    %522 = math.tanh %521 : vector<2x32xf32>
    %523 = arith.mulf %516, %522 : vector<2x32xf32>
    %524 = arith.addf %495, %523 : vector<2x32xf32>
    %525 = vector.extract_strided_slice %523 {offsets = [0, 0], sizes = [2, 16], strides = [1, 1]} : vector<2x32xf32> to vector<2x16xf32>
    %c0_115 = arith.constant 0 : index
    %c192 = arith.constant 192 : index
    %526 = vector.load %arg20[%c0_115, %c192] : memref<2x256xf32, #tpu.memory_space<vmem>>, vector<2x16xf32>
    tpu.vector_store %arg20[%c0_115, %c192], %525 {strides = array<i32>} : memref<2x256xf32, #tpu.memory_space<vmem>>, vector<2x16xf32>,
    %527 = vector.extract_strided_slice %523 {offsets = [0, 16], sizes = [2, 16], strides = [1, 1]} : vector<2x32xf32> to vector<2x16xf32>
    %c0_116 = arith.constant 0 : index
    %c48 = arith.constant 48 : index
    %528 = vector.load %arg20[%c0_116, %c48] : memref<2x256xf32, #tpu.memory_space<vmem>>, vector<2x16xf32>
    tpu.vector_store %arg20[%c0_116, %c48], %527 {strides = array<i32>} : memref<2x256xf32, #tpu.memory_space<vmem>>, vector<2x16xf32>,
    %529 = vector.extract_strided_slice %320 {offsets = [14, 0], sizes = [2, 128], strides = [1, 1]} : vector<16x128xf32> to vector<2x128xf32>
    %530 = vector.broadcast %79 : vector<1x128xf32> to vector<2x128xf32>
    %531 = arith.mulf %529, %530 : vector<2x128xf32>
    %532 = vector.extract_strided_slice %320 {offsets = [0, 0], sizes = [2, 128], strides = [1, 1]} : vector<16x128xf32> to vector<2x128xf32>
    %533 = vector.broadcast %322 : vector<1x128xf32> to vector<2x128xf32>
    %534 = arith.mulf %532, %533 : vector<2x128xf32>
    %535 = arith.addf %531, %534 : vector<2x128xf32>
    %cst_117 = arith.constant dense<0.000000e+00> : vector<2x128xf32>
    %536 = tpu.matmul %523, %316, %cst_117 {dimension_numbers = #tpu.dot_dimension_numbers<[1], [0], [0], [1], [0, 0, 1, 1], [], []>} : vector<2x32xf32>, vector<32x128xf32>, vector<2x128xf32> -> vector<2x128xf32>
    %537 = arith.addf %535, %536 : vector<2x128xf32>
    %538 = arith.negf %537 : vector<2x128xf32>
    %539 = math.exp %538 : vector<2x128xf32>
    %cst_118 = arith.constant 1.000000e+00 : f32
    %540 = vector.broadcast %cst_118 : f32 to vector<2x128xf32>
    %541 = arith.addf %540, %539 : vector<2x128xf32>
    %542 = arith.divf %540, %541 : vector<2x128xf32>
    %543 = vector.extract_strided_slice %542 {offsets = [0, 0], sizes = [2, 32], strides = [1, 1]} : vector<2x128xf32> to vector<2x32xf32>
    %544 = vector.extract_strided_slice %542 {offsets = [0, 32], sizes = [2, 32], strides = [1, 1]} : vector<2x128xf32> to vector<2x32xf32>
    %545 = vector.extract_strided_slice %542 {offsets = [0, 96], sizes = [2, 32], strides = [1, 1]} : vector<2x128xf32> to vector<2x32xf32>
    %546 = vector.extract_strided_slice %537 {offsets = [0, 64], sizes = [2, 32], strides = [1, 1]} : vector<2x128xf32> to vector<2x32xf32>
    %547 = math.tanh %546 : vector<2x32xf32>
    %548 = arith.mulf %544, %521 : vector<2x32xf32>
    %549 = arith.mulf %543, %547 : vector<2x32xf32>
    %550 = arith.addf %548, %549 : vector<2x32xf32>
    %551 = math.tanh %550 : vector<2x32xf32>
    %552 = arith.mulf %545, %551 : vector<2x32xf32>
    %553 = arith.addf %524, %552 : vector<2x32xf32>
    %554 = vector.extract_strided_slice %552 {offsets = [0, 0], sizes = [2, 16], strides = [1, 1]} : vector<2x32xf32> to vector<2x16xf32>
    %c0_119 = arith.constant 0 : index
    %c224 = arith.constant 224 : index
    %555 = vector.load %arg20[%c0_119, %c224] : memref<2x256xf32, #tpu.memory_space<vmem>>, vector<2x16xf32>
    tpu.vector_store %arg20[%c0_119, %c224], %554 {strides = array<i32>} : memref<2x256xf32, #tpu.memory_space<vmem>>, vector<2x16xf32>,
    %556 = vector.extract_strided_slice %552 {offsets = [0, 16], sizes = [2, 16], strides = [1, 1]} : vector<2x32xf32> to vector<2x16xf32>
    %c0_120 = arith.constant 0 : index
    %c16_121 = arith.constant 16 : index
    %557 = vector.load %arg20[%c0_120, %c16_121] : memref<2x256xf32, #tpu.memory_space<vmem>>, vector<2x16xf32>
    tpu.vector_store %arg20[%c0_120, %c16_121], %556 {strides = array<i32>} : memref<2x256xf32, #tpu.memory_space<vmem>>, vector<2x16xf32>,
    %cst_122 = arith.constant 1.250000e-01 : f32
    %558 = vector.broadcast %cst_122 : f32 to vector<2x32xf32>
    %559 = arith.mulf %553, %558 : vector<2x32xf32>
    %c0_123 = arith.constant 0 : index
    %c0_124 = arith.constant 0 : index
    %560 = vector.load %arg11[%c0_123, %c0_124] : memref<48x16xf32, #tpu.memory_space<vmem>>, vector<32x16xf32>
    %cst_125 = arith.constant dense<0.000000e+00> : vector<2x16xf32>
    %561 = tpu.matmul %559, %560, %cst_125 {dimension_numbers = #tpu.dot_dimension_numbers<[1], [0], [0], [1], [0, 0, 1, 1], [], []>} : vector<2x32xf32>, vector<32x16xf32>, vector<2x16xf32> -> vector<2x16xf32>
    %c0_126 = arith.constant 0 : index
    %c0_127 = arith.constant 0 : index
    %562 = vector.load %arg12[%c0_126, %c0_127] : memref<2x16xf32, #tpu.memory_space<vmem>>, vector<1x16xf32>
    %563 = vector.broadcast %562 : vector<1x16xf32> to vector<2x16xf32>
    %564 = arith.addf %561, %563 : vector<2x16xf32>
    %cst_128 = arith.constant 0.000000e+00 : f32
    %565 = vector.broadcast %cst_128 : f32 to vector<2x16xf32>
    %566 = arith.maximumf %564, %565 : vector<2x16xf32>
    %c32_129 = arith.constant 32 : index
    %c0_130 = arith.constant 0 : index
    %567 = vector.load %arg11[%c32_129, %c0_130] : memref<48x16xf32, #tpu.memory_space<vmem>>, vector<16x16xf32>
    %cst_131 = arith.constant dense<0.000000e+00> : vector<2x16xf32>
    %568 = tpu.matmul %566, %567, %cst_131 {dimension_numbers = #tpu.dot_dimension_numbers<[1], [0], [0], [1], [0, 0, 1, 1], [], []>} : vector<2x16xf32>, vector<16x16xf32>, vector<2x16xf32> -> vector<2x16xf32>
    %c1_132 = arith.constant 1 : index
    %c0_133 = arith.constant 0 : index
    %569 = vector.load %arg12[%c1_132, %c0_133] : memref<2x16xf32, #tpu.memory_space<vmem>>, vector<1x16xf32>
    %570 = vector.broadcast %569 : vector<1x16xf32> to vector<2x16xf32>
    %571 = arith.addf %568, %570 : vector<2x16xf32>
    %c0_134 = arith.constant 0 : index
    %c0_135 = arith.constant 0 : index
    %572 = vector.load %arg17[%c0_134, %c0_135] : memref<2x16xf32, #tpu.memory_space<vmem>>, vector<2x16xf32>
    tpu.vector_store %arg17[%c0_134, %c0_135], %571 {strides = array<i32>} : memref<2x16xf32, #tpu.memory_space<vmem>>, vector<2x16xf32>,
    %c0_136 = arith.constant 0 : index
    %c0_137 = arith.constant 0 : index
    %573 = vector.load %arg20[%c0_136, %c0_137] : memref<2x256xf32, #tpu.memory_space<vmem>>, vector<2x256xf32>
    %c0_138 = arith.constant 0 : index
    %c0_139 = arith.constant 0 : index
    %574 = vector.load %arg13[%c0_138, %c0_139] : memref<256x128xf32, #tpu.memory_space<vmem>>, vector<256x128xf32>
    %cst_140 = arith.constant dense<0.000000e+00> : vector<2x128xf32>
    %575 = tpu.matmul %573, %574, %cst_140 {dimension_numbers = #tpu.dot_dimension_numbers<[1], [0], [0], [1], [0, 0, 1, 1], [], []>} : vector<2x256xf32>, vector<256x128xf32>, vector<2x128xf32> -> vector<2x128xf32>
    %c0_141 = arith.constant 0 : index
    %c0_142 = arith.constant 0 : index
    %576 = vector.load %arg15[%c0_141, %c0_142] : memref<2x128xf32, #tpu.memory_space<vmem>>, vector<1x128xf32>
    %577 = vector.broadcast %576 : vector<1x128xf32> to vector<2x128xf32>
    %578 = arith.addf %575, %577 : vector<2x128xf32>
    %cst_143 = arith.constant 0.000000e+00 : f32
    %579 = vector.broadcast %cst_143 : f32 to vector<2x128xf32>
    %580 = arith.maximumf %578, %579 : vector<2x128xf32>
    %c0_144 = arith.constant 0 : index
    %c0_145 = arith.constant 0 : index
    %581 = vector.load %arg14[%c0_144, %c0_145] : memref<128x16xf32, #tpu.memory_space<vmem>>, vector<128x16xf32>
    %cst_146 = arith.constant dense<0.000000e+00> : vector<2x16xf32>
    %582 = tpu.matmul %580, %581, %cst_146 {dimension_numbers = #tpu.dot_dimension_numbers<[1], [0], [0], [1], [0, 0, 1, 1], [], []>} : vector<2x128xf32>, vector<128x16xf32>, vector<2x16xf32> -> vector<2x16xf32>
    %c1_147 = arith.constant 1 : index
    %c0_148 = arith.constant 0 : index
    %583 = vector.load %arg15[%c1_147, %c0_148] : memref<2x128xf32, #tpu.memory_space<vmem>>, vector<1x16xf32>
    %584 = vector.broadcast %583 : vector<1x16xf32> to vector<2x16xf32>
    %585 = arith.addf %582, %584 : vector<2x16xf32>
    %c0_149 = arith.constant 0 : index
    %c0_150 = arith.constant 0 : index
    %586 = vector.load %arg16[%c0_149, %c0_150] : memref<16x128xf32, #tpu.memory_space<vmem>>, vector<16x128xf32>
    %cst_151 = arith.constant dense<0.000000e+00> : vector<2x128xf32>
    %587 = tpu.matmul %585, %586, %cst_151 {dimension_numbers = #tpu.dot_dimension_numbers<[1], [0], [0], [1], [0, 0, 1, 1], [], []>} : vector<2x16xf32>, vector<16x128xf32>, vector<2x128xf32> -> vector<2x128xf32>
    %c0_152 = arith.constant 0 : index
    %c0_153 = arith.constant 0 : index
    %588 = vector.load %arg18[%c0_152, %c0_153] : memref<2x128xf32, #tpu.memory_space<vmem>>, vector<2x128xf32>
    tpu.vector_store %arg18[%c0_152, %c0_153], %587 {strides = array<i32>} : memref<2x128xf32, #tpu.memory_space<vmem>>, vector<2x128xf32>,
    return
  }
}

</mosaic_0001>

<bundles_post_ra>
// kernel: hierarchical_signal_net.1
= control target key start
LH: loop header
LB: loop body
LE: loop exit
PB: predicated region body
PF: predicated region fallthrough
CT: control target
= control target key end

     0   :  { %s7653_s0 = inlined_call_operand.vmem [shape: f32[2,72,2], index: 0, kind: input, shape index: {}]   ;;  %s7654_s1 = inlined_call_operand.vmem [shape: f32[14,8], index: 1, kind: input, shape index: {}]   ;;  %s7655_s2 = inlined_call_operand.vmem [shape: f32[40,16], index: 2, kind: input, shape index: {}]   ;;  %s7656_s3 = inlined_call_operand.vmem [shape: f32[48,32], index: 3, kind: input, shape index: {}]   ;;  %s7657_s4 = inlined_call_operand.vmem [shape: f32[9,32], index: 4, kind: input, shape index: {}]   ;;  %s7658_s5 = inlined_call_operand.vmem [shape: f32[160,128], index: 5, kind: input, shape index: {}]   ;;  %s7659_s6 = inlined_call_operand.vmem [shape: f32[96,64], index: 6, kind: input, shape index: {}]   ;;  %s7660_s7 = inlined_call_operand.vmem [shape: f32[32,32], index: 7, kind: input, shape index: {}]   ;;  %s7661_s8 = inlined_call_operand.vmem [shape: f32[64,128], index: 8, kind: input, shape index: {}]   ;;  %s7662_s9 = inlined_call_operand.vmem [shape: f32[64,128], index: 9, kind: input, shape index: {}]   ;;  %s7663_s10 = inlined_call_operand.vmem [shape: f32[3,128], index: 10, kind: input, shape index: {}]   ;;  %s7664_s11 = inlined_call_operand.vmem [shape: f32[48,16], index: 11, kind: input, shape index: {}]   ;;  %s7665_s12 = inlined_call_operand.vmem [shape: f32[2,16], index: 12, kind: input, shape index: {}]   ;;  %s7666_s13 = inlined_call_operand.vmem [shape: f32[256,128], index: 13, kind: input, shape index: {}]   ;;  %s7667_s14 = inlined_call_operand.vmem [shape: f32[128,16], index: 14, kind: input, shape index: {}]   ;;  %s7668_s15 = inlined_call_operand.vmem [shape: f32[2,128], index: 15, kind: input, shape index: {}]   ;;  %s7669_s16 = inlined_call_operand.vmem [shape: f32[16,128], index: 16, kind: input, shape index: {}]   ;;  %s7670_s17 = inlined_call_operand.hbm [shape: f32[2,16], index: 17, kind: output, shape index: {0}]   ;;  %s7671_s18 = inlined_call_operand.vmem [shape: f32[2,128], index: 18, kind: output, shape index: {1}]  }
   0x1   :  { %7675 = sst [smem:[#allocation7_spill]] %s7653_s0 }
   0x2   :  { %7676 = sst [smem:[#allocation8_spill]] %s7654_s1 }
   0x3   :  { %7677 = sst [smem:[#allocation9_spill]] %s7655_s2 }
   0x4   :  { %s7678_s29 = sld [smem:[#allocation7_spill]]  ;;  %vm119_vm0 = vcmask 1046528   ;;  %vm208_vm1 = vcmask 1045504   ;;  %s5694_s22 = smov 2  }
   0xa   :  { %v5807_v0 = vld [vmem:[%s7678_s29 + $0x10] sm:$0xff]  ;;  %v5812_v1 = vld [vmem:[%s7678_s29 + $0x18] sm:$0xff]  ;;  %v5817_v2 = vld [vmem:[%s7678_s29] sm:$0xff] }
   0xb   :  { %v123_v3 = vrot.slane %v5807_v0, 1  ;;  %v125_v4 = vrot.slane %v5812_v1, 1  ;;  %v5824_v5 = vld [vmem:[%s7678_s29 + $0x8] sm:$0xff]  ;;  %v120_v6 = vrot.slane %v5817_v2, 1  ;;  %v209_v7 = vrot.slane %v5817_v2, 2 }
   0xc   :  { %v121_v8 = vrot.slane %v5824_v5, 1  ;;  %v210_v9 = vrot.slane %v5824_v5, 2  ;;  %v212_v13 = vrot.slane %v5807_v0, 2  ;;  %v214_v14 = vrot.slane %v5812_v1, 2 }
   0xd   :  { %v126_v10 = vsel %vm119_vm0, %v123_v3, %v125_v4 }
   0xe   :  { %158 = vrot.lane.b32.xlu1 %v126_v10, %s5694_s22  ;;  %v122_v11 = vsel %vm119_vm0, %v120_v6, %v121_v8  ;;  %v211_v12 = vsel %vm208_vm1, %v209_v7, %v210_v9  ;;  %v124_v15 = vsel %vm119_vm0, %v121_v8, %v123_v3 }
   0xf   :  { %154 = vrot.lane.b32.xlu0 %v122_v11, %s5694_s22 }
  0x10   :  { %24 = vsyncpa [#allocation5], 0  ;;  %s5695_s2 = smov 4   ;;  %v215_v16 = vsel %vm208_vm1, %v212_v13, %v214_v14  ;;  %v299_v17 = vrot.slane %v5824_v5, 3  ;;  %v301_v18 = vrot.slane %v5807_v0, 3  ;;  %v213_v19 = vsel %vm208_vm1, %v210_v9, %v212_v13  ;;  %v5855_v26 = vld [vmem:[%s7678_s29 + $0x20] sm:$0xff] }
  0x11   :  { %vm297_vm2 = vcmask 1044480   ;;  %v298_v20 = vrot.slane %v5817_v2, 3  ;;  %v387_v22 = vrot.slane %v5817_v2, 4  ;;  %v388_v23 = vrot.slane %v5824_v5, 4  ;;  %s5696_s25 = smov 6   ;;  %s5697_s26 = smov 8  }
  0x12   :  { %243 = vrot.lane.b32.xlu1 %v211_v12, %s5695_s2  ;;  %v302_v21 = vsel %vm297_vm2, %v299_v17, %v301_v18  ;;  %vm386_vm3 = vcmask 1043456   ;;  %v303_v25 = vrot.slane %v5812_v1, 3  ;;  %v127_v28 = vrot.slane %v5855_v26, 1  ;;  %v5873_v36 = vld [vmem:[%s7678_s29 + $0x28] sm:$0xff]  ;;  %s5698_s30 = smov 10   ;;  %s7679_s1 = sld [smem:[#allocation8_spill]] }
  0x13   :  { %156 = vrot.lane.b32.xlu0 %v124_v15, %s5694_s22  ;;  %v300_v24 = vsel %vm297_vm2, %v298_v20, %v299_v17  ;;  %v389_v27 = vsel %vm386_vm3, %v387_v22, %v388_v23  ;;  %v390_v30 = vrot.slane %v5807_v0, 4  ;;  %v476_v32 = vrot.slane %v5817_v2, 5  ;;  %s5699_s23 = smov 12   ;;  %v5917_v60 = vld [vmem:[%s7678_s29 + $0x30] sm:$0xff]  ;;  %v5934_v9 = vld [vmem:[%s7678_s29 + $0x38] sm:$0xff] }
  0x14   :  { %v304_v29 = vsel %vm297_vm2, %v301_v18, %v303_v25  ;;  %v128_v31 = vsel %vm119_vm0, %v125_v4, %v127_v28  ;;  %v477_v33 = vrot.slane %v5824_v5, 5  ;;  %vm475_vm4 = vcmask 1042432  }
  0x15   :  { %v391_v34 = vsel %vm386_vm3, %v388_v23, %v390_v30  ;;  %v392_v35 = vrot.slane %v5812_v1, 4  ;;  %v129_v38 = vrot.slane %v5873_v36, 1  ;;  %v479_v40 = vrot.slane %v5807_v0, 5 }
  0x16   :  { %247 = vrot.lane.b32.xlu1 %v215_v16, %s5695_s2  ;;  %v478_v37 = vsel %vm475_vm4, %v476_v32, %v477_v33  ;;  %v481_v42 = vrot.slane %v5812_v1, 5  ;;  %v216_v44 = vrot.slane %v5855_v26, 2  ;;  %v566_v46 = vrot.slane %v5824_v5, 6 }
  0x17   :  { %245 = vrot.lane.b32.xlu0 %v213_v19, %s5695_s2  ;;  %v393_v39 = vsel %vm386_vm3, %v390_v30, %v392_v35  ;;  %v130_v41 = vsel %vm119_vm0, %v127_v28, %v129_v38  ;;  %v480_v43 = vsel %vm475_vm4, %v477_v33, %v479_v40  ;;  %v568_v47 = vrot.slane %v5807_v0, 6 }
  0x18   :  { %v482_v45 = vsel %vm475_vm4, %v479_v40, %v481_v42  ;;  %v217_v48 = vsel %vm208_vm1, %v214_v14, %v216_v44  ;;  %vm564_vm5 = vcmask 1041408   ;;  %v565_v49 = vrot.slane %v5817_v2, 6  ;;  %v80_v50 = vld [vmem:[%s7679_s1 + $0x8] sm:$0x3f]  ;;  %v79_v53 = vld [vmem:[%s7679_s1] sm:$0xff] }
  0x19   :  { %5092 = vmatprep.subr.msk.mxu0 %vm208_vm1, %v80_v50  ;;  %v569_v51 = vsel %vm564_vm5, %v566_v46, %v568_v47  ;;  %v305_v52 = vrot.slane %v5855_v26, 3  ;;  %v218_v55 = vrot.slane %v5873_v36, 2  ;;  %v307_v57 = vrot.slane %v5873_v36, 3 }
  0x1a   :  { %334 = vrot.lane.b32.xlu1 %v302_v21, %s5696_s25  ;;  %5093 = vmatpush3.msk.msra.mxu0 %vm208_vm1, %v80_v50  ;;  %v567_v54 = vsel %vm564_vm5, %v565_v49, %v566_v46  ;;  %v570_v59 = vrot.slane %v5812_v1, 6  ;;  %v131_v62 = vrot.slane %v5917_v60, 1  ;;  %v394_v3 = vrot.slane %v5855_v26, 4  ;;  %v6004_v49 = vld [vmem:[%s7678_s29 + $0x50] sm:$0xff] }
  0x1b   :  { %332 = vrot.lane.b32.xlu0 %v300_v24, %s5696_s25  ;;  %5094 = vmatprep.subr.mxu0 %v79_v53  ;;  %v306_v56 = vsel %vm297_vm2, %v303_v25, %v305_v52  ;;  %v219_v58 = vsel %vm208_vm1, %v216_v44, %v218_v55  ;;  %v308_v61 = vsel %vm297_vm2, %v305_v52, %v307_v57  ;;  %v483_v6 = vrot.slane %v5855_v26, 5 }
  0x1c   :  { %5095 = vmatpush3.msra.mxu0 %v79_v53  ;;  %v571_v63 = vsel %vm564_vm5, %v568_v47, %v570_v59  ;;  %v132_v4 = vsel %vm119_vm0, %v129_v38, %v131_v62  ;;  %v395_v7 = vsel %vm386_vm3, %v392_v35, %v394_v3  ;;  %v396_v8 = vrot.slane %v5873_v36, 4 }
  0x1d   :  { %v484_v10 = vsel %vm475_vm4, %v481_v42, %v483_v6  ;;  %v220_v11 = vrot.slane %v5917_v60, 2  ;;  %v133_v13 = vrot.slane %v5934_v9, 1  ;;  %v572_v15 = vrot.slane %v5855_v26, 6 }
  0x1e   :  { %421 = vrot.lane.b32.xlu1 %v389_v27, %s5697_s26  ;;  %v397_v12 = vsel %vm386_vm3, %v394_v3, %v396_v8  ;;  %v485_v17 = vrot.slane %v5873_v36, 5  ;;  %v309_v19 = vrot.slane %v5917_v60, 3  ;;  %v222_v21 = vrot.slane %v5934_v9, 2  ;;  %v5963_v27 = vld [vmem:[%s7678_s29 + $0x40] sm:$0xff] }
  0x1f   :  { %336 = vrot.lane.b32.xlu0 %v304_v29, %s5696_s25  ;;  %v221_v14 = vsel %vm208_vm1, %v218_v55, %v220_v11  ;;  %v134_v16 = vsel %vm119_vm0, %v131_v62, %v133_v13  ;;  %v573_v18 = vsel %vm564_vm5, %v570_v59, %v572_v15  ;;  %v311_v23 = vrot.slane %v5934_v9, 3 }
  0x20   :  { %v486_v20 = vsel %vm475_vm4, %v483_v6, %v485_v17  ;;  %v310_v22 = vsel %vm297_vm2, %v307_v57, %v309_v19  ;;  %v223_v24 = vsel %vm208_vm1, %v220_v11, %v222_v21  ;;  %v574_v25 = vrot.slane %v5873_v36, 6 }
  0x21   :  { %v312_v28 = vsel %vm297_vm2, %v309_v19, %v311_v23  ;;  %v135_v29 = vrot.slane %v5963_v27, 1  ;;  %v487_v33 = vrot.slane %v5917_v60, 5  ;;  %v400_v35 = vrot.slane %v5934_v9, 4 }
  0x22   :  { %160 = vrot.lane.b32.xlu1 %v128_v31, %s5694_s22  ;;  %v575_v30 = vsel %vm564_vm5, %v572_v15, %v574_v25  ;;  %v398_v31 = vrot.slane %v5917_v60, 4  ;;  %v224_v38 = vrot.slane %v5963_v27, 2  ;;  %v489_v42 = vrot.slane %v5934_v9, 5 }
  0x23   :  { %423 = vrot.lane.b32.xlu0 %v391_v34, %s5697_s26  ;;  %v136_v32 = vsel %vm119_vm0, %v133_v13, %v135_v29  ;;  %v313_v44 = vrot.slane %v5963_v27, 3  ;;  %v578_v47 = vrot.slane %v5934_v9, 6  ;;  %v402_v53 = vrot.slane %v5963_v27, 4 }
  0x24   :  { %v399_v34 = vsel %vm386_vm3, %v396_v8, %v398_v31  ;;  %v225_v40 = vsel %vm208_vm1, %v222_v21, %v224_v38  ;;  %v491_v62 = vrot.slane %v5963_v27, 5  ;;  %v227_v3 = vrot.slane %v6004_v49, 2 }
  0x25   :  { %v314_v46 = vsel %vm297_vm2, %v311_v23, %v313_v44  ;;  %vm653_vm6 = vcmask 15360   ;;  %vm672_vm7 = vcmask 31744   ;;  %vm691_vm8 = vcmask 48128  }
  0x26   :  { %510 = vrot.lane.b32.xlu1 %v478_v37, %s5698_s30  ;;  %v488_v37 = vsel %vm475_vm4, %v485_v17, %v487_v33  ;;  %v492_v6 = vsel %vm475_vm4, %v489_v42, %v491_v62  ;;  %vm710_vm9 = vcmask 64512   ;;  %vm729_vm10 = vcmask 80896  }
  0x27   :  { %425 = vrot.lane.b32.xlu0 %v393_v39, %s5697_s26  ;;  %v401_v39 = vsel %vm386_vm3, %v398_v31, %v400_v35  ;;  %vm748_vm11 = vcmask 97280   ;;  %vm823_vm12 = vcmask 113664   ;;  %vm1464_vm13 = vcmask 130048  }
  0x28   :  { %vm1475_vm14 = vcmask 195584   ;;  %vm1486_vm15 = vcmask 261120  }
  0x2a   :  { %162 = vrot.lane.b32.xlu1 %v130_v41, %s5694_s22  ;;  %v576_v41 = vrot.slane %v5917_v60, 6 }
  0x2b   :  { %512 = vrot.lane.b32.xlu0 %v480_v43, %s5698_s30 }
  0x2c   :  { %v577_v43 = vsel %vm564_vm5, %v574_v25, %v576_v41  ;;  %v579_v52 = vsel %vm564_vm5, %v576_v41, %v578_v47 }
  0x2e   :  { %514 = vrot.lane.b32.xlu1 %v482_v45, %s5698_s30  ;;  %v490_v45 = vsel %vm475_vm4, %v487_v33, %v489_v42 }
  0x2f   :  { %249 = vrot.lane.b32.xlu0 %v217_v48, %s5695_s2  ;;  %v5999_v48 = vld [vmem:[%s7678_s29 + $0x48] sm:$0xff] }
  0x30   :  { %v137_v50 = vrot.slane %v5999_v48, 1  ;;  %v315_v13 = vrot.slane %v5999_v48, 3  ;;  %v404_v21 = vrot.slane %v5999_v48, 4 }
  0x32   :  { %601 = vrot.lane.b32.xlu1 %v569_v51, %s5699_s23  ;;  %v138_v51 = vrot.slane %v6004_v49, 1 }
  0x33   :  { %599 = vrot.lane.b32.xlu0 %v567_v54, %s5699_s23  ;;  %v6015_v54 = vld [vmem:[%s7678_s29 + $0x58] sm:$0xff] }
  0x34   :  { %v139_v55 = vsel %vm119_vm0, %v137_v50, %v138_v51  ;;  %v140_v57 = vrot.slane %v6015_v54, 1  ;;  %v318_v19 = vrot.slane %v6015_v54, 3 }
  0x36   :  { %338 = vrot.lane.b32.xlu1 %v306_v56, %s5696_s25  ;;  %v403_v56 = vsel %vm386_vm3, %v400_v35, %v402_v53 }
  0x37   :  { %251 = vrot.lane.b32.xlu0 %v219_v58, %s5695_s2  ;;  %v6025_v58 = vld [vmem:[%s7678_s29 + $0x60] sm:$0xff] }
  0x38   :  { %v142_v59 = vrot.slane %v6025_v58, 1  ;;  %v231_v15 = vrot.slane %v6025_v58, 2  ;;  %v320_v25 = vrot.slane %v6025_v58, 3  ;;  %v409_v42 = vrot.slane %v6025_v58, 4 }
  0x3a   :  { %340 = vrot.lane.b32.xlu1 %v308_v61, %s5696_s25  ;;  %v141_v61 = vsel %vm119_vm0, %v138_v51, %v140_v57  ;;  %v321_v33 = vsel %vm297_vm2, %v318_v19, %v320_v25  ;;  %v496_v51 = vrot.slane %v6015_v54, 5 }
  0x3b   :  { %603 = vrot.lane.b32.xlu0 %v571_v63, %s5699_s23  ;;  %v143_v63 = vsel %vm119_vm0, %v140_v57, %v142_v59 }
  0x3e   :  { %164 = vrot.lane.b32.xlu1 %v132_v4, %s5694_s22  ;;  %v229_v4 = vrot.slane %v6015_v54, 2 }
  0x3f   :  { %427 = vrot.lane.b32.xlu0 %v395_v7, %s5697_s26  ;;  %v226_v7 = vrot.slane %v5999_v48, 2 }
  0x40   :  { %v230_v8 = vsel %vm208_vm1, %v227_v3, %v229_v4 }
  0x41   :  { %v228_v11 = vsel %vm208_vm1, %v226_v7, %v227_v3  ;;  %v585_v3 = vrot.slane %v6015_v54, 6  ;;  %v582_v7 = vrot.slane %v5999_v48, 6 }
  0x42   :  { %516 = vrot.lane.b32.xlu1 %v484_v10, %s5698_s30  ;;  %v580_v10 = vrot.slane %v5963_v27, 6 }
  0x43   :  { %429 = vrot.lane.b32.xlu0 %v397_v12, %s5697_s26 }
  0x44   :  { %v581_v12 = vsel %vm564_vm5, %v578_v47, %v580_v10 }
  0x46   :  { %253 = vrot.lane.b32.xlu1 %v221_v14, %s5695_s2  ;;  %v316_v14 = vrot.slane %v6004_v49, 3 }
  0x47   :  { %166 = vrot.lane.b32.xlu0 %v134_v16, %s5694_s22 }
  0x48   :  { %v317_v16 = vsel %vm297_vm2, %v315_v13, %v316_v14 }
  0x4a   :  { %605 = vrot.lane.b32.xlu1 %v573_v18, %s5699_s23  ;;  %v232_v18 = vsel %vm208_vm1, %v229_v4, %v231_v15 }
  0x4b   :  { %518 = vrot.lane.b32.xlu0 %v486_v20, %s5698_s30 }
  0x4e   :  { %342 = vrot.lane.b32.xlu1 %v310_v22, %s5696_s25  ;;  %v405_v22 = vrot.slane %v6004_v49, 4 }
  0x4f   :  { %255 = vrot.lane.b32.xlu0 %v223_v24, %s5695_s2  ;;  %v319_v24 = vsel %vm297_vm2, %v316_v14, %v318_v19 }
  0x52   :  { %344 = vrot.lane.b32.xlu1 %v312_v28, %s5696_s25  ;;  %v6070_v28 = vld [vmem:[%s7678_s29 + $0x68] sm:$0xff] }
  0x53   :  { %607 = vrot.lane.b32.xlu0 %v575_v30, %s5699_s23  ;;  %v406_v30 = vsel %vm386_vm3, %v404_v21, %v405_v22  ;;  %v144_v31 = vrot.slane %v6070_v28, 1 }
  0x56   :  { %168 = vrot.lane.b32.xlu1 %v136_v32, %s5694_s22 }
  0x57   :  { %431 = vrot.lane.b32.xlu0 %v399_v34, %s5697_s26  ;;  %v407_v34 = vrot.slane %v6015_v54, 4 }
  0x59   :  { %v408_v41 = vsel %vm386_vm3, %v405_v22, %v407_v34  ;;  %v410_v50 = vsel %vm386_vm3, %v407_v34, %v409_v42 }
  0x5a   :  { %520 = vrot.lane.b32.xlu1 %v488_v37, %s5698_s30  ;;  %v145_v37 = vsel %vm119_vm0, %v142_v59, %v144_v31  ;;  %v233_v59 = vrot.slane %v6070_v28, 2 }
  0x5b   :  { %433 = vrot.lane.b32.xlu0 %v401_v39, %s5697_s26  ;;  %v494_v39 = vrot.slane %v6004_v49, 5 }
  0x5d   :  { %v497_v57 = vsel %vm475_vm4, %v494_v39, %v496_v51 }
  0x5e   :  { %257 = vrot.lane.b32.xlu1 %v225_v40, %s5695_s2 }
  0x5f   :  { %170 = vrot.lane.b32.xlu0 %v135_v29, %s5694_s22 }
  0x62   :  { %609 = vrot.lane.b32.xlu1 %v577_v43, %s5699_s23  ;;  %v6090_v43 = vld [vmem:[%s7678_s29 + $0x70] sm:$0xff] }
  0x63   :  { %522 = vrot.lane.b32.xlu0 %v490_v45, %s5698_s30  ;;  %v235_v14 = vrot.slane %v6090_v43, 2 }
  0x65   :  { %v236_v22 = vsel %vm208_vm1, %v233_v59, %v235_v14 }
  0x66   :  { %346 = vrot.lane.b32.xlu1 %v314_v46, %s5696_s25  ;;  %v146_v46 = vrot.slane %v6090_v43, 1 }
  0x67   :  { %259 = vrot.lane.b32.xlu0 %v224_v38, %s5695_s2  ;;  %v493_v38 = vrot.slane %v5999_v48, 5 }
  0x69   :  { %v495_v45 = vsel %vm475_vm4, %v493_v38, %v494_v39 }
  0x6a   :  { %348 = vrot.lane.b32.xlu1 %v313_v44, %s5696_s25 }
  0x6b   :  { %611 = vrot.lane.b32.xlu0 %v579_v52, %s5699_s23 }
  0x6e   :  { %172 = vrot.lane.b32.xlu1 %v139_v55, %s5694_s22  ;;  %v498_v55 = vrot.slane %v6025_v58, 5 }
  0x6f   :  { %435 = vrot.lane.b32.xlu0 %v403_v56, %s5697_s26 }
  0x72   :  { %437 = vrot.lane.b32.xlu1 %v402_v53, %s5697_s26  ;;  %v147_v53 = vsel %vm119_vm0, %v144_v31, %v146_v46 }
  0x73   :  { %174 = vrot.lane.b32.xlu0 %v141_v61, %s5694_s22 }
  0x76   :  { %176 = vrot.lane.b32.xlu1 %v143_v63, %s5694_s22  ;;  %v583_v63 = vrot.slane %v6004_v49, 6 }
  0x77   :  { %524 = vrot.lane.b32.xlu0 %v492_v6, %s5698_s30  ;;  %v234_v6 = vsel %vm208_vm1, %v231_v15, %v233_v59 }
  0x78   :  { %v584_v13 = vsel %vm564_vm5, %v582_v7, %v583_v63 }
  0x7a   :  { %263 = vrot.lane.b32.xlu1 %v230_v8, %s5695_s2 }
  0x7b   :  { %261 = vrot.lane.b32.xlu0 %v228_v11, %s5695_s2  ;;  %v322_v11 = vrot.slane %v6070_v28, 3 }
  0x7d   :  { %v323_v15 = vsel %vm297_vm2, %v320_v25, %v322_v11 }
  0x7e   :  { %613 = vrot.lane.b32.xlu1 %v581_v12, %s5699_s23 }
  0x7f   :  { %526 = vrot.lane.b32.xlu0 %v491_v62, %s5698_s30  ;;  %v499_v62 = vsel %vm475_vm4, %v496_v51, %v498_v55 }
  0x80   :  { %v6053_v17 = vpop.permute.xlu1 %158 }
  0x81   :  { %v6057_v20 = vpop.permute.xlu0 %154 }
  0x82   :  { %350 = vrot.lane.b32.xlu1 %v317_v16, %s5696_s25  ;;  %v654_v25 = vsel %vm653_vm6, %v5817_v2, %v6057_v20 }
  0x83   :  { %265 = vrot.lane.b32.xlu0 %v232_v18, %s5695_s2  ;;  %v324_v18 = vrot.slane %v6090_v43, 3 }
  0x84   :  { %v6063_v23 = vpop.permute.xlu1 %243 }
  0x85   :  { %v157_v29 = vpop.permute.xlu0 %156  ;;  %v325_v2 = vsel %vm297_vm2, %v322_v11, %v324_v18 }
  0x86   :  { %615 = vrot.lane.b32.xlu1 %v580_v10, %s5699_s23  ;;  %v586_v10 = vsel %vm564_vm5, %v583_v63, %v585_v3  ;;  %v655_v19 = vsel %vm653_vm6, %v5824_v5, %v157_v29  ;;  %v673_v29 = vsel %vm672_vm7, %v654_v25, %v6063_v23  ;;  %v656_v63 = vsel %vm653_vm6, %v5807_v0, %v6053_v17 }
  0x87   :  { %352 = vrot.lane.b32.xlu0 %v319_v24, %s5696_s25  ;;  %v587_v24 = vrot.slane %v6025_v58, 6 }
  0x88   :  { %v6076_v32 = vpop.permute.xlu1 %247 }
  0x89   :  { %v246_v35 = vpop.permute.xlu0 %245  ;;  %v588_v39 = vsel %vm564_vm5, %v585_v3, %v587_v24 }
  0x8a   :  { %439 = vrot.lane.b32.xlu1 %v406_v30, %s5697_s26  ;;  %v6144_v30 = vld [vmem:[%s7678_s29 + $0x78] sm:$0xff]  ;;  %v674_v31 = vsel %vm672_vm7, %v655_v19, %v246_v35 }
  0x8b   :  { %354 = vrot.lane.b32.xlu0 %v321_v33, %s5696_s25  ;;  %v148_v20 = vrot.slane %v6144_v30, 1  ;;  %v237_v17 = vrot.slane %v6144_v30, 2 }
  0x8c   :  { %v335_v40 = vpop.permute.xlu1 %334 }
  0x8d   :  { %v333_v44 = vpop.permute.xlu0 %332  ;;  %v693_v33 = vsel %vm691_vm8, %v674_v31, %v335_v40  ;;  %v411_v40 = vrot.slane %v6070_v28, 4 }
  0x8e   :  { %178 = vrot.lane.b32.xlu1 %v145_v37, %s5694_s22  ;;  %v692_v34 = vsel %vm691_vm8, %v673_v29, %v333_v44  ;;  %v326_v29 = vrot.slane %v6144_v30, 3 }
  0x8f   :  { %441 = vrot.lane.b32.xlu0 %v408_v41, %s5697_s26 }
  0x90   :  { %v422_v47 = vpop.permute.xlu1 %421 }
  0x91   :  { %v6100_v52 = vpop.permute.xlu0 %336  ;;  %v711_v23 = vsel %vm710_vm9, %v692_v34, %v422_v47 }
  0x92   :  { %528 = vrot.lane.b32.xlu1 %v495_v45, %s5698_s30 }
  0x93   :  { %443 = vrot.lane.b32.xlu0 %v410_v50, %s5697_s26 }
  0x94   :  { %v6108_v56 = vpop.permute.xlu1 %160 }
  0x95   :  { %v424_v61 = vpop.permute.xlu0 %423 }
  0x96   :  { %180 = vrot.lane.b32.xlu1 %v147_v53, %s5694_s22  ;;  %v712_v37 = vsel %vm710_vm9, %v693_v33, %v424_v61  ;;  %v149_v53 = vsel %vm119_vm0, %v146_v46, %v148_v20  ;;  %v412_v61 = vsel %vm386_vm3, %v409_v42, %v411_v40  ;;  %v6191_v46 = vld [vmem:[%s7678_s29 + $0x80] sm:$0xff] }
  0x97   :  { %530 = vrot.lane.b32.xlu0 %v497_v57, %s5698_s30  ;;  %v500_v57 = vrot.slane %v6070_v28, 5  ;;  %v150_v11 = vrot.slane %v6191_v46, 1 }
  0x98   :  { %v511_v4 = vpop.permute.xlu1 %510 }
  0x99   :  { %v6121_v8 = vpop.permute.xlu0 %425  ;;  %v730_v41 = vsel %vm729_vm10, %v711_v23, %v511_v4  ;;  %v501_v0 = vsel %vm475_vm4, %v498_v55, %v500_v57  ;;  %v328_v23 = vrot.slane %v6191_v46, 3 }
  0x9a   :  { %532 = vrot.lane.b32.xlu1 %v499_v62, %s5698_s30  ;;  %v413_v62 = vrot.slane %v6090_v43, 4 }
  0x9b   :  { %267 = vrot.lane.b32.xlu0 %v234_v6, %s5695_s2  ;;  %v675_v6 = vsel %vm672_vm7, %v656_v63, %v6076_v32  ;;  %v504_v63 = vrot.slane %v6144_v30, 5 }
  0x9c   :  { %v6127_v12 = vpop.permute.xlu1 %162  ;;  %v694_v42 = vsel %vm691_vm8, %v675_v6, %v6100_v52  ;;  %v414_v32 = vsel %vm386_vm3, %v411_v40, %v413_v62  ;;  %v6250_v40 = vld [vmem:[%s7678_s29 + $0x88] sm:$0xff]  ;;  %s5705_s29 = smov 64  }
  0x9d   :  { %v513_v16 = vpop.permute.xlu0 %512  ;;  %v713_v7 = vsel %vm710_vm9, %v694_v42, %v6121_v8  ;;  %v238_v8 = vsel %vm208_vm1, %v235_v14, %v237_v17 }
  0x9e   :  { %619 = vrot.lane.b32.xlu1 %v586_v10, %s5699_s23  ;;  %v731_v35 = vsel %vm729_vm10, %v712_v37, %v513_v16  ;;  %v239_v37 = vrot.slane %v6191_v46, 2 }
  0x9f   :  { %617 = vrot.lane.b32.xlu0 %v584_v13, %s5699_s23 }
  0xa0   :  { %v515_v21 = vpop.permute.xlu1 %514 }
  0xa1   :  { %v6150_v5 = vpop.permute.xlu0 %249  ;;  %v732_v52 = vsel %vm729_vm10, %v713_v7, %v515_v21  ;;  %v502_v21 = vrot.slane %v6090_v43, 5 }
  0xa2   :  { %356 = vrot.lane.b32.xlu1 %v323_v15, %s5696_s25  ;;  %v589_v15 = vrot.slane %v6070_v28, 6 }
  0xa3   :  { %269 = vrot.lane.b32.xlu0 %v236_v22, %s5695_s2  ;;  %v151_v22 = vsel %vm119_vm0, %v148_v20, %v150_v11  ;;  %v503_v34 = vsel %vm475_vm4, %v500_v57, %v502_v21  ;;  %v327_v20 = vsel %vm297_vm2, %v324_v18, %v326_v29 }
  0xa4   :  { %v602_v38 = vpop.permute.xlu1 %601  ;;  %v590_v14 = vsel %vm564_vm5, %v587_v24, %v589_v15  ;;  %v657_v24 = vsel %vm653_vm6, %v5812_v1, %v6108_v56  ;;  %v329_v56 = vsel %vm297_vm2, %v326_v29, %v328_v23  ;;  %v330_v29 = vrot.slane %v6250_v40, 3 }
  0xa5   :  { %v750_v44 = vsel %vm748_vm11, %v731_v35, %v602_v38  ;;  %v600_v45 = vpop.permute.xlu0 %599  ;;  %v240_v38 = vsel %vm208_vm1, %v237_v17, %v239_v37  ;;  %v676_v18 = vsel %vm672_vm7, %v657_v24, %v6150_v5  ;;  %v658_v17 = vsel %vm653_vm6, %v5855_v26, %v6127_v12 }
  0xa6   :  { %v786_v50 = vrot.slane %v750_v44, 1  ;;  %v749_v51 = vsel %vm748_vm11, %v730_v41, %v600_v45  ;;  %358 = vrot.lane.b32.xlu1 %v325_v2, %s5696_s25  ;;  %v152_v45 = vrot.slane %v6250_v40, 1 }
  0xa7   :  { %v785_v47 = vrot.slane %v749_v51, 1  ;;  %621 = vrot.lane.b32.xlu0 %v588_v39, %s5699_s23  ;;  %v591_v39 = vrot.slane %v6090_v43, 6 }
  0xa8   :  { %v339_v59 = vpop.permute.xlu1 %338 }
  0xa9   :  { %v6185_v3 = vpop.permute.xlu0 %251  ;;  %v787_v4 = vsel %vm119_vm0, %v785_v47, %v786_v50  ;;  %v695_v44 = vsel %vm691_vm8, %v676_v18, %v339_v59  ;;  %v592_v5 = vsel %vm564_vm5, %v589_v15, %v591_v39  ;;  %v415_v47 = vrot.slane %v6144_v30, 4 }
  0xaa   :  { %5096 = vmatprep.mubr.msk.f32.mxu0 %vm823_vm12, %v787_v4  ;;  %182 = vrot.lane.b32.xlu1 %v149_v53, %s5694_s22  ;;  %v593_v15 = vrot.slane %v6144_v30, 6 }
  0xab   :  { %445 = vrot.lane.b32.xlu0 %v412_v61, %s5697_s26  ;;  %v153_v61 = vsel %vm119_vm0, %v150_v11, %v152_v45  ;;  %v416_v42 = vsel %vm386_vm3, %v413_v62, %v415_v47  ;;  %v505_v62 = vsel %vm475_vm4, %v502_v21, %v504_v63  ;;  %v506_v21 = vrot.slane %v6191_v46, 5 }
  0xac   :  { %v6206_v10 = vpop.permute.xlu1 %340 }
  0xad   :  { %v604_v13 = vpop.permute.xlu0 %603 }
  0xae   :  { %v751_v16 = vsel %vm748_vm11, %v732_v52, %v604_v13  ;;  %534 = vrot.lane.b32.xlu1 %v501_v0, %s5698_s30  ;;  %v417_v0 = vrot.slane %v6191_v46, 4  ;;  %v241_v52 = vrot.slane %v6250_v40, 2 }
  0xaf   :  { %v788_v55 = vrot.slane %v751_v16, 1  ;;  %447 = vrot.lane.b32.xlu0 %v414_v32, %s5697_s26  ;;  %v677_v32 = vsel %vm672_vm7, %v658_v17, %v6185_v3 }
  0xb0   :  { %v6220_v19 = vpop.permute.xlu1 %164  ;;  %v696_v11 = vsel %vm691_vm8, %v677_v32, %v6206_v10  ;;  %v418_v12 = vsel %vm386_vm3, %v415_v47, %v417_v0  ;;  %v242_v10 = vsel %vm208_vm1, %v239_v37, %v241_v52 }
  0xb1   :  { %v428_v25 = vpop.permute.xlu0 %427  ;;  %v789_v31 = vsel %vm119_vm0, %v786_v50, %v788_v55 }
  0xb2   :  { %5097 = vmatmul.mubr.msk.f32.vlgmr.msra.gmra.mxu0 %vm823_vm12, %v789_v31  ;;  %271 = vrot.lane.b32.xlu1 %v238_v8, %s5695_s2  ;;  %v714_v1 = vsel %vm710_vm9, %v695_v44, %v428_v25 }
  0xb3   :  { %184 = vrot.lane.b32.xlu0 %v151_v22, %s5694_s22 }
  0xb4   :  { %v517_v33 = vpop.permute.xlu1 %516 }
  0xb5   :  { %v430_v2 = vpop.permute.xlu0 %429  ;;  %v733_v50 = vsel %vm729_vm10, %v714_v1, %v517_v33 }
  0xb6   :  { %623 = vrot.lane.b32.xlu1 %v590_v14, %s5699_s23  ;;  %v715_v13 = vsel %vm710_vm9, %v696_v11, %v430_v2  ;;  %v594_v14 = vsel %vm564_vm5, %v591_v39, %v593_v15  ;;  %v331_v2 = vsel %vm297_vm2, %v328_v23, %v330_v29 }
  0xb7   :  { %536 = vrot.lane.b32.xlu0 %v503_v34, %s5698_s30  ;;  %v507_v34 = vsel %vm475_vm4, %v504_v63, %v506_v21 }
  0xb8   :  { %v6243_v35 = vpop.permute.xlu1 %253 }
  0xb9   :  { %v6254_v41 = vpop.permute.xlu0 %166 }
  0xba   :  { %360 = vrot.lane.b32.xlu1 %v327_v20, %s5696_s25  ;;  %v659_v20 = vsel %vm653_vm6, %v5873_v36, %v6220_v19  ;;  %v419_v19 = vrot.slane %v6250_v40, 4 }
  0xbb   :  { %273 = vrot.lane.b32.xlu0 %v240_v38, %s5695_s2  ;;  %v595_v38 = vrot.slane %v6191_v46, 6  ;;  %v678_v39 = vsel %vm672_vm7, %v659_v20, %v6243_v35 }
  0xbc   :  { %v606_v51 = vpop.permute.xlu1 %605  ;;  %v420_v47 = vsel %vm386_vm3, %v417_v0, %v419_v19  ;;  %v597_v0 = vrot.slane %v6250_v40, 6 }
  0xbd   :  { %v752_v53 = vsel %vm748_vm11, %v733_v50, %v606_v51  ;;  %v519_v57 = vpop.permute.xlu0 %518  ;;  %v596_v36 = vsel %vm564_vm5, %v593_v15, %v595_v38 }
  0xbe   :  { %v790_v59 = vrot.slane %v752_v53, 1  ;;  %362 = vrot.lane.b32.xlu1 %v329_v56, %s5696_s25  ;;  %v734_v16 = vsel %vm729_vm10, %v715_v13, %v519_v57  ;;  %v508_v53 = vrot.slane %v6250_v40, 5  ;;  %v660_v57 = vsel %vm653_vm6, %v5917_v60, %v6254_v41 }
  0xbf   :  { %625 = vrot.lane.b32.xlu0 %v592_v5, %s5699_s23  ;;  %v598_v11 = vsel %vm564_vm5, %v595_v38, %v597_v0  ;;  %vm2382_vm5 = vcmask 255104  }
  0xc0   :  { %v343_v4 = vpop.permute.xlu1 %342  ;;  %v791_v6 = vsel %vm119_vm0, %v788_v55, %v790_v59 }
  0xc1   :  { %v256_v7 = vpop.permute.xlu0 %255  ;;  %5099 = vmatprep.mubr.msk.f32.mxu0 %vm823_vm12, %v791_v6  ;;  %v697_v44 = vsel %vm691_vm8, %v678_v39, %v343_v4 }
  0xc2   :  { %186 = vrot.lane.b32.xlu1 %v153_v61, %s5694_s22  ;;  %v679_v61 = vsel %vm672_vm7, %v660_v57, %v256_v7 }
  0xc3   :  { %449 = vrot.lane.b32.xlu0 %v416_v42, %s5697_s26  ;;  %v509_v42 = vsel %vm475_vm4, %v506_v21, %v508_v53  ;;  %vm1683_vm4 = vcmask 523264  }
  0xc4   :  { %v345_v26 = vpop.permute.xlu1 %344 }
  0xc5   :  { %v608_v55 = vpop.permute.xlu0 %607  ;;  %v698_v63 = vsel %vm691_vm8, %v679_v61, %v345_v26 }
  0xc6   :  { %v753_v3 = vsel %vm748_vm11, %v734_v16, %v608_v55  ;;  %538 = vrot.lane.b32.xlu1 %v505_v62, %s5698_s30 }
  0xc7   :  { %v792_v8 = vrot.slane %v753_v3, 1  ;;  %451 = vrot.lane.b32.xlu0 %v418_v12, %s5697_s26 }
  0xc8   :  { %v6297_v22 = vpop.permute.xlu1 %168 }
  0xc9   :  { %v432_v25 = vpop.permute.xlu0 %431  ;;  %v793_v31 = vsel %vm119_vm0, %v790_v59, %v792_v8  ;;  %v661_v55 = vsel %vm653_vm6, %v5934_v9, %v6297_v22 }
  0xca   :  { %5100 = vmatmul.mubr.msk.f32.gmra.mxu0 %vm823_vm12, %v793_v31  ;;  %275 = vrot.lane.b32.xlu1 %v242_v10, %s5695_s2  ;;  %v716_v1 = vsel %vm710_vm9, %v697_v44, %v432_v25 }
  0xcb   :  { %188 = vrot.lane.b32.xlu0 %v152_v45, %s5694_s22 }
  0xcc   :  { %v521_v33 = vpop.permute.xlu1 %520 }
  0xcd   :  { %v434_v37 = vpop.permute.xlu0 %433  ;;  %v735_v23 = vsel %vm729_vm10, %v716_v1, %v521_v33 }
  0xce   :  { %627 = vrot.lane.b32.xlu1 %v594_v14, %s5699_s23  ;;  %v717_v4 = vsel %vm710_vm9, %v698_v63, %v434_v37 }
  0xcf   :  { %540 = vrot.lane.b32.xlu0 %v507_v34, %s5698_s30 }
  0xd0   :  { %v258_v24 = vpop.permute.xlu1 %257 }
  0xd1   :  { %v171_v18 = vpop.permute.xlu0 %170 }
  0xd2   :  { %364 = vrot.lane.b32.xlu1 %v331_v2, %s5696_s25  ;;  %v662_v34 = vsel %vm653_vm6, %v5963_v27, %v171_v18 }
  0xd3   :  { %277 = vrot.lane.b32.xlu0 %v241_v52, %s5695_s2  ;;  %s7680_s2 = sld [smem:[#allocation9_spill]] }
  0xd4   :  { %v610_v56 = vpop.permute.xlu1 %609 }
  0xd5   :  { %v754_v45 = vsel %vm748_vm11, %v735_v23, %v610_v56  ;;  %v523_v50 = vpop.permute.xlu0 %522 }
  0xd6   :  { %v794_v35 = vrot.slane %v754_v45, 1  ;;  %366 = vrot.lane.b32.xlu1 %v330_v29, %s5696_s25  ;;  %v736_v60 = vsel %vm729_vm10, %v717_v4, %v523_v50  ;;  %s5701_s25 = smov 32  }
  0xd7   :  { %629 = vrot.lane.b32.xlu0 %v596_v36, %s5699_s23 }
  0xd8   :  { %v347_v51 = vpop.permute.xlu1 %346  ;;  %v795_v5 = vsel %vm119_vm0, %v792_v8, %v794_v35  ;;  %v680_v8 = vsel %vm672_vm7, %v661_v55, %v258_v24 }
  0xd9   :  { %v260_v59 = vpop.permute.xlu0 %259  ;;  %5102 = vmatprep.mubr.msk.f32.mxu0 %vm823_vm12, %v795_v5  ;;  %v699_v15 = vsel %vm691_vm8, %v680_v8, %v347_v51 }
  0xda   :  { %455 = vrot.lane.b32.xlu1 %v419_v19, %s5697_s26  ;;  %v681_v22 = vsel %vm672_vm7, %v662_v34, %v260_v59 }
  0xdb   :  { %453 = vrot.lane.b32.xlu0 %v420_v47, %s5697_s26 }
  0xdc   :  { %v349_v6 = vpop.permute.xlu1 %348 }
  0xdd   :  { %v612_v41 = vpop.permute.xlu0 %611  ;;  %v700_v20 = vsel %vm691_vm8, %v681_v22, %v349_v6 }
  0xde   :  { %v755_v17 = vsel %vm748_vm11, %v736_v60, %v612_v41  ;;  %544 = vrot.lane.b32.xlu1 %v508_v53, %s5698_s30 }
  0xdf   :  { %v796_v7 = vrot.slane %v755_v17, 1  ;;  %542 = vrot.lane.b32.xlu0 %v509_v42, %s5698_s30  ;;  %s5702_s30 = smov 24  }
  0xe0   :  { %v173_v32 = vpop.permute.xlu1 %172 }
  0xe1   :  { %v436_v62 = vpop.permute.xlu0 %435  ;;  %v797_v52 = vsel %vm119_vm0, %v794_v35, %v796_v7  ;;  %v663_v53 = vsel %vm653_vm6, %v5999_v48, %v173_v32 }
  0xe2   :  { %5103 = vmatmul.mubr.msk.f32.gmra.mxu0 %vm823_vm12, %v797_v52  ;;  %633 = vrot.lane.b32.xlu1 %v597_v0, %s5699_s23  ;;  %v718_v21 = vsel %vm710_vm9, %v699_v15, %v436_v62 }
  0xe3   :  { %631 = vrot.lane.b32.xlu0 %v598_v11, %s5699_s23 }
  0xe4   :  { %v438_v13 = vpop.permute.xlu1 %437 }
  0xe5   :  { %v175_v26 = vpop.permute.xlu0 %174  ;;  %v719_v24 = vsel %vm710_vm9, %v700_v20, %v438_v13 }
  0xe6   :  { %v664_v5 = vsel %vm653_vm6, %v6004_v49, %v175_v26 }
  0xe8   :  { %v177_v12 = vpop.permute.xlu1 %176 }
  0xe9   :  { %v525_v16 = vpop.permute.xlu0 %524  ;;  %v665_v62 = vsel %vm653_vm6, %v6015_v54, %v177_v12 }
  0xea   :  { %v737_v25 = vsel %vm729_vm10, %v718_v21, %v525_v16 }
  0xec   :  { %v264_v3 = vpop.permute.xlu1 %263 }
  0xed   :  { %v262_v10 = vpop.permute.xlu0 %261  ;;  %v683_v57 = vsel %vm672_vm7, %v664_v5, %v264_v3 }
  0xee   :  { %v682_v61 = vsel %vm672_vm7, %v663_v53, %v262_v10 }
  0xf0   :  { %v614_v31 = vpop.permute.xlu1 %613 }
  0xf1   :  { %v756_v14 = vsel %vm748_vm11, %v737_v25, %v614_v31  ;;  %v527_v29 = vpop.permute.xlu0 %526 }
  0xf2   :  { %v798_v33 = vrot.slane %v756_v14, 1  ;;  %v738_v38 = vsel %vm729_vm10, %v719_v24, %v527_v29 }
  0xf4   :  { %v351_v37 = vpop.permute.xlu1 %350  ;;  %v799_v9 = vsel %vm119_vm0, %v796_v7, %v798_v33 }
  0xf5   :  { %v266_v2 = vpop.permute.xlu0 %265  ;;  %5105 = vmatprep.mubr.msk.f32.mxu0 %vm823_vm12, %v799_v9  ;;  %v701_v4 = vsel %vm691_vm8, %v682_v61, %v351_v37 }
  0xf6   :  { %v684_v26 = vsel %vm672_vm7, %v665_v62, %v266_v2 }
  0xf8   :  { %v616_v39 = vpop.permute.xlu1 %615 }
  0xf9   :  { %v757_v44 = vsel %vm748_vm11, %v738_v38, %v616_v39  ;;  %v353_v1 = vpop.permute.xlu0 %352 }
  0xfa   :  { %v800_v23 = vrot.slane %v757_v44, 1  ;;  %v702_v63 = vsel %vm691_vm8, %v683_v57, %v353_v1 }
  0xfc   :  { %v440_v27 = vpop.permute.xlu1 %439  ;;  %v801_v18 = vsel %vm119_vm0, %v798_v33, %v800_v23 }
  0xfd   :  { %v355_v56 = vpop.permute.xlu0 %354  ;;  %5106 = vmatmul.mubr.msk.f32.gmra.mxu0 %vm823_vm12, %v801_v18  ;;  %v720_v42 = vsel %vm710_vm9, %v701_v4, %v440_v27 }
  0xfe   :  { %v703_v16 = vsel %vm691_vm8, %v684_v26, %v355_v56 }
 0x100   :  { %v179_v36 = vpop.permute.xlu1 %178 }
 0x101   :  { %v442_v19 = vpop.permute.xlu0 %441  ;;  %v666_v29 = vsel %vm653_vm6, %v6025_v58, %v179_v36 }
 0x102   :  { %v721_v6 = vsel %vm710_vm9, %v702_v63, %v442_v19 }
 0x104   :  { %v529_v45 = vpop.permute.xlu1 %528 }
 0x105   :  { %v444_v50 = vpop.permute.xlu0 %443  ;;  %v739_v60 = vsel %vm729_vm10, %v720_v42, %v529_v45 }
 0x106   :  { %v722_v55 = vsel %vm710_vm9, %v703_v16, %v444_v50 }
 0x108   :  { %v181_v35 = vpop.permute.xlu1 %180 }
 0x109   :  { %v531_v51 = vpop.permute.xlu0 %530  ;;  %v667_v58 = vsel %vm653_vm6, %v6070_v28, %v181_v35 }
 0x10a   :  { %v740_v0 = vsel %vm729_vm10, %v721_v6, %v531_v51 }
 0x10c   :  { %v533_v47 = vpop.permute.xlu1 %532 }
 0x10d   :  { %v268_v59 = vpop.permute.xlu0 %267  ;;  %v741_v8 = vsel %vm729_vm10, %v722_v55, %v533_v47 }
 0x10e   :  { %v685_v34 = vsel %vm672_vm7, %v666_v29, %v268_v59 }
 0x110   :  { %v620_v49 = vpop.permute.xlu1 %619 }
 0x111   :  { %v759_v48 = vsel %vm748_vm11, %v740_v0, %v620_v49  ;;  %v618_v41 = vpop.permute.xlu0 %617 }
 0x112   :  { %v803_v17 = vrot.slane %v759_v48, 1  ;;  %v758_v7 = vsel %vm748_vm11, %v739_v60, %v618_v41 }
 0x113   :  { %v802_v32 = vrot.slane %v758_v7, 1 }
 0x114   :  { %v357_v11 = vpop.permute.xlu1 %356 }
 0x115   :  { %v270_v52 = vpop.permute.xlu0 %269  ;;  %v804_v13 = vsel %vm119_vm0, %v802_v32, %v803_v17  ;;  %v704_v9 = vsel %vm691_vm8, %v685_v34, %v357_v11 }
 0x116   :  { %5108 = vmatprep.mubr.msk.f32.mxu0 %vm823_vm12, %v804_v13  ;;  %v686_v27 = vsel %vm672_vm7, %v667_v58, %v270_v52 }
 0x118   :  { %v359_v3 = vpop.permute.xlu1 %358 }
 0x119   :  { %v622_v10 = vpop.permute.xlu0 %621  ;;  %v705_v18 = vsel %vm691_vm8, %v686_v27, %v359_v3 }
 0x11a   :  { %v760_v15 = vsel %vm748_vm11, %v741_v8, %v622_v10 }
 0x11b   :  { %v805_v21 = vrot.slane %v760_v15, 1 }
 0x11c   :  { %v183_v25 = vpop.permute.xlu1 %182 }
 0x11d   :  { %v446_v54 = vpop.permute.xlu0 %445  ;;  %v806_v12 = vsel %vm119_vm0, %v803_v17, %v805_v21  ;;  %v668_v57 = vsel %vm653_vm6, %v6090_v43, %v183_v25 }
 0x11e   :  { %5109 = vmatmul.mubr.msk.f32.gmra.mxu0 %vm823_vm12, %v806_v12  ;;  %v723_v22 = vsel %vm710_vm9, %v704_v9, %v446_v54 }
 0x120   :  { %v535_v31 = vpop.permute.xlu1 %534 }
 0x121   :  { %v448_v14 = vpop.permute.xlu0 %447  ;;  %v742_v2 = vsel %vm729_vm10, %v723_v22, %v535_v31 }
 0x122   :  { %v724_v56 = vsel %vm710_vm9, %v705_v18, %v448_v14 }
 0x124   :  { %v272_v33 = vpop.permute.xlu1 %271 }
 0x125   :  { %v185_v37 = vpop.permute.xlu0 %184  ;;  %v687_v61 = vsel %vm672_vm7, %v668_v57, %v272_v33 }
 0x126   :  { %v669_v43 = vsel %vm653_vm6, %v6144_v30, %v185_v37 }
 0x128   :  { %v624_v20 = vpop.permute.xlu1 %623 }
 0x129   :  { %v761_v24 = vsel %vm748_vm11, %v742_v2, %v624_v20  ;;  %v537_v38 = vpop.permute.xlu0 %536 }
 0x12a   :  { %v807_v39 = vrot.slane %v761_v24, 1  ;;  %v743_v19 = vsel %vm729_vm10, %v724_v56, %v537_v38 }
 0x12c   :  { %v361_v44 = vpop.permute.xlu1 %360  ;;  %v808_v1 = vsel %vm119_vm0, %v805_v21, %v807_v39 }
 0x12d   :  { %v274_v23 = vpop.permute.xlu0 %273  ;;  %5111 = vmatprep.mubr.msk.f32.mxu0 %vm823_vm12, %v808_v1  ;;  %v706_v4 = vsel %vm691_vm8, %v687_v61, %v361_v44 }
 0x12e   :  { %v688_v32 = vsel %vm672_vm7, %v669_v43, %v274_v23 }
 0x130   :  { %v363_v36 = vpop.permute.xlu1 %362 }
 0x131   :  { %v626_v45 = vpop.permute.xlu0 %625  ;;  %v707_v11 = vsel %vm691_vm8, %v688_v32, %v363_v36 }
 0x132   :  { %v762_v50 = vsel %vm748_vm11, %v743_v19, %v626_v45  ;;  %v819_v45 = vlaneseq }
 0x133   :  { %v809_v51 = vrot.slane %v762_v50, 1 }
 0x134   :  { %v187_v5 = vpop.permute.xlu1 %186 }
 0x135   :  { %v450_v47 = vpop.permute.xlu0 %449  ;;  %v810_v28 = vsel %vm119_vm0, %v807_v39, %v809_v51  ;;  %v670_v21 = vsel %vm653_vm6, %v6191_v46, %v187_v5  ;;  %v81_v39 = vld [vmem:[%s7658_s5] sm:$0xff]  ;;  %v6460_v5 = vshrl.u32 %v819_v45, 7 }
 0x136   :  { %5112 = vmatmul.mubr.msk.f32.gmra.mxu0 %vm823_vm12, %v810_v28  ;;  %v725_v6 = vsel %vm710_vm9, %v706_v4, %v450_v47  ;;  %5152 = vmatprep.mubr.f32.mxu1 %v81_v39 }
 0x137   :  { %v6463_v28 = vsub.s32 0, %v6460_v5 }
 0x138   :  { %v539_v35 = vpop.permute.xlu1 %538 }
 0x139   :  { %v452_v53 = vpop.permute.xlu0 %451  ;;  %v744_v42 = vsel %vm729_vm10, %v725_v6, %v539_v35  ;;  %v6468_v35 = vld [vmem:[%s7657_s4] sm:$0xff]  ;;  %v1042_v6 = vsub.s32 2, %v6460_v5 }
 0x13a   :  { %v726_v62 = vsel %vm710_vm9, %v707_v11, %v452_v53  ;;  %v6472_v57 = vrot.slane %v6468_v35, %v6463_v28 }
 0x13c   :  { %v276_v59 = vpop.permute.xlu1 %275 }
 0x13d   :  { %v189_v63 = vpop.permute.xlu0 %188  ;;  %v689_v12 = vsel %vm672_vm7, %v670_v21, %v276_v59  ;;  %v1022_v59 = vsub.s32 1, %v6460_v5 }
 0x13e   :  { %v671_v10 = vsel %vm653_vm6, %v6250_v40, %v189_v63  ;;  %vm2494_vm6 = vcmask 125954  }
 0x140   :  { %v628_v0 = vpop.permute.xlu1 %627 }
 0x141   :  { %v763_v49 = vsel %vm748_vm11, %v744_v42, %v628_v0  ;;  %v541_v60 = vpop.permute.xlu0 %540 }
 0x142   :  { %v811_v48 = vrot.slane %v763_v49, 1  ;;  %v745_v13 = vsel %vm729_vm10, %v726_v62, %v541_v60  ;;  %v6480_v49 = vrot.slane %v6468_v35, %v1022_v59 }
 0x144   :  { %v365_v41 = vpop.permute.xlu1 %364  ;;  %v812_v17 = vsel %vm119_vm0, %v809_v51, %v811_v48 }
 0x145   :  { %v278_v7 = vpop.permute.xlu0 %277  ;;  %5114 = vmatprep.mubr.msk.f32.mxu0 %vm823_vm12, %v812_v17  ;;  %v708_v14 = vsel %vm691_vm8, %v689_v12, %v365_v41 }
 0x146   :  { %v690_v25 = vsel %vm672_vm7, %v671_v10, %v278_v7  ;;  %v6485_v7 = vrot.slane %v6468_v35, %v1042_v6  ;;  %vm2496_vm7 = vcmask 257154  }
 0x148   :  { %v367_v52 = vpop.permute.xlu1 %366 }
 0x149   :  { %v630_v26 = vpop.permute.xlu0 %629  ;;  %v709_v31 = vsel %vm691_vm8, %v690_v25, %v367_v52  ;;  %vm2722_vm8 = vcmask 130054  }
 0x14a   :  { %v764_v16 = vsel %vm748_vm11, %v745_v13, %v630_v26 }
 0x14b   :  { %v813_v55 = vrot.slane %v764_v16, 1 }
 0x14c   :  { %v456_v3 = vpop.permute.xlu1 %455 }
 0x14d   :  { %v454_v8 = vpop.permute.xlu0 %453  ;;  %v814_v30 = vsel %vm119_vm0, %v811_v48, %v813_v55  ;;  %v728_v29 = vsel %vm710_vm9, %v709_v31, %v456_v3 }
 0x14e   :  { %5115 = vmatmul.mubr.msk.f32.gmra.mxu0 %vm823_vm12, %v814_v30  ;;  %v727_v33 = vsel %vm710_vm9, %v708_v14, %v454_v8 }
 0x150   :  { %v545_v15 = vpop.permute.xlu1 %544 }
 0x151   :  { %v543_v54 = vpop.permute.xlu0 %542  ;;  %v747_v34 = vsel %vm729_vm10, %v728_v29, %v545_v15 }
 0x152   :  { %v746_v37 = vsel %vm729_vm10, %v727_v33, %v543_v54  ;;  %vm2608_vm10 = vcmask 128004  }
 0x154   :  { %v634_v40 = vpop.permute.xlu1 %633 }
 0x155   :  { %v766_v46 = vsel %vm748_vm11, %v747_v34, %v634_v40  ;;  %v632_v9 = vpop.permute.xlu0 %631 }
 0x156   :  { %v817_v22 = vrot.slane %v766_v46, 1  ;;  %v765_v2 = vsel %vm748_vm11, %v746_v37, %v632_v9  ;;  %vm2610_vm11 = vcmask 259204  }
 0x157   :  { %v815_v20 = vrot.slane %v765_v2, 1 }
 0x159   :  { %v816_v24 = vsel %vm119_vm0, %v813_v55, %v815_v20  ;;  %v818_v38 = vsel %vm119_vm0, %v815_v20, %v817_v22 }
 0x15a   :  { %5117 = vmatprep.mubr.msk.f32.mxu0 %vm823_vm12, %v816_v24 }
 0x15b   :  { %5118 = vmatmul.mubr.msk.f32.gmra.mxu0 %vm823_vm12, %v818_v38  ;;  %vm3387_vm12 = vcmask 1042304  }
 0x172   :  { %v6452_v44 = vpop.f32.mrf.mxu0 }
 0x174   :  { %v6454_v1 = vpop.f32.mrf.mxu0 }
 0x18a   :  { %v6456_v58 = vpop.f32.mrf.mxu0 }
 0x18b   :  { %v941_v24 = vadd.f32 %v6456_v58, %v6472_v57  ;;  %v931_v58 = vadd.f32 %v6452_v44, %v6472_v57 }
 0x18c   :  { %v6458_v23 = vpop.f32.mrf.mxu0 }
 0x18d   :  { %v1007_v45 = vmax.f32 %v941_v24, 0.0 }
 0x18f   :  { %v1027_v44 = vmul.f32 %v6480_v49, %v1007_v45 }
 0x1a2   :  { %v5104_v27 = vpop.f32.mrf.mxu0 }
 0x1a3   :  { %v951_v34 = vadd.f32 %v5104_v27, %v6472_v57 }
 0x1a4   :  { %v945_v18 = vpop.f32.mrf.mxu0 }
 0x1a5   :  { %v946_v9 = vadd.f32 %v945_v18, %v6472_v57  ;;  %v1009_v38 = vmax.f32 %v951_v34, 0.0  ;;  %v936_v18 = vadd.f32 %v6458_v23, %v6472_v57  ;;  %v926_v23 = vadd.f32 %v6454_v1, %v6472_v57 }
 0x1bd   :  { %v5107_v56 = vpop.f32.mrf.mxu0 }
 0x1be   :  { %v961_v21 = vadd.f32 %v5107_v56, %v6472_v57  ;;  %v1008_v56 = vmax.f32 %v946_v9, 0.0 }
 0x1bf   :  { %v955_v36 = vpop.f32.mrf.mxu0 }
 0x1c0   :  { %v956_v31 = vadd.f32 %v955_v36, %v6472_v57  ;;  %v1011_v40 = vmax.f32 %v961_v21, 0.0  ;;  %v99_v21 = vld [vmem:[%s7658_s5 + $0x90] sm:$0xff] }
 0x1c2   :  { %v1010_v22 = vmax.f32 %v956_v31, 0.0  ;;  %v1031_v39 = vmul.f32 %v6480_v49, %v1011_v40 }
 0x1c4   :  { %v1030_v36 = vmul.f32 %v6480_v49, %v1010_v22 }
 0x1c6   :  { %v1050_v59 = vadd.f32 %v6485_v7, %v1030_v36 }
 0x1de   :  { %v5110_v19 = vpop.f32.mrf.mxu0 }
 0x1df   :  { %v971_v13 = vadd.f32 %v5110_v19, %v6472_v57 }
 0x1e0   :  { %v965_v50 = vpop.f32.mrf.mxu0 }
 0x1e1   :  { %v966_v8 = vadd.f32 %v965_v50, %v6472_v57  ;;  %v1013_v25 = vmax.f32 %v971_v13, 0.0  ;;  %v1029_v50 = vmul.f32 %v6480_v49, %v1009_v38  ;;  %v90_v13 = vld [vmem:[%s7658_s5 + $0x48] sm:$0xff] }
 0x1e3   :  { %v1012_v14 = vmax.f32 %v966_v8, 0.0  ;;  %v1033_v37 = vmul.f32 %v6480_v49, %v1013_v25  ;;  %v95_v8 = vld [vmem:[%s7658_s5 + $0x70] sm:$0xff]  ;;  %v100_v25 = vld [vmem:[%s7658_s5 + $0x98] sm:$0xff] }
 0x1e5   :  { %v1032_v2 = vmul.f32 %v6480_v49, %v1012_v14  ;;  %v1053_v27 = vadd.f32 %v6485_v7, %v1033_v37 }
 0x1e7   :  { %v1052_v19 = vadd.f32 %v6485_v7, %v1032_v2 }
 0x1f6   :  { %v5113_v51 = vpop.f32.mrf.mxu0 }
 0x1f7   :  { %v981_v48 = vadd.f32 %v5113_v51, %v6472_v57  ;;  %v1051_v51 = vadd.f32 %v6485_v7, %v1031_v39 }
 0x1f8   :  { %v975_v47 = vpop.f32.mrf.mxu0 }
 0x1f9   :  { %v976_v32 = vadd.f32 %v975_v47, %v6472_v57  ;;  %v1015_v26 = vmax.f32 %v981_v48, 0.0  ;;  %v1006_v47 = vmax.f32 %v936_v18, 0.0 }
 0x1fb   :  { %v1014_v30 = vmax.f32 %v976_v32, 0.0  ;;  %v1035_v54 = vmul.f32 %v6480_v49, %v1015_v26  ;;  %v1026_v6 = vmul.f32 %v6480_v49, %v1006_v47  ;;  %v86_v32 = vld [vmem:[%s7658_s5 + $0x28] sm:$0xff]  ;;  %v91_v26 = vld [vmem:[%s7658_s5 + $0x50] sm:$0xff] }
 0x1fd   :  { %v1034_v29 = vmul.f32 %v6480_v49, %v1014_v30  ;;  %v1055_v46 = vadd.f32 %v6485_v7, %v1035_v54  ;;  %v96_v30 = vld [vmem:[%s7658_s5 + $0x78] sm:$0xff] }
 0x1ff   :  { %v1054_v20 = vadd.f32 %v6485_v7, %v1034_v29 }
 0x20e   :  { %v5116_v53 = vpop.f32.mrf.mxu0 }
 0x20f   :  { %v991_v63 = vadd.f32 %v5116_v53, %v6472_v57  ;;  %v1028_v53 = vmul.f32 %v6480_v49, %v1008_v56 }
 0x210   :  { %v985_v61 = vpop.f32.mrf.mxu0 }
 0x211   :  { %v986_v42 = vadd.f32 %v985_v61, %v6472_v57  ;;  %v1017_v41 = vmax.f32 %v991_v63, 0.0  ;;  %v1005_v61 = vmax.f32 %v931_v58, 0.0  ;;  %v1049_v63 = vadd.f32 %v6485_v7, %v1029_v50 }
 0x212   :  { %v1048_v1 = vadd.f32 %v6485_v7, %v1028_v53 }
 0x213   :  { %v1016_v11 = vmax.f32 %v986_v42, 0.0  ;;  %v1037_v16 = vmul.f32 %v6480_v49, %v1017_v41  ;;  %v1047_v42 = vadd.f32 %v6485_v7, %v1027_v44  ;;  %v1239_v44 = vld [vmem:[%s7680_s2 + $0x20] sm:$0xff] }
 0x214   :  { %5182 = vmatprep.subr.mxu0 %v1239_v44 }
 0x215   :  { %v1036_v10 = vmul.f32 %v6480_v49, %v1016_v11  ;;  %v1057_v12 = vadd.f32 %v6485_v7, %v1037_v16  ;;  %v87_v11 = vld [vmem:[%s7658_s5 + $0x30] sm:$0xff]  ;;  %v92_v16 = vld [vmem:[%s7658_s5 + $0x58] sm:$0xff]  ;;  %5183 = vmatpush3.msra.mxu0 %v1239_v44 }
 0x217   :  { %v1056_v33 = vadd.f32 %v6485_v7, %v1036_v10  ;;  %v97_v10 = vld [vmem:[%s7658_s5 + $0x80] sm:$0xff] }
 0x21b   :  { %v5119_v4 = vpop.f32.mrf.mxu0 }
 0x21c   :  { %v1001_v0 = vadd.f32 %v5119_v4, %v6472_v57  ;;  %v1004_v4 = vmax.f32 %v926_v23, 0.0 }
 0x21d   :  { %v995_v60 = vpop.f32.mrf.mxu0 }
 0x21e   :  { %v1019_v17 = vmax.f32 %v1001_v0, 0.0  ;;  %v996_v43 = vadd.f32 %v995_v60, %v6472_v57  ;;  %v1025_v57 = vmul.f32 %v6480_v49, %v1005_v61  ;;  %v1024_v0 = vmul.f32 %v6480_v49, %v1004_v4 }
 0x21f   :  { %v1046_v60 = vadd.f32 %v6485_v7, %v1026_v6 }
 0x220   :  { %v1039_v62 = vmul.f32 %v6480_v49, %v1019_v17  ;;  %v1018_v52 = vmax.f32 %v996_v43, 0.0  ;;  %v1045_v48 = vadd.f32 %v6485_v7, %v1025_v57  ;;  %v1044_v41 = vadd.f32 %v6485_v7, %v1024_v0  ;;  %v82_v17 = vld [vmem:[%s7658_s5 + $0x8] sm:$0xff]  ;;  %v84_v43 = vld [vmem:[%s7658_s5 + $0x18] sm:$0xff]  ;;  %v1237_v0 = vld [vmem:[%s7680_s2 + $0x10] sm:$0xff] }
 0x222   :  { %v1038_v55 = vmul.f32 %v6480_v49, %v1018_v52  ;;  %v1059_v3 = vadd.f32 %v6485_v7, %v1039_v62  ;;  %v83_v49 = vld [vmem:[%s7658_s5 + $0x10] sm:$0xff]  ;;  %v88_v62 = vld [vmem:[%s7658_s5 + $0x38] sm:$0xff]  ;;  %v89_v52 = vld [vmem:[%s7658_s5 + $0x40] sm:$0xff] }
 0x224   :  { %5120 = vmatprep.subr.mxu1 %v1059_v3  ;;  %v1058_v15 = vadd.f32 %v6485_v7, %v1038_v55  ;;  %v85_v7 = vld [vmem:[%s7658_s5 + $0x20] sm:$0xff] }
 0x225   :  { %5121 = vmatpush3.msra.mxu1 %v1059_v3  ;;  %v93_v55 = vld [vmem:[%s7658_s5 + $0x60] sm:$0xff]  ;;  %v94_v3 = vld [vmem:[%s7658_s5 + $0x68] sm:$0xff] }
 0x226   :  { %5122 = vmatprep.subr.mxu1 %v1058_v15 }
 0x227   :  { %5123 = vmatpush3.msra.mxu1 %v1058_v15  ;;  %v98_v15 = vld [vmem:[%s7658_s5 + $0x88] sm:$0xff]  ;;  %s5700_s5 = smov 16  }
 0x228   :  { %5124 = vmatprep.subr.mxu1 %v1057_v12 }
 0x229   :  { %5125 = vmatpush3.msra.mxu1 %v1057_v12 }
 0x22a   :  { %5126 = vmatprep.subr.mxu1 %v1056_v33 }
 0x22b   :  { %5127 = vmatpush3.msra.mxu1 %v1056_v33 }
 0x22c   :  { %5128 = vmatprep.subr.mxu1 %v1055_v46 }
 0x22d   :  { %5129 = vmatpush3.msra.mxu1 %v1055_v46 }
 0x22e   :  { %5130 = vmatprep.subr.mxu1 %v1054_v20 }
 0x22f   :  { %5131 = vmatpush3.msra.mxu1 %v1054_v20 }
 0x230   :  { %5132 = vmatprep.subr.mxu1 %v1053_v27 }
 0x231   :  { %5133 = vmatpush3.msra.mxu1 %v1053_v27 }
 0x232   :  { %5134 = vmatprep.subr.mxu1 %v1052_v19 }
 0x233   :  { %5135 = vmatpush3.msra.mxu1 %v1052_v19 }
 0x234   :  { %5136 = vmatprep.subr.mxu1 %v1051_v51 }
 0x235   :  { %5137 = vmatpush3.msra.mxu1 %v1051_v51 }
 0x236   :  { %5138 = vmatprep.subr.mxu1 %v1050_v59 }
 0x237   :  { %5139 = vmatpush3.msra.mxu1 %v1050_v59 }
 0x238   :  { %5140 = vmatprep.subr.mxu1 %v1049_v63 }
 0x239   :  { %5141 = vmatpush3.msra.mxu1 %v1049_v63 }
 0x23a   :  { %5142 = vmatprep.subr.mxu1 %v1048_v1 }
 0x23b   :  { %5143 = vmatpush3.msra.mxu1 %v1048_v1 }
 0x23c   :  { %5144 = vmatprep.subr.mxu1 %v1047_v42 }
 0x23d   :  { %5145 = vmatpush3.msra.mxu1 %v1047_v42  ;;  %v1238_v42 = vld [vmem:[%s7680_s2 + $0x18] sm:$0xff] }
 0x23e   :  { %5146 = vmatprep.subr.mxu1 %v1046_v60  ;;  %5184 = vmatprep.subr.mxu0 %v1238_v42 }
 0x23f   :  { %5147 = vmatpush3.msra.mxu1 %v1046_v60  ;;  %5185 = vmatpush3.msra.mxu0 %v1238_v42 }
 0x240   :  { %5148 = vmatprep.subr.mxu1 %v1045_v48  ;;  %5186 = vmatprep.subr.mxu0 %v1237_v0 }
 0x241   :  { %5149 = vmatpush3.msra.mxu1 %v1045_v48  ;;  %5187 = vmatpush3.msra.mxu0 %v1237_v0 }
 0x242   :  { %5150 = vmatprep.subr.mxu1 %v1044_v41 }
 0x243   :  { %5151 = vmatpush3.msra.mxu1 %v1044_v41 }
 0x244   :  { %5153 = vmatmul.mubr.f32.vlgmr.msra.gmra.mxu1 %v82_v17 }
 0x245   :  { %5155 = vmatprep.mubr.f32.mxu1 %v83_v49 }
 0x248   :  { %5156 = vmatmul.mubr.f32.gmra.mxu1 %v84_v43 }
 0x249   :  { %5158 = vmatprep.mubr.f32.mxu1 %v85_v7 }
 0x24c   :  { %5159 = vmatmul.mubr.f32.gmra.mxu1 %v86_v32  ;;  %v1236_v32 = vld [vmem:[%s7680_s2 + $0x8] sm:$0xff] }
 0x24d   :  { %5161 = vmatprep.mubr.f32.mxu1 %v87_v11  ;;  %5188 = vmatprep.subr.mxu0 %v1236_v32 }
 0x24e   :  { %5189 = vmatpush3.msra.mxu0 %v1236_v32 }
 0x250   :  { %5162 = vmatmul.mubr.f32.gmra.mxu1 %v88_v62 }
 0x251   :  { %5164 = vmatprep.mubr.f32.mxu1 %v89_v52 }
 0x254   :  { %5165 = vmatmul.mubr.f32.gmra.mxu1 %v90_v13  ;;  %v1235_v13 = vld [vmem:[%s7680_s2] sm:$0xff] }
 0x255   :  { %5167 = vmatprep.mubr.f32.mxu1 %v91_v26  ;;  %5190 = vmatprep.subr.mxu0 %v1235_v13 }
 0x256   :  { %5191 = vmatpush3.msra.mxu0 %v1235_v13 }
 0x258   :  { %5168 = vmatmul.mubr.f32.gmra.mxu1 %v92_v16 }
 0x259   :  { %5170 = vmatprep.mubr.f32.mxu1 %v93_v55 }
 0x25c   :  { %5171 = vmatmul.mubr.f32.gmra.mxu1 %v94_v3 }
 0x25d   :  { %5173 = vmatprep.mubr.f32.mxu1 %v95_v8 }
 0x260   :  { %5174 = vmatmul.mubr.f32.gmra.mxu1 %v96_v30 }
 0x261   :  { %5176 = vmatprep.mubr.f32.mxu1 %v97_v10 }
 0x264   :  { %5177 = vmatmul.mubr.f32.gmra.mxu1 %v98_v15 }
 0x265   :  { %5179 = vmatprep.mubr.f32.mxu1 %v99_v21 }
 0x268   :  { %5180 = vmatmul.mubr.f32.gmra.mxu1 %v100_v25 }
 0x304   :  { %v5154_v54 = vpop.f32.mrf.mxu1 }
 0x306   :  { %v1126_v12 = vpop.f32.mrf.mxu1 }
 0x308   :  { %v5157_v31 = vpop.f32.mrf.mxu1 }
 0x30a   :  { %v1136_v14 = vpop.f32.mrf.mxu1 }
 0x30c   :  { %v6591_v29 = vpop.f32.mrf.mxu1 }
 0x30e   :  { %v1146_v33 = vpop.f32.mrf.mxu1 }
 0x310   :  { %v6593_v34 = vpop.f32.mrf.mxu1 }
 0x312   :  { %v6595_v40 = vpop.f32.mrf.mxu1 }
 0x314   :  { %v6597_v37 = vpop.f32.mrf.mxu1 }
 0x316   :  { %v6599_v46 = vpop.f32.mrf.mxu1 }
 0x318   :  { %v5169_v9 = vpop.f32.mrf.mxu1 }
 0x319   :  { %v6601_v22 = vmax.f32 %v5154_v54, %v5169_v9 }
 0x31a   :  { %v1176_v2 = vpop.f32.mrf.mxu1 }
 0x31b   :  { %v6603_v20 = vmax.f32 %v1126_v12, %v1176_v2  ;;  %v1311_v39 = vrot.slane %v6601_v22, 2  ;;  %v1263_v18 = vrot.slane %v6601_v22, 1  ;;  %v1407_v23 = vrot.slane %v6601_v22, 4 }
 0x31c   :  { %v5172_v24 = vpop.f32.mrf.mxu1  ;;  %v1359_v47 = vrot.slane %v6601_v22, 3 }
 0x31d   :  { %v1310_v38 = vrot.slane %v6603_v20, 2  ;;  %v1262_v27 = vrot.slane %v6603_v20, 1  ;;  %v1406_v36 = vrot.slane %v6603_v20, 4  ;;  %v1358_v50 = vrot.slane %v6603_v20, 3 }
 0x31e   :  { %v1186_v56 = vpop.f32.mrf.mxu1  ;;  %v6617_v51 = vmax.f32 %v5157_v31, %v5172_v24 }
 0x31f   :  { %v6610_v19 = vmax.f32 %v1136_v14, %v1186_v56  ;;  %v1312_v58 = vsel %vm208_vm1, %v1310_v38, %v1311_v39  ;;  %v1264_v45 = vsel %vm119_vm0, %v1262_v27, %v1263_v18  ;;  %v1408_v53 = vsel %vm386_vm3, %v1406_v36, %v1407_v23 }
 0x320   :  { %1328 = vrot.lane.b32.xlu1 %v1312_v58, %s5700_s5  ;;  %1280 = vrot.lane.b32.xlu0 %v1264_v45, %s5697_s26  ;;  %v1360_v59 = vsel %vm297_vm2, %v1358_v50, %v1359_v47  ;;  %v1267_v63 = vrot.slane %v6617_v51, 1  ;;  %v5175_v4 = vpop.f32.mrf.mxu1  ;;  %v1315_v60 = vrot.slane %v6617_v51, 2  ;;  %v1363_v43 = vrot.slane %v6617_v51, 3 }
 0x321   :  { %v1265_v61 = vrot.slane %v6610_v19, 1  ;;  %v1313_v57 = vrot.slane %v6610_v19, 2  ;;  %v1361_v49 = vrot.slane %v6610_v19, 3  ;;  %v1409_v52 = vrot.slane %v6610_v19, 4 }
 0x322   :  { %v1196_v48 = vpop.f32.mrf.mxu1  ;;  %v1411_v55 = vrot.slane %v6617_v51, 4  ;;  %v6682_v31 = vmax.f32 %v6591_v29, %v5175_v4 }
 0x323   :  { %v1268_v6 = vsel %vm119_vm0, %v1265_v61, %v1267_v63  ;;  %v1266_v1 = vsel %vm119_vm0, %v1263_v18, %v1265_v61  ;;  %v1314_v41 = vsel %vm208_vm1, %v1311_v39, %v1313_v57  ;;  %v1316_v17 = vsel %vm208_vm1, %v1313_v57, %v1315_v60 }
 0x324   :  { %1424 = vrot.lane.b32.xlu1 %v1408_v53, %s5701_s25  ;;  %1376 = vrot.lane.b32.xlu0 %v1360_v59, %s5702_s30  ;;  %v6648_v7 = vmax.f32 %v1146_v33, %v1196_v48  ;;  %v1364_v11 = vsel %vm297_vm2, %v1361_v49, %v1363_v43  ;;  %v1362_v62 = vsel %vm297_vm2, %v1359_v47, %v1361_v49  ;;  %v5178_v30 = vpop.f32.mrf.mxu1  ;;  %v1271_v24 = vrot.slane %v6682_v31, 1 }
 0x325   :  { %v1410_v16 = vsel %vm386_vm3, %v1407_v23, %v1409_v52  ;;  %v1412_v8 = vsel %vm386_vm3, %v1409_v52, %v1411_v55  ;;  %v6685_v14 = vmax.f32 %v6593_v34, %v5178_v30  ;;  %v1319_v18 = vrot.slane %v6682_v31, 2 }
 0x326   :  { %v1269_v26 = vrot.slane %v6648_v7, 1  ;;  %v1317_v3 = vrot.slane %v6648_v7, 2  ;;  %v1365_v10 = vrot.slane %v6648_v7, 3  ;;  %v1206_v21 = vpop.f32.mrf.mxu1  ;;  %v1413_v25 = vrot.slane %v6648_v7, 4 }
 0x327   :  { %v6676_v54 = vmax.f32 %v6595_v40, %v1206_v21  ;;  %v1274_v40 = vrot.slane %v6685_v14, 1  ;;  %v1322_v27 = vrot.slane %v6685_v14, 2  ;;  %v1367_v50 = vrot.slane %v6682_v31, 3 }
 0x328   :  { %1284 = vrot.lane.b32.xlu0 %v1268_v6, %s5697_s26  ;;  %1282 = vrot.lane.b32.xlu1 %v1266_v1, %s5697_s26  ;;  %v1318_v15 = vsel %vm208_vm1, %v1315_v60, %v1317_v3  ;;  %v1366_v12 = vsel %vm297_vm2, %v1363_v43, %v1365_v10  ;;  %v1414_v33 = vsel %vm386_vm3, %v1411_v55, %v1413_v25  ;;  %v5181_v39 = vpop.f32.mrf.mxu1  ;;  %v1370_v23 = vrot.slane %v6685_v14, 3 }
 0x329   :  { %v1270_v9 = vsel %vm119_vm0, %v1267_v63, %v1269_v26  ;;  %v1272_v2 = vrot.slane %v6676_v54, 1  ;;  %v1320_v34 = vrot.slane %v6676_v54, 2  ;;  %v1368_v58 = vrot.slane %v6676_v54, 3 }
 0x32a   :  { %v1216_v45 = vpop.f32.mrf.mxu1  ;;  %v1416_v61 = vrot.slane %v6676_v54, 4  ;;  %v1418_v44 = vrot.slane %v6685_v14, 4  ;;  %v1415_v63 = vrot.slane %v6682_v31, 4  ;;  %v6719_v4 = vmax.f32 %v6597_v37, %v5181_v39 }
 0x32b   :  { %v1275_v29 = vsel %vm119_vm0, %v1272_v2, %v1274_v40  ;;  %v1273_v38 = vsel %vm119_vm0, %v1271_v24, %v1272_v2  ;;  %v1323_v56 = vsel %vm208_vm1, %v1320_v34, %v1322_v27  ;;  %v1321_v36 = vsel %vm208_vm1, %v1319_v18, %v1320_v34 }
 0x32c   :  { %1330 = vrot.lane.b32.xlu0 %v1314_v41, %s5700_s5  ;;  %1332 = vrot.lane.b32.xlu1 %v1316_v17, %s5700_s5  ;;  %v6709_v47 = vmax.f32 %v6599_v46, %v1216_v45  ;;  %v1369_v53 = vsel %vm297_vm2, %v1367_v50, %v1368_v58  ;;  %v1371_v59 = vsel %vm297_vm2, %v1368_v58, %v1370_v23  ;;  %v1278_v57 = vrot.slane %v6719_v4, 1 }
 0x32d   :  { %v1419_v46 = vsel %vm386_vm3, %v1416_v61, %v1418_v44  ;;  %v1417_v6 = vsel %vm386_vm3, %v1415_v63, %v1416_v61  ;;  %v1326_v37 = vrot.slane %v6719_v4, 2  ;;  %v1374_v41 = vrot.slane %v6719_v4, 3 }
 0x32e   :  { %v1276_v1 = vrot.slane %v6709_v47, 1  ;;  %v1372_v0 = vrot.slane %v6709_v47, 3  ;;  %v1420_v48 = vrot.slane %v6709_v47, 4  ;;  %v1324_v49 = vrot.slane %v6709_v47, 2 }
 0x32f   :  { %v1422_v52 = vrot.slane %v6719_v4, 4 }
 0x330   :  { %1380 = vrot.lane.b32.xlu0 %v1364_v11, %s5702_s30  ;;  %1378 = vrot.lane.b32.xlu1 %v1362_v62, %s5702_s30  ;;  %v1277_v42 = vsel %vm119_vm0, %v1274_v40, %v1276_v1  ;;  %v1373_v60 = vsel %vm297_vm2, %v1370_v23, %v1372_v0  ;;  %v1421_v17 = vsel %vm386_vm3, %v1418_v44, %v1420_v48 }
 0x331   :  { %v1325_v43 = vsel %vm208_vm1, %v1322_v27, %v1324_v49  ;;  %v1327_v32 = vsel %vm208_vm1, %v1324_v49, %v1326_v37  ;;  %v1279_v11 = vsel %vm119_vm0, %v1276_v1, %v1278_v57  ;;  %v1375_v62 = vsel %vm297_vm2, %v1372_v0, %v1374_v41 }
 0x332   :  { %v1423_v13 = vsel %vm386_vm3, %v1420_v48, %v1422_v52  ;;  %vm1529_vm3 = vcmask 326656  }
 0x334   :  { %1426 = vrot.lane.b32.xlu0 %v1410_v16, %s5701_s25  ;;  %1288 = vrot.lane.b32.xlu1 %v1269_v26, %s5697_s26 }
 0x338   :  { %1428 = vrot.lane.b32.xlu0 %v1412_v8, %s5701_s25  ;;  %1336 = vrot.lane.b32.xlu1 %v1317_v3, %s5700_s5 }
 0x33c   :  { %1334 = vrot.lane.b32.xlu0 %v1318_v15, %s5700_s5  ;;  %1384 = vrot.lane.b32.xlu1 %v1365_v10, %s5702_s30 }
 0x340   :  { %1382 = vrot.lane.b32.xlu0 %v1366_v12, %s5702_s30  ;;  %1432 = vrot.lane.b32.xlu1 %v1413_v25, %s5701_s25 }
 0x344   :  { %1430 = vrot.lane.b32.xlu0 %v1414_v33, %s5701_s25  ;;  %1286 = vrot.lane.b32.xlu1 %v1270_v9, %s5697_s26 }
 0x348   :  { %1292 = vrot.lane.b32.xlu0 %v1275_v29, %s5697_s26  ;;  %1290 = vrot.lane.b32.xlu1 %v1273_v38, %s5697_s26 }
 0x34c   :  { %1340 = vrot.lane.b32.xlu0 %v1323_v56, %s5700_s5  ;;  %1338 = vrot.lane.b32.xlu1 %v1321_v36, %s5700_s5 }
 0x350   :  { %1386 = vrot.lane.b32.xlu0 %v1369_v53, %s5702_s30  ;;  %1388 = vrot.lane.b32.xlu1 %v1371_v59, %s5702_s30 }
 0x354   :  { %1436 = vrot.lane.b32.xlu0 %v1419_v46, %s5701_s25  ;;  %1434 = vrot.lane.b32.xlu1 %v1417_v6, %s5701_s25 }
 0x358   :  { %1298 = vrot.lane.b32.xlu1 %v1278_v57, %s5697_s26  ;;  %1294 = vrot.lane.b32.xlu0 %v1277_v42, %s5697_s26 }
 0x35c   :  { %1346 = vrot.lane.b32.xlu1 %v1326_v37, %s5700_s5  ;;  %1390 = vrot.lane.b32.xlu0 %v1373_v60, %s5702_s30 }
 0x360   :  { %1394 = vrot.lane.b32.xlu1 %v1374_v41, %s5702_s30  ;;  %1438 = vrot.lane.b32.xlu0 %v1421_v17, %s5701_s25 }
 0x364   :  { %1342 = vrot.lane.b32.xlu1 %v1325_v43, %s5700_s5  ;;  %1344 = vrot.lane.b32.xlu0 %v1327_v32, %s5700_s5 }
 0x368   :  { %1296 = vrot.lane.b32.xlu1 %v1279_v11, %s5697_s26  ;;  %1392 = vrot.lane.b32.xlu0 %v1375_v62, %s5702_s30 }
 0x36c   :  { %1442 = vrot.lane.b32.xlu1 %v1422_v52, %s5701_s25  ;;  %1440 = vrot.lane.b32.xlu0 %v1423_v13, %s5701_s25 }
 0x392   :  { %v1329_v26 = vpop.permute.xlu1 %1328  ;;  %v1281_v16 = vpop.permute.xlu0 %1280 }
 0x393   :  { %v1454_v10 = vsel %vm710_vm9, %v6603_v20, %v1281_v16 }
 0x394   :  { %v1465_v25 = vsel %vm1464_vm13, %v1454_v10, %v1329_v26 }
 0x396   :  { %v1425_v55 = vpop.permute.xlu1 %1424  ;;  %v1377_v3 = vpop.permute.xlu0 %1376 }
 0x397   :  { %v1476_v12 = vsel %vm1475_vm14, %v1465_v25, %v1377_v3 }
 0x398   :  { %v1487_v40 = vsel %vm1486_vm15, %v1476_v12, %v1425_v55 }
 0x399   :  { %v1507_v39 = vrot.slane %v1487_v40, 2 }
 0x39a   :  { %v1285_v8 = vpop.permute.xlu0 %1284  ;;  %v1283_v30 = vpop.permute.xlu1 %1282 }
 0x39b   :  { %v1455_v2 = vsel %vm710_vm9, %v6601_v22, %v1283_v30  ;;  %v1456_v27 = vsel %vm710_vm9, %v6610_v19, %v1285_v8 }
 0x39e   :  { %v1331_v15 = vpop.permute.xlu0 %1330  ;;  %v1333_v21 = vpop.permute.xlu1 %1332 }
 0x39f   :  { %v1466_v24 = vsel %vm1464_vm13, %v1455_v2, %v1331_v15  ;;  %v1467_v56 = vsel %vm1464_vm13, %v1456_v27, %v1333_v21 }
 0x3a2   :  { %v1381_v33 = vpop.permute.xlu0 %1380  ;;  %v1379_v9 = vpop.permute.xlu1 %1378 }
 0x3a3   :  { %v1477_v20 = vsel %vm1475_vm14, %v1466_v24, %v1379_v9  ;;  %v1478_v22 = vsel %vm1475_vm14, %v1467_v56, %v1381_v33 }
 0x3a6   :  { %v1427_v29 = vpop.permute.xlu0 %1426  ;;  %v1289_v38 = vpop.permute.xlu1 %1288 }
 0x3a7   :  { %v1488_v34 = vsel %vm1486_vm15, %v1477_v20, %v1427_v29  ;;  %v1458_v63 = vsel %vm710_vm9, %v6648_v7, %v1289_v38 }
 0x3a8   :  { %v1508_v18 = vrot.slane %v1488_v34, 2 }
 0x3aa   :  { %v1429_v36 = vpop.permute.xlu0 %1428  ;;  %v1337_v58 = vpop.permute.xlu1 %1336  ;;  %v1509_v45 = vsel %vm208_vm1, %v1507_v39, %v1508_v18 }
 0x3ab   :  { %v1489_v50 = vsel %vm1486_vm15, %v1478_v22, %v1429_v36  ;;  %5192 = vmatprep.mubr.msk.f32.mxu0 %vm1529_vm3, %v1509_v45  ;;  %v1469_v46 = vsel %vm1464_vm13, %v1458_v63, %v1337_v58 }
 0x3ac   :  { %v1510_v23 = vrot.slane %v1489_v50, 2 }
 0x3ae   :  { %v1511_v53 = vsel %vm208_vm1, %v1508_v18, %v1510_v23  ;;  %v1335_v59 = vpop.permute.xlu0 %1334  ;;  %v1385_v61 = vpop.permute.xlu1 %1384 }
 0x3af   :  { %5193 = vmatmul.mubr.msk.f32.vlgmr.msra.gmra.mxu0 %vm1529_vm3, %v1511_v53  ;;  %v1480_v57 = vsel %vm1475_vm14, %v1469_v46, %v1385_v61 }
 0x3b2   :  { %v1383_v19 = vpop.permute.xlu0 %1382  ;;  %v1433_v44 = vpop.permute.xlu1 %1432 }
 0x3b3   :  { %v1491_v0 = vsel %vm1486_vm15, %v1480_v57, %v1433_v44 }
 0x3b4   :  { %v1514_v7 = vrot.slane %v1491_v0, 2 }
 0x3b6   :  { %v1431_v6 = vpop.permute.xlu0 %1430  ;;  %v1287_v1 = vpop.permute.xlu1 %1286 }
 0x3b7   :  { %v1457_v42 = vsel %vm710_vm9, %v6617_v51, %v1287_v1 }
 0x3b8   :  { %v1468_v37 = vsel %vm1464_vm13, %v1457_v42, %v1335_v59 }
 0x3b9   :  { %v1479_v60 = vsel %vm1475_vm14, %v1468_v37, %v1383_v19  ;;  %v1527_v37 = vsub.s32 3, %v6460_v5 }
 0x3ba   :  { %v1293_v48 = vpop.permute.xlu0 %1292  ;;  %v1291_v41 = vpop.permute.xlu1 %1290  ;;  %v1490_v17 = vsel %vm1486_vm15, %v1479_v60, %v1431_v6  ;;  %v1240_v6 = vld [vmem:[%s7659_s6] sm:$0xff] }
 0x3bb   :  { %v1512_v49 = vrot.slane %v1490_v17, 2  ;;  %v1460_v13 = vsel %vm710_vm9, %v6676_v54, %v1293_v48  ;;  %v1459_v26 = vsel %vm710_vm9, %v6682_v31, %v1291_v41  ;;  %v1528_v48 = vrot.slane %v6468_v35, %v1527_v37 }
 0x3bc   :  { %v1661_v41 = vsub.s32 4, %v6460_v5 }
 0x3bd   :  { %v1513_v43 = vsel %vm208_vm1, %v1510_v23, %v1512_v49  ;;  %v1515_v32 = vsel %vm208_vm1, %v1512_v49, %v1514_v7 }
 0x3be   :  { %5195 = vmatprep.mubr.msk.f32.mxu0 %vm1529_vm3, %v1513_v43  ;;  %v1341_v11 = vpop.permute.xlu0 %1340  ;;  %v1339_v51 = vpop.permute.xlu1 %1338  ;;  %v1673_v43 = vsub.s32 5, %v6460_v5 }
 0x3bf   :  { %5196 = vmatmul.mubr.msk.f32.gmra.mxu0 %vm1529_vm3, %v1515_v32  ;;  %v1471_v16 = vsel %vm1464_vm13, %v1460_v13, %v1341_v11  ;;  %v1470_v55 = vsel %vm1464_vm13, %v1459_v26, %v1339_v51  ;;  %v1662_v51 = vrot.slane %v6468_v35, %v1661_v41 }
 0x3c2   :  { %v1387_v62 = vpop.permute.xlu0 %1386  ;;  %v1389_v52 = vpop.permute.xlu1 %1388 }
 0x3c3   :  { %v1481_v3 = vsel %vm1475_vm14, %v1470_v55, %v1387_v62  ;;  %v1482_v8 = vsel %vm1475_vm14, %v1471_v16, %v1389_v52  ;;  %v1674_v55 = vrot.slane %v6468_v35, %v1673_v43 }
 0x3c6   :  { %v1437_v30 = vpop.permute.xlu0 %1436  ;;  %v1435_v10 = vpop.permute.xlu1 %1434 }
 0x3c7   :  { %v1493_v15 = vsel %vm1486_vm15, %v1482_v8, %v1437_v30  ;;  %v1492_v21 = vsel %vm1486_vm15, %v1481_v3, %v1435_v10 }
 0x3c8   :  { %v1517_v25 = vrot.slane %v1493_v15, 2  ;;  %v1516_v12 = vrot.slane %v1492_v21, 2 }
 0x3ca   :  { %v1299_v54 = vpop.permute.xlu1 %1298  ;;  %v1295_v33 = vpop.permute.xlu0 %1294  ;;  %v1518_v31 = vsel %vm208_vm1, %v1516_v12, %v1517_v25 }
 0x3cb   :  { %5198 = vmatprep.mubr.msk.f32.mxu0 %vm1529_vm3, %v1518_v31  ;;  %v1461_v20 = vsel %vm710_vm9, %v6685_v14, %v1295_v33  ;;  %v1463_v58 = vsel %vm710_vm9, %v6719_v4, %v1299_v54 }
 0x3ce   :  { %v1347_v9 = vpop.permute.xlu1 %1346  ;;  %v1391_v2 = vpop.permute.xlu0 %1390 }
 0x3cf   :  { %v1474_v50 = vsel %vm1464_vm13, %v1463_v58, %v1347_v9  ;;  %v1242_v58 = vld [vmem:[%s7659_s6 + $0x10] sm:$0xff] }
 0x3d2   :  { %v1395_v40 = vpop.permute.xlu1 %1394  ;;  %v1439_v24 = vpop.permute.xlu0 %1438 }
 0x3d3   :  { %v1485_v53 = vsel %vm1475_vm14, %v1474_v50, %v1395_v40  ;;  %v1245_v50 = vld [vmem:[%s7659_s6 + $0x28] sm:$0xff] }
 0x3d6   :  { %v1343_v29 = vpop.permute.xlu1 %1342  ;;  %v1345_v38 = vpop.permute.xlu0 %1344 }
 0x3d7   :  { %v1472_v34 = vsel %vm1464_vm13, %v1461_v20, %v1343_v29 }
 0x3d8   :  { %v1483_v39 = vsel %vm1475_vm14, %v1472_v34, %v1391_v2 }
 0x3d9   :  { %v1494_v27 = vsel %vm1486_vm15, %v1483_v39, %v1439_v24 }
 0x3da   :  { %v1519_v18 = vrot.slane %v1494_v27, 2  ;;  %v1297_v56 = vpop.permute.xlu1 %1296  ;;  %v1393_v22 = vpop.permute.xlu0 %1392 }
 0x3db   :  { %v1462_v36 = vsel %vm710_vm9, %v6709_v47, %v1297_v56  ;;  %vm2724_vm9 = vcmask 261254  }
 0x3dc   :  { %v1473_v45 = vsel %vm1464_vm13, %v1462_v36, %v1345_v38  ;;  %v1520_v14 = vsel %vm208_vm1, %v1517_v25, %v1519_v18  ;;  %v1241_v36 = vld [vmem:[%s7659_s6 + $0x8] sm:$0xff] }
 0x3dd   :  { %v1484_v23 = vsel %vm1475_vm14, %v1473_v45, %v1393_v22  ;;  %5199 = vmatmul.mubr.msk.f32.gmra.mxu0 %vm1529_vm3, %v1520_v14  ;;  %v1243_v45 = vld [vmem:[%s7659_s6 + $0x18] sm:$0xff]  ;;  %v1244_v14 = vld [vmem:[%s7659_s6 + $0x20] sm:$0xff]  ;;  %vm3517_vm14 = vcmask 779904  }
 0x3de   :  { %v1443_v59 = vpop.permute.xlu1 %1442  ;;  %v1441_v61 = vpop.permute.xlu0 %1440 }
 0x3df   :  { %v1496_v19 = vsel %vm1486_vm15, %v1485_v53, %v1443_v59  ;;  %v1495_v47 = vsel %vm1486_vm15, %v1484_v23, %v1441_v61  ;;  %v1246_v23 = vld [vmem:[%s7659_s6 + $0x30] sm:$0xff]  ;;  %v1247_v53 = vld [vmem:[%s7659_s6 + $0x38] sm:$0xff]  ;;  %v1248_v59 = vld [vmem:[%s7659_s6 + $0x40] sm:$0xff] }
 0x3e0   :  { %v1523_v44 = vrot.slane %v1496_v19, 2  ;;  %v1521_v4 = vrot.slane %v1495_v47, 2  ;;  %v1249_v61 = vld [vmem:[%s7659_s6 + $0x48] sm:$0xff]  ;;  %v1250_v19 = vld [vmem:[%s7659_s6 + $0x50] sm:$0xff]  ;;  %v1251_v47 = vld [vmem:[%s7659_s6 + $0x58] sm:$0xff] }
 0x3e2   :  { %v1522_v63 = vsel %vm208_vm1, %v1519_v18, %v1521_v4  ;;  %v1524_v46 = vsel %vm208_vm1, %v1521_v4, %v1523_v44  ;;  %v1856_v44 = vld [vmem:[%s7656_s3 + $0x28] sm:$0xff] }
 0x3e3   :  { %5201 = vmatprep.mubr.msk.f32.mxu0 %vm1529_vm3, %v1522_v63  ;;  %5238 = vmatprep.subr.mxu1 %v1856_v44 }
 0x3e4   :  { %5202 = vmatmul.mubr.msk.f32.gmra.mxu0 %vm1529_vm3, %v1524_v46  ;;  %5239 = vmatpush3.msra.mxu1 %v1856_v44  ;;  %vm3644_vm3 = vcmask 517504  }
 0x3e5   :  { %5220 = vmatprep.mubr.msk.f32.mxu0 %vm1683_vm4, %v1240_v6 }
 0x46f   :  { %v5194_v1 = vpop.f32.mrf.mxu0 }
 0x470   :  { %v1618_v15 = vadd.f32 %v5194_v1, %v1528_v48 }
 0x471   :  { %v1612_v57 = vpop.f32.mrf.mxu0 }
 0x472   :  { %v1613_v33 = vadd.f32 %v1612_v57, %v1528_v48  ;;  %v1652_v40 = vmax.f32 %v1618_v15, 0.0 }
 0x474   :  { %v1651_v35 = vmax.f32 %v1613_v33, 0.0  ;;  %v1664_v34 = vmul.f32 %v1662_v51, %v1652_v40 }
 0x476   :  { %v1663_v27 = vmul.f32 %v1662_v51, %v1651_v35  ;;  %v1676_v56 = vadd.f32 %v1674_v55, %v1664_v34 }
 0x478   :  { %v1675_v22 = vadd.f32 %v1674_v55, %v1663_v27 }
 0x47f   :  { %v5197_v42 = vpop.f32.mrf.mxu0 }
 0x480   :  { %v1628_v52 = vadd.f32 %v5197_v42, %v1528_v48 }
 0x481   :  { %v1622_v0 = vpop.f32.mrf.mxu0 }
 0x482   :  { %v1623_v3 = vadd.f32 %v1622_v0, %v1528_v48  ;;  %v1654_v21 = vmax.f32 %v1628_v52, 0.0 }
 0x484   :  { %v1653_v31 = vmax.f32 %v1623_v3, 0.0  ;;  %v1666_v24 = vmul.f32 %v1662_v51, %v1654_v21 }
 0x486   :  { %v1665_v29 = vmul.f32 %v1662_v51, %v1653_v31  ;;  %v1678_v39 = vadd.f32 %v1674_v55, %v1666_v24 }
 0x488   :  { %v1677_v18 = vadd.f32 %v1674_v55, %v1665_v29 }
 0x49d   :  { %v5200_v60 = vpop.f32.mrf.mxu0 }
 0x49e   :  { %v1638_v7 = vadd.f32 %v5200_v60, %v1528_v48  ;;  %v1855_v60 = vld [vmem:[%s7656_s3 + $0x20] sm:$0xff] }
 0x49f   :  { %v1632_v17 = vpop.f32.mrf.mxu0  ;;  %5240 = vmatprep.subr.mxu1 %v1855_v60 }
 0x4a0   :  { %v1633_v32 = vadd.f32 %v1632_v17, %v1528_v48  ;;  %v1656_v13 = vmax.f32 %v1638_v7, 0.0  ;;  %5241 = vmatpush3.msra.mxu1 %v1855_v60 }
 0x4a2   :  { %v1655_v8 = vmax.f32 %v1633_v32, 0.0  ;;  %v1668_v25 = vmul.f32 %v1662_v51, %v1656_v13  ;;  %v1853_v32 = vld [vmem:[%s7656_s3 + $0x10] sm:$0xff] }
 0x4a4   :  { %v5203_v49 = vpop.f32.mrf.mxu0  ;;  %v1667_v9 = vmul.f32 %v1662_v51, %v1655_v8  ;;  %v1680_v20 = vadd.f32 %v1674_v55, %v1668_v25 }
 0x4a5   :  { %v1648_v11 = vadd.f32 %v5203_v49, %v1528_v48 }
 0x4a6   :  { %v1642_v62 = vpop.f32.mrf.mxu0  ;;  %v1679_v38 = vadd.f32 %v1674_v55, %v1667_v9 }
 0x4a7   :  { %v1658_v26 = vmax.f32 %v1648_v11, 0.0  ;;  %v1643_v16 = vadd.f32 %v1642_v62, %v1528_v48  ;;  %v1854_v48 = vld [vmem:[%s7656_s3 + $0x18] sm:$0xff]  ;;  %v1852_v62 = vld [vmem:[%s7656_s3 + $0x8] sm:$0xff] }
 0x4a8   :  { %5242 = vmatprep.subr.mxu1 %v1854_v48 }
 0x4a9   :  { %v1670_v30 = vmul.f32 %v1662_v51, %v1658_v26  ;;  %v1657_v10 = vmax.f32 %v1643_v16, 0.0  ;;  %5243 = vmatpush3.msra.mxu1 %v1854_v48 }
 0x4aa   :  { %5244 = vmatprep.subr.mxu1 %v1853_v32 }
 0x4ab   :  { %v1669_v12 = vmul.f32 %v1662_v51, %v1657_v10  ;;  %v1682_v54 = vadd.f32 %v1674_v55, %v1670_v30  ;;  %5245 = vmatpush3.msra.mxu1 %v1853_v32  ;;  %v1953_v32 = vsub.s32 6, %v6460_v5 }
 0x4ac   :  { %5246 = vmatprep.subr.mxu1 %v1852_v62 }
 0x4ad   :  { %5204 = vmatprep.subr.mxu0 %v1682_v54  ;;  %v1681_v2 = vadd.f32 %v1674_v55, %v1669_v12  ;;  %v1851_v55 = vld [vmem:[%s7656_s3] sm:$0xff]  ;;  %5247 = vmatpush3.msra.mxu1 %v1852_v62 }
 0x4ae   :  { %5205 = vmatpush3.msra.mxu0 %v1682_v54  ;;  %5248 = vmatprep.subr.mxu1 %v1851_v55 }
 0x4af   :  { %5206 = vmatprep.subr.mxu0 %v1681_v2  ;;  %5249 = vmatpush3.msra.mxu1 %v1851_v55 }
 0x4b0   :  { %5207 = vmatpush3.msra.mxu0 %v1681_v2 }
 0x4b1   :  { %5208 = vmatprep.subr.mxu0 %v1680_v20 }
 0x4b2   :  { %5209 = vmatpush3.msra.mxu0 %v1680_v20 }
 0x4b3   :  { %5210 = vmatprep.subr.mxu0 %v1679_v38 }
 0x4b4   :  { %5211 = vmatpush3.msra.mxu0 %v1679_v38 }
 0x4b5   :  { %5212 = vmatprep.subr.mxu0 %v1678_v39 }
 0x4b6   :  { %5213 = vmatpush3.msra.mxu0 %v1678_v39 }
 0x4b7   :  { %5214 = vmatprep.subr.mxu0 %v1677_v18 }
 0x4b8   :  { %5215 = vmatpush3.msra.mxu0 %v1677_v18 }
 0x4b9   :  { %5216 = vmatprep.subr.mxu0 %v1676_v56 }
 0x4ba   :  { %5217 = vmatpush3.msra.mxu0 %v1676_v56 }
 0x4bb   :  { %5218 = vmatprep.subr.mxu0 %v1675_v22 }
 0x4bc   :  { %5219 = vmatpush3.msra.mxu0 %v1675_v22 }
 0x4bd   :  { %5221 = vmatmul.mubr.msk.f32.vlgmr.msra.gmra.mxu0 %vm1683_vm4, %v1241_v36 }
 0x4be   :  { %5223 = vmatprep.mubr.msk.f32.mxu0 %vm1683_vm4, %v1242_v58 }
 0x4c1   :  { %5224 = vmatmul.mubr.msk.f32.gmra.mxu0 %vm1683_vm4, %v1243_v45 }
 0x4c2   :  { %5226 = vmatprep.mubr.msk.f32.mxu0 %vm1683_vm4, %v1244_v14 }
 0x4c5   :  { %5227 = vmatmul.mubr.msk.f32.gmra.mxu0 %vm1683_vm4, %v1245_v50 }
 0x4c6   :  { %5229 = vmatprep.mubr.msk.f32.mxu0 %vm1683_vm4, %v1246_v23 }
 0x4c9   :  { %5230 = vmatmul.mubr.msk.f32.gmra.mxu0 %vm1683_vm4, %v1247_v53 }
 0x4ca   :  { %5232 = vmatprep.mubr.msk.f32.mxu0 %vm1683_vm4, %v1248_v59 }
 0x4cd   :  { %5233 = vmatmul.mubr.msk.f32.gmra.mxu0 %vm1683_vm4, %v1249_v61 }
 0x4ce   :  { %5235 = vmatprep.mubr.msk.f32.mxu0 %vm1683_vm4, %v1250_v19 }
 0x4d1   :  { %5236 = vmatmul.mubr.msk.f32.gmra.mxu0 %vm1683_vm4, %v1251_v47  ;;  %vm3512_vm4 = vcmask 386304  }
 0x57d   :  { %v5222_v4 = vpop.f32.mrf.mxu0 }
 0x57f   :  { %v1786_v63 = vpop.f32.mrf.mxu0 }
 0x581   :  { %v5225_v46 = vpop.f32.mrf.mxu0 }
 0x583   :  { %v1796_v6 = vpop.f32.mrf.mxu0 }
 0x585   :  { %v5228_v1 = vpop.f32.mrf.mxu0 }
 0x587   :  { %v1806_v57 = vpop.f32.mrf.mxu0 }
 0x589   :  { %v5231_v42 = vpop.f32.mrf.mxu0 }
 0x58a   :  { %v6876_v0 = vmax.f32 %v5222_v4, %v5231_v42 }
 0x58b   :  { %v1816_v37 = vpop.f32.mrf.mxu0 }
 0x58c   :  { %v1845_v41 = vmax.f32 %v1786_v63, %v1816_v37  ;;  %v1896_v7 = vrot.slane %v6876_v0, 2  ;;  %v1868_v11 = vrot.slane %v6876_v0, 1 }
 0x58d   :  { %v5234_v17 = vpop.f32.mrf.mxu0 }
 0x58e   :  { %v1867_v49 = vrot.slane %v1845_v41, 1  ;;  %v1895_v43 = vrot.slane %v1845_v41, 2  ;;  %v1848_v54 = vmax.f32 %v5225_v46, %v5234_v17 }
 0x58f   :  { %v1826_v51 = vpop.f32.mrf.mxu0 }
 0x590   :  { %v1847_v52 = vmax.f32 %v1796_v6, %v1826_v51  ;;  %v1897_v13 = vsel %vm208_vm1, %v1895_v43, %v1896_v7  ;;  %v1869_v26 = vsel %vm119_vm0, %v1867_v49, %v1868_v11  ;;  %v1900_v2 = vrot.slane %v1848_v54, 2  ;;  %v1857_v43 = vld [vmem:[%s7660_s7] sm:$0xff] }
 0x591   :  { %1905 = vrot.lane.b32.xlu1 %v1897_v13, %s5701_s25  ;;  %v5237_v16 = vpop.f32.mrf.mxu0  ;;  %1877 = vrot.lane.b32.xlu0 %v1869_v26, %s5700_s5  ;;  %v1872_v40 = vrot.slane %v1848_v54, 1  ;;  %v5671_v51 = vld [vmem:[%s7657_s4] sm:$0xff]  ;;  %v2055_v26 = vsub.s32 7, %v6460_v5 }
 0x592   :  { %v1870_v3 = vrot.slane %v1847_v52, 1  ;;  %v1898_v8 = vrot.slane %v1847_v52, 2  ;;  %v1850_v15 = vmax.f32 %v5228_v1, %v5237_v16  ;;  %5264 = vmatprep.mubr.msk.f32.mxu0 %vm1486_vm15, %v1857_v43  ;;  %v1954_v62 = vrot.slane %v5671_v51, %v1953_v32 }
 0x593   :  { %v1836_v30 = vpop.f32.mrf.mxu0 }
 0x594   :  { %v1849_v10 = vmax.f32 %v1806_v57, %v1836_v30  ;;  %v1871_v25 = vsel %vm119_vm0, %v1868_v11, %v1870_v3  ;;  %v1899_v12 = vsel %vm208_vm1, %v1896_v7, %v1898_v8  ;;  %v1875_v33 = vrot.slane %v1850_v15, 1 }
 0x595   :  { %1909 = vrot.lane.b32.xlu1 %v1898_v8, %s5701_s25  ;;  %1881 = vrot.lane.b32.xlu0 %v1870_v3, %s5700_s5  ;;  %v1903_v35 = vrot.slane %v1850_v15, 2 }
 0x596   :  { %v1873_v21 = vrot.slane %v1849_v10, 1  ;;  %v1901_v31 = vrot.slane %v1849_v10, 2 }
 0x598   :  { %v1876_v9 = vsel %vm119_vm0, %v1873_v21, %v1875_v33  ;;  %v1902_v24 = vsel %vm208_vm1, %v1900_v2, %v1901_v31  ;;  %v1874_v20 = vsel %vm119_vm0, %v1872_v40, %v1873_v21  ;;  %v1904_v29 = vsel %vm208_vm1, %v1901_v31, %v1903_v35 }
 0x599   :  { %1879 = vrot.lane.b32.xlu1 %v1871_v25, %s5700_s5  ;;  %1907 = vrot.lane.b32.xlu0 %v1899_v12, %s5701_s25  ;;  %vm1955_vm0 = vcmask 392192   ;;  %vm5704_vm1 = vmmov 0  }
 0x59d   :  { %1885 = vrot.lane.b32.xlu1 %v1876_v9, %s5700_s5  ;;  %1887 = vrot.lane.b32.xlu0 %v1875_v33, %s5700_s5  ;;  %v4783_v33 = vld [vmem:[%s7657_s4 + $0x8] ss:$0 sm:$0xff]  ;;  %s5708_s4 = smov [#allocation4]  }
 0x5a1   :  { %1911 = vrot.lane.b32.xlu1 %v1902_v24, %s5701_s25  ;;  %1883 = vrot.lane.b32.xlu0 %v1874_v20, %s5700_s5 }
 0x5a5   :  { %1915 = vrot.lane.b32.xlu1 %v1903_v35, %s5701_s25  ;;  %1913 = vrot.lane.b32.xlu0 %v1904_v29, %s5701_s25  ;;  %v1858_v29 = vld [vmem:[%s7660_s7 + $0x8] sm:$0xff] }
 0x603   :  { %v1906_v38 = vpop.permute.xlu1 %1905  ;;  %v1878_v34 = vpop.permute.xlu0 %1877 }
 0x604   :  { %v1923_v27 = vsel %vm1464_vm13, %v1845_v41, %v1878_v34  ;;  %v1860_v34 = vld [vmem:[%s7660_s7 + $0x18] sm:$0xff] }
 0x605   :  { %v1929_v22 = vsel %vm1486_vm15, %v1923_v27, %v1906_v38  ;;  %v1859_v38 = vld [vmem:[%s7660_s7 + $0x10] sm:$0xff] }
 0x606   :  { %v1941_v23 = vrot.slane %v1929_v22, 3  ;;  %v2171_v27 = vld [vmem:[%s7661_s8 + $0x10] sm:$0xff]  ;;  %v6975_v22 = vld [vmem:[%s7662_s9 + $0x18] sm:$0xff] }
 0x607   :  { %v1910_v39 = vpop.permute.xlu1 %1909  ;;  %v1882_v18 = vpop.permute.xlu0 %1881 }
 0x608   :  { %v1925_v56 = vsel %vm1464_vm13, %v1847_v52, %v1882_v18  ;;  %v2170_v18 = vld [vmem:[%s7661_s8 + $0x8] sm:$0xff] }
 0x609   :  { %v1931_v36 = vsel %vm1486_vm15, %v1925_v56, %v1910_v39  ;;  %v2172_v39 = vld [vmem:[%s7661_s8 + $0x18] sm:$0xff]  ;;  %v2169_v56 = vld [vmem:[%s7661_s8] sm:$0xff] }
 0x60a   :  { %v1944_v53 = vrot.slane %v1931_v36, 3  ;;  %5270 = vmatprep.subr.mxu1 %v2172_v39  ;;  %v5703_v36 = vmov 0.0  }
 0x60b   :  { %v1880_v58 = vpop.permute.xlu1 %1879  ;;  %v1908_v45 = vpop.permute.xlu0 %1907 }
 0x60c   :  { %v1924_v14 = vsel %vm1464_vm13, %v6876_v0, %v1880_v58  ;;  %v6981_v58 = vld [vmem:[%s7662_s9 + $0x10] sm:$0xff] }
 0x60d   :  { %v1930_v50 = vsel %vm1486_vm15, %v1924_v14, %v1908_v45  ;;  %v6990_v45 = vld [vmem:[%s7662_s9 + $0x8] sm:$0xff]  ;;  %v6998_v14 = vld [vmem:[%s7662_s9] sm:$0xff] }
 0x60e   :  { %v1942_v59 = vrot.slane %v1930_v50, 3 }
 0x60f   :  { %v1886_v61 = vpop.permute.xlu1 %1885  ;;  %v1888_v19 = vpop.permute.xlu0 %1887 }
 0x610   :  { %v1943_v47 = vsel %vm297_vm2, %v1941_v23, %v1942_v59  ;;  %v1945_v44 = vsel %vm297_vm2, %v1942_v59, %v1944_v53  ;;  %v1928_v6 = vsel %vm1464_vm13, %v1850_v15, %v1888_v19  ;;  %v1927_v42 = vsel %vm1464_vm13, %v1849_v10, %v1886_v61 }
 0x611   :  { %5250 = vmatprep.mubr.msk.f32.mxu1 %vm1955_vm0, %v1943_v47  ;;  %v2056_v10 = vrot.slane %v5671_v51, %v2055_v26 }
 0x612   :  { %5251 = vmatmul.mubr.msk.f32.vlgmr.msra.gmra.mxu1 %vm1955_vm0, %v1945_v44 }
 0x613   :  { %v1912_v4 = vpop.permute.xlu1 %1911  ;;  %v1884_v63 = vpop.permute.xlu0 %1883  ;;  %5271 = vmatpush3.msra.mxu1 %v2172_v39 }
 0x614   :  { %v1926_v46 = vsel %vm1464_vm13, %v1848_v54, %v1884_v63  ;;  %5272 = vmatprep.subr.mxu1 %v2171_v27 }
 0x615   :  { %v1932_v1 = vsel %vm1486_vm15, %v1926_v46, %v1912_v4  ;;  %5273 = vmatpush3.msra.mxu1 %v2171_v27  ;;  %v2168_v4 = vld [vmem:[%s7663_s10 + $0x2] sm:$0x1]  ;;  %v4788_v46 = vld [vmem:[%s7663_s10] ss:$0 sm:$0xff] }
 0x616   :  { %v1946_v41 = vrot.slane %v1932_v1, 3  ;;  %5274 = vmatprep.subr.mxu1 %v2170_v18  ;;  %v2263_v63 = vsub.f32 1.0, %v2168_v4 }
 0x617   :  { %v1916_v57 = vpop.permute.xlu1 %1915  ;;  %v1914_v37 = vpop.permute.xlu0 %1913  ;;  %5275 = vmatpush3.msra.mxu1 %v2170_v18 }
 0x618   :  { %v1934_v0 = vsel %vm1486_vm15, %v1928_v6, %v1916_v57  ;;  %v1933_v48 = vsel %vm1486_vm15, %v1927_v42, %v1914_v37  ;;  %5276 = vmatprep.subr.mxu1 %v2169_v56  ;;  %v7034_v6 = vrot.slane %v2263_v63, %v6463_v28  ;;  %v7037_v42 = vrot.slane %v2168_v4, %v6463_v28 }
 0x619   :  { %v1949_v60 = vrot.slane %v1934_v0, 3  ;;  %v1947_v17 = vrot.slane %v1933_v48, 3  ;;  %5277 = vmatpush3.msra.mxu1 %v2169_v56 }
 0x61a   :  { %5292 = vmatprep.subr.mxu1 %v5703_v36 }
 0x61b   :  { %v1948_v7 = vsel %vm297_vm2, %v1946_v41, %v1947_v17  ;;  %v1950_v49 = vsel %vm297_vm2, %v1947_v17, %v1949_v60  ;;  %vm2380_vm2 = vcmask 123904  }
 0x61c   :  { %5253 = vmatprep.mubr.msk.f32.mxu1 %vm1955_vm0, %v1948_v7 }
 0x61d   :  { %5254 = vmatmul.mubr.msk.f32.gmra.mxu1 %vm1955_vm0, %v1950_v49  ;;  %vm3639_vm0 = vcmask 648704  }
 0x6d2   :  { %v5252_v11 = vpop.f32.mrf.mxu1 }
 0x6d3   :  { %v2036_v13 = vadd.f32 %v5252_v11, %v1954_v62 }
 0x6d4   :  { %v2030_v52 = vpop.f32.mrf.mxu1 }
 0x6d5   :  { %v2031_v55 = vadd.f32 %v2030_v52, %v1954_v62  ;;  %v2050_v30 = vmax.f32 %v2036_v13, 0.0 }
 0x6d7   :  { %v2049_v25 = vmax.f32 %v2031_v55, 0.0  ;;  %v2058_v31 = vmul.f32 %v2056_v10, %v2050_v30 }
 0x6d9   :  { %v2057_v40 = vmul.f32 %v2056_v10, %v2049_v25  ;;  %v2066_v20 = vadd.f32 %v4783_v33, %v2058_v31 }
 0x6db   :  { %v2065_v35 = vadd.f32 %v4783_v33, %v2057_v40 }
 0x6dd   :  { %v5255_v16 = vpop.f32.mrf.mxu1 }
 0x6de   :  { %v2046_v3 = vadd.f32 %v5255_v16, %v1954_v62 }
 0x6df   :  { %v2040_v8 = vpop.f32.mrf.mxu1 }
 0x6e0   :  { %v2052_v15 = vmax.f32 %v2046_v3, 0.0  ;;  %v2041_v21 = vadd.f32 %v2040_v8, %v1954_v62 }
 0x6e2   :  { %v2060_v12 = vmul.f32 %v2056_v10, %v2052_v15  ;;  %v2051_v54 = vmax.f32 %v2041_v21, 0.0 }
 0x6e4   :  { %v2059_v9 = vmul.f32 %v2056_v10, %v2051_v54  ;;  %v2068_v2 = vadd.f32 %v4783_v33, %v2060_v12 }
 0x6e6   :  { %5256 = vmatprep.subr.mxu0 %v2068_v2  ;;  %v2067_v24 = vadd.f32 %v4783_v33, %v2059_v9 }
 0x6e7   :  { %5257 = vmatpush3.msra.mxu0 %v2068_v2 }
 0x6e8   :  { %5258 = vmatprep.subr.mxu0 %v2067_v24 }
 0x6e9   :  { %5259 = vmatpush3.msra.mxu0 %v2067_v24 }
 0x6ea   :  { %5260 = vmatprep.subr.mxu0 %v2066_v20 }
 0x6eb   :  { %5261 = vmatpush3.msra.mxu0 %v2066_v20 }
 0x6ec   :  { %5262 = vmatprep.subr.mxu0 %v2065_v35 }
 0x6ed   :  { %5263 = vmatpush3.msra.mxu0 %v2065_v35 }
 0x6ee   :  { %5265 = vmatmul.mubr.msk.f32.vlgmr.msra.gmra.mxu0 %vm1486_vm15, %v1858_v29  ;;  %5281 = vmatprep.subr.mxu0 %v5703_v36 }
 0x6ef   :  { %5267 = vmatprep.mubr.msk.f32.mxu0 %vm1486_vm15, %v1859_v38  ;;  %5282 = vmatpush3.msra.mxu0 %v6975_v22 }
 0x6f0   :  { %5283 = vmatprep.subr.mxu0 %v5703_v36 }
 0x6f1   :  { %5284 = vmatpush3.msra.mxu0 %v6981_v58 }
 0x6f2   :  { %5268 = vmatmul.mubr.msk.f32.gmra.mxu0 %vm1486_vm15, %v1860_v34  ;;  %5285 = vmatprep.subr.mxu0 %v5703_v36 }
 0x6f3   :  { %5289 = vmatprep.mubr.msk.f32.mxu0 %vm5704_vm1, %v5703_v36  ;;  %5286 = vmatpush3.msra.mxu0 %v6990_v45 }
 0x6f4   :  { %5287 = vmatprep.subr.mxu0 %v5703_v36 }
 0x6f5   :  { %5288 = vmatpush3.msra.mxu0 %v6998_v14 }
 0x6f6   :  { %5290 = vmatmul.mubr.f32.vlgmr.msra.gmra.mxu0 %v5703_v36  ;;  %5303 = vmatprep.subr.mxu0 %v5703_v36 }
 0x6f7   :  { %5304 = vmatpush3.msra.mxu0 %v6975_v22  ;;  %5311 = vmatprep.mubr.msk.f32.mxu0 %vm5704_vm1, %v5703_v36 }
 0x6f8   :  { %5305 = vmatprep.subr.mxu0 %v5703_v36 }
 0x6f9   :  { %5306 = vmatpush3.msra.mxu0 %v6981_v58 }
 0x6fa   :  { %5307 = vmatprep.subr.mxu0 %v5703_v36 }
 0x6fb   :  { %5308 = vmatpush3.msra.mxu0 %v6990_v45 }
 0x6fc   :  { %5309 = vmatprep.subr.mxu0 %v5703_v36 }
 0x6fd   :  { %5310 = vmatpush3.msra.mxu0 %v6998_v14 }
 0x6fe   :  { %5325 = vmatprep.subr.mxu0 %v5703_v36 }
 0x7ae   :  { %v5266_v50 = vpop.f32.mrf.mxu0 }
 0x7b0   :  { %v2147_v23 = vpop.f32.mrf.mxu0 }
 0x7b2   :  { %v5269_v53 = vpop.f32.mrf.mxu0 }
 0x7b3   :  { %v2167_v19 = vmax.f32 %v5266_v50, %v5269_v53 }
 0x7b4   :  { %v2157_v59 = vpop.f32.mrf.mxu0 }
 0x7b5   :  { %v2166_v61 = vmax.f32 %v2147_v23, %v2157_v59 }
 0x7b6   :  { %v2347_v47 = vpop.f32.mrf.mxu0 }
 0x7b7   :  { %5278 = vmatprep.mubr.msk.f32.mxu1 %vm1486_vm15, %v2166_v61 }
 0x7b8   :  { %5279 = vmatmul.mubr.msk.f32.vlgmr.msra.gmra.mxu1 %vm1486_vm15, %v2167_v19  ;;  %v5291_v44 = vpop.f32.mrf.mxu0 }
 0x7b9   :  { %5293 = vmatpush3.msra.mxu1 %v6975_v22  ;;  %5300 = vmatprep.mubr.msk.f32.mxu1 %vm5704_vm1, %v5703_v36 }
 0x7ba   :  { %5294 = vmatprep.subr.mxu1 %v5703_v36 }
 0x7bb   :  { %5295 = vmatpush3.msra.mxu1 %v6981_v58 }
 0x7bc   :  { %5296 = vmatprep.subr.mxu1 %v5703_v36 }
 0x7bd   :  { %5297 = vmatpush3.msra.mxu1 %v6990_v45 }
 0x7be   :  { %5298 = vmatprep.subr.mxu1 %v5703_v36 }
 0x7bf   :  { %5299 = vmatpush3.msra.mxu1 %v6998_v14 }
 0x7c0   :  { %5314 = vmatprep.subr.mxu1 %v5703_v36 }
 0x878   :  { %v5280_v1 = vpop.f32.mrf.mxu1 }
 0x879   :  { %v2260_v57 = vadd.f32 %v5280_v1, %v4788_v46 }
 0x87a   :  { %v2254_v0 = vpop.f32.mrf.mxu1 }
 0x87b   :  { %v2273_v37 = vmul.f32 %v7034_v6, %v2260_v57  ;;  %v2255_v60 = vadd.f32 %v4788_v46, %v2254_v0  ;;  %v2726_v49 = vmul.f32 %v7037_v42, %v2260_v57 }
 0x87d   :  { %v2384_v48 = vrot.slane %v2273_v37, 2  ;;  %v2268_v41 = vmul.f32 %v7037_v42, %v2255_v60  ;;  %v2727_v17 = vmul.f32 %v7034_v6, %v2255_v60  ;;  %v2275_v7 = vrot.slane %v2273_v37, 6 }
 0x87f   :  { %v2841_v43 = vrot.slane %v2727_v17, 2  ;;  %v7043_v32 = vadd.f32 %v2275_v7, %v2268_v41  ;;  %v7045_v11 = vadd.f32 %v2384_v48, %v2268_v41  ;;  %v2729_v51 = vrot.slane %v2727_v17, 6 }
 0x881   :  { %v2351_v28 = vadd.f32 %v2347_v47, %v7043_v32  ;;  %v7048_v62 = vadd.f32 %v2729_v51, %v2726_v49  ;;  %v7050_v52 = vadd.f32 %v2841_v43, %v2726_v49 }
 0x883   :  { %5543 = vtanh.f32 %v2351_v28  ;;  %v4791_v26 = vmul.f32 -1.442695, %v2351_v28 }
 0x885   :  { %5545 = vpow2.f32 %v4791_v26 }
 0x890   :  { %v5544_v13 = vpop.eup %5543 }
 0x891   :  { %2361 = vrot.lane.b32.xlu0 %v5544_v13, %s5705_s29 }
 0x892   :  { %v5546_v16 = vpop.eup %5545 }
 0x893   :  { %v2355_v55 = vadd.f32 1.0, %v5546_v16 }
 0x895   :  { %5547 = vrcp.f32 %v2355_v55 }
 0x8a2   :  { %v5548_v3 = vpop.eup %5547 }
 0x8a3   :  { %v2359_v10 = vmul.f32 0.0, %v5548_v3 }
 0x903   :  { %v2362_v8 = vpop.permute.xlu0 %2361 }
 0x904   :  { %v2364_v30 = vmul.f32 %v5548_v3, %v2362_v8 }
 0x906   :  { %2366 = vrot.lane.b32.xlu1 %v2364_v30, %s5701_s25 }
 0x978   :  { %v2367_v15 = vpop.permute.xlu1 %2366 }
 0x979   :  { %v2369_v21 = vadd.f32 %v2367_v15, %v2359_v10 }
 0x97b   :  { %5549 = vtanh.f32 %v2369_v21  ;;  %v2471_v27 = vrot.slane %v2369_v21, 6 }
 0x988   :  { %v5550_v25 = vpop.eup %5549 }
 0x989   :  { %2372 = vrot.lane.b32.xlu0 %v5550_v25, %s5705_s29 }
 0x9fb   :  { %v2373_v12 = vpop.permute.xlu0 %2372 }
 0x9fc   :  { %v2375_v54 = vmul.f32 %v5548_v3, %v2373_v12 }
 0x9fe   :  { %2377 = vrot.lane.b32.xlu1 %v2375_v54, %s5701_s25 }
 0xa70   :  { %v2378_v33 = vpop.permute.xlu1 %2377 }
 0xa71   :  { %2381 = vst.msk [vmem:[#allocation2] sm:$0x3] %vm2380_vm2, %v2378_v33  ;;  %5301 = vmatmul.mubr.msk.f32.vlgmr.msra.gmra.mxu1 %vm1486_vm15, %v2378_v33 }
 0xa72   :  { %2383 = vst.msk [vmem:[#allocation2 + $0xe] sm:$0x3] %vm2382_vm5, %v2378_v33  ;;  %5315 = vmatpush3.msra.mxu1 %v6975_v22  ;;  %5322 = vmatprep.mubr.msk.f32.mxu1 %vm5704_vm1, %v5703_v36 }
 0xa73   :  { %5316 = vmatprep.subr.mxu1 %v5703_v36 }
 0xa74   :  { %5317 = vmatpush3.msra.mxu1 %v6981_v58 }
 0xa75   :  { %5318 = vmatprep.subr.mxu1 %v5703_v36 }
 0xa76   :  { %5319 = vmatpush3.msra.mxu1 %v6990_v45 }
 0xa77   :  { %5320 = vmatprep.subr.mxu1 %v5703_v36 }
 0xa78   :  { %5321 = vmatpush3.msra.mxu1 %v6998_v14 }
 0xa79   :  { %5336 = vmatprep.subr.mxu1 %v5703_v36 }
 0xb31   :  { %v2455_v31 = vpop.f32.mrf.mxu1 }
 0xb32   :  { %v2460_v9 = vrot.slane %v2455_v31, 6 }
 0xb33   :  { %v5302_v2 = vpop.f32.mrf.mxu1 }
 0xb34   :  { %v2462_v40 = vadd.f32 %v2460_v9, %v7045_v11 }
 0xb36   :  { %5551 = vtanh.f32 %v2462_v40  ;;  %v4793_v20 = vmul.f32 -1.442695, %v2462_v40 }
 0xb38   :  { %5553 = vpow2.f32 %v4793_v20 }
 0xb43   :  { %v5552_v24 = vpop.eup %5551 }
 0xb44   :  { %2475 = vrot.lane.b32.xlu0 %v5552_v24, %s5705_s29 }
 0xb45   :  { %v5554_v35 = vpop.eup %5553 }
 0xb46   :  { %v2466_v29 = vadd.f32 1.0, %v5554_v35 }
 0xb48   :  { %5555 = vrcp.f32 %v2466_v29 }
 0xb55   :  { %v5556_v38 = vpop.eup %5555 }
 0xb56   :  { %v2473_v18 = vmul.f32 %v5556_v38, %v2471_v27 }
 0xbb6   :  { %v2476_v34 = vpop.permute.xlu0 %2475 }
 0xbb7   :  { %v2478_v39 = vmul.f32 %v5556_v38, %v2476_v34 }
 0xbb9   :  { %2480 = vrot.lane.b32.xlu1 %v2478_v39, %s5701_s25 }
 0xc2b   :  { %v2481_v56 = vpop.permute.xlu1 %2480 }
 0xc2c   :  { %v2483_v50 = vadd.f32 %v2481_v56, %v2473_v18 }
 0xc2e   :  { %5557 = vtanh.f32 %v2483_v50  ;;  %v2585_v41 = vrot.slane %v2483_v50, 6 }
 0xc3b   :  { %v5558_v23 = vpop.eup %5557 }
 0xc3c   :  { %2486 = vrot.lane.b32.xlu0 %v5558_v23, %s5705_s29 }
 0xcae   :  { %v2487_v53 = vpop.permute.xlu0 %2486 }
 0xcaf   :  { %v7073_v59 = vmul.f32 %v5556_v38, %v2487_v53 }
 0xcb1   :  { %v2498_v61 = vrot.slane %v7073_v59, 2 }
 0xcb3   :  { %2499 = vrot.lane.b32.xlu1 %v2498_v61, %s5701_s25 }
 0xd25   :  { %v2500_v19 = vpop.permute.xlu1 %2499 }
 0xd26   :  { %5312 = vmatmul.mubr.msk.f32.vlgmr.msra.gmra.mxu0 %vm1486_vm15, %v2500_v19 }
 0xd27   :  { %5326 = vmatpush3.msra.mxu0 %v6975_v22  ;;  %5333 = vmatprep.mubr.msk.f32.mxu0 %vm5704_vm1, %v5703_v36 }
 0xd28   :  { %5327 = vmatprep.subr.mxu0 %v5703_v36 }
 0xd29   :  { %5328 = vmatpush3.msra.mxu0 %v6981_v58 }
 0xd2a   :  { %5329 = vmatprep.subr.mxu0 %v5703_v36 }
 0xd2b   :  { %5330 = vmatpush3.msra.mxu0 %v6990_v45 }
 0xd2c   :  { %5331 = vmatprep.subr.mxu0 %v5703_v36 }
 0xd2d   :  { %5332 = vmatpush3.msra.mxu0 %v6998_v14 }
 0xd2e   :  { %5347 = vmatprep.subr.mxu0 %v5703_v36 }
 0xde6   :  { %v2569_v47 = vpop.f32.mrf.mxu0 }
 0xde7   :  { %v2574_v44 = vrot.slane %v2569_v47, 4 }
 0xde8   :  { %v5313_v4 = vpop.f32.mrf.mxu0 }
 0xde9   :  { %v2576_v63 = vadd.f32 %v2574_v44, %v7043_v32 }
 0xdeb   :  { %5559 = vtanh.f32 %v2576_v63  ;;  %v4795_v1 = vmul.f32 -1.442695, %v2576_v63 }
 0xded   :  { %5561 = vpow2.f32 %v4795_v1 }
 0xdf8   :  { %v5560_v46 = vpop.eup %5559 }
 0xdf9   :  { %2589 = vrot.lane.b32.xlu0 %v5560_v46, %s5705_s29 }
 0xdfa   :  { %v5562_v57 = vpop.eup %5561 }
 0xdfb   :  { %v2580_v0 = vadd.f32 1.0, %v5562_v57 }
 0xdfd   :  { %5563 = vrcp.f32 %v2580_v0 }
 0xe0a   :  { %v5564_v37 = vpop.eup %5563 }
 0xe0b   :  { %v2587_v17 = vmul.f32 %v5564_v37, %v2585_v41 }
 0xe6b   :  { %v2590_v60 = vpop.permute.xlu0 %2589 }
 0xe6c   :  { %v2592_v48 = vmul.f32 %v5564_v37, %v2590_v60 }
 0xe6e   :  { %2594 = vrot.lane.b32.xlu1 %v2592_v48, %s5701_s25 }
 0xee0   :  { %v2595_v7 = vpop.permute.xlu1 %2594 }
 0xee1   :  { %v2597_v49 = vadd.f32 %v2595_v7, %v2587_v17 }
 0xee3   :  { %5565 = vtanh.f32 %v2597_v49  ;;  %v2699_v54 = vrot.slane %v2597_v49, 6 }
 0xef0   :  { %v5566_v43 = vpop.eup %5565 }
 0xef1   :  { %2600 = vrot.lane.b32.xlu0 %v5566_v43, %s5705_s29 }
 0xf63   :  { %v2601_v32 = vpop.permute.xlu0 %2600 }
 0xf64   :  { %v7092_v51 = vmul.f32 %v5564_v37, %v2601_v32 }
 0xf66   :  { %v2612_v28 = vrot.slane %v7092_v51, 4 }
 0xf68   :  { %2613 = vrot.lane.b32.xlu1 %v2612_v28, %s5701_s25 }
 0xfda   :  { %v2614_v13 = vpop.permute.xlu1 %2613 }
 0xfdb   :  { %5323 = vmatmul.mubr.msk.f32.vlgmr.msra.gmra.mxu1 %vm1486_vm15, %v2614_v13 }
 0xfdc   :  { %5337 = vmatpush3.msra.mxu1 %v6975_v22  ;;  %5344 = vmatprep.mubr.msk.f32.mxu1 %vm5704_vm1, %v5703_v36 }
 0xfdd   :  { %5338 = vmatprep.subr.mxu1 %v5703_v36 }
 0xfde   :  { %5339 = vmatpush3.msra.mxu1 %v6981_v58 }
 0xfdf   :  { %5340 = vmatprep.subr.mxu1 %v5703_v36 }
 0xfe0   :  { %5341 = vmatpush3.msra.mxu1 %v6990_v45 }
 0xfe1   :  { %5342 = vmatprep.subr.mxu1 %v5703_v36 }
 0xfe2   :  { %5343 = vmatpush3.msra.mxu1 %v6998_v14 }
 0xfe3   :  { %5358 = vmatprep.subr.mxu1 %v5703_v36 }
0x109b   :  { %v2683_v26 = vpop.f32.mrf.mxu1 }
0x109c   :  { %v2688_v16 = vrot.slane %v2683_v26, 2 }
0x109d   :  { %v5324_v55 = vpop.f32.mrf.mxu1 }
0x109e   :  { %v2690_v3 = vadd.f32 %v2688_v16, %v7045_v11 }
0x10a0   :  { %5567 = vtanh.f32 %v2690_v3  ;;  %v4797_v30 = vmul.f32 -1.442695, %v2690_v3 }
0x10a2   :  { %5569 = vpow2.f32 %v4797_v30 }
0x10ad   :  { %v5568_v8 = vpop.eup %5567 }
0x10ae   :  { %2703 = vrot.lane.b32.xlu0 %v5568_v8, %s5705_s29 }
0x10af   :  { %v5570_v10 = vpop.eup %5569 }
0x10b0   :  { %v2694_v15 = vadd.f32 1.0, %v5570_v10 }
0x10b2   :  { %5571 = vrcp.f32 %v2694_v15 }
0x10bf   :  { %v5572_v21 = vpop.eup %5571 }
0x10c0   :  { %v2701_v33 = vmul.f32 %v5572_v21, %v2699_v54 }
0x1120   :  { %v2704_v25 = vpop.permute.xlu0 %2703 }
0x1121   :  { %v2706_v12 = vmul.f32 %v5572_v21, %v2704_v25 }
0x1123   :  { %2708 = vrot.lane.b32.xlu1 %v2706_v12, %s5701_s25 }
0x1195   :  { %v2709_v31 = vpop.permute.xlu1 %2708 }
0x1196   :  { %v2711_v9 = vadd.f32 %v2709_v31, %v2701_v33 }
0x1198   :  { %5573 = vtanh.f32 %v2711_v9  ;;  %v2816_v53 = vrot.slane %v2711_v9, 6 }
0x11a5   :  { %v5574_v11 = vpop.eup %5573 }
0x11a6   :  { %2714 = vrot.lane.b32.xlu0 %v5574_v11, %s5705_s29 }
0x1218   :  { %v2715_v2 = vpop.permute.xlu0 %2714 }
0x1219   :  { %v7111_v40 = vmul.f32 %v5572_v21, %v2715_v2 }
0x121b   :  { %v2732_v24 = vrot.slane %v7111_v40, 6 }
0x121d   :  { %2733 = vrot.lane.b32.xlu1 %v2732_v24, %s5701_s25 }
0x128f   :  { %v2734_v20 = vpop.permute.xlu1 %2733 }
0x1290   :  { %5334 = vmatmul.mubr.msk.f32.vlgmr.msra.gmra.mxu0 %vm1486_vm15, %v2734_v20 }
0x1291   :  { %5348 = vmatpush3.msra.mxu0 %v6975_v22  ;;  %5355 = vmatprep.mubr.msk.f32.mxu0 %vm5704_vm1, %v5703_v36 }
0x1292   :  { %5349 = vmatprep.subr.mxu0 %v5703_v36 }
0x1293   :  { %5350 = vmatpush3.msra.mxu0 %v6981_v58 }
0x1294   :  { %5351 = vmatprep.subr.mxu0 %v5703_v36 }
0x1295   :  { %5352 = vmatpush3.msra.mxu0 %v6990_v45 }
0x1296   :  { %5353 = vmatprep.subr.mxu0 %v5703_v36 }
0x1297   :  { %5354 = vmatpush3.msra.mxu0 %v6998_v14 }
0x1350   :  { %v2803_v35 = vpop.f32.mrf.mxu0 }
0x1351   :  { %v2807_v29 = vadd.f32 %v2803_v35, %v7048_v62 }
0x1352   :  { %v5335_v38 = vpop.f32.mrf.mxu0 }
0x1353   :  { %5575 = vtanh.f32 %v2807_v29  ;;  %v4799_v39 = vmul.f32 -1.442695, %v2807_v29 }
0x1355   :  { %5577 = vpow2.f32 %v4799_v39 }
0x1360   :  { %v5576_v34 = vpop.eup %5575 }
0x1361   :  { %2820 = vrot.lane.b32.xlu0 %v5576_v34, %s5705_s29 }
0x1362   :  { %v5578_v27 = vpop.eup %5577 }
0x1363   :  { %v2811_v18 = vadd.f32 1.0, %v5578_v27 }
0x1365   :  { %5579 = vrcp.f32 %v2811_v18 }
0x1372   :  { %v5580_v56 = vpop.eup %5579 }
0x1373   :  { %v2818_v61 = vmul.f32 %v5580_v56, %v2816_v53 }
0x13d3   :  { %v2821_v50 = vpop.permute.xlu0 %2820 }
0x13d4   :  { %v2823_v23 = vmul.f32 %v5580_v56, %v2821_v50 }
0x13d6   :  { %2825 = vrot.lane.b32.xlu1 %v2823_v23, %s5701_s25 }
0x1448   :  { %v2826_v19 = vpop.permute.xlu1 %2825 }
0x1449   :  { %v2828_v47 = vadd.f32 %v2826_v19, %v2818_v61 }
0x144b   :  { %5581 = vtanh.f32 %v2828_v47 }
0x1458   :  { %v5582_v44 = vpop.eup %5581 }
0x1459   :  { %2831 = vrot.lane.b32.xlu0 %v5582_v44, %s5705_s29 }
0x14cb   :  { %v2832_v4 = vpop.permute.xlu0 %2831 }
0x14cc   :  { %v2834_v63 = vmul.f32 %v5580_v56, %v2832_v4 }
0x14ce   :  { %2836 = vrot.lane.b32.xlu1 %v2834_v63, %s5701_s25 }
0x1540   :  { %v7130_v46 = vpop.permute.xlu1 %2836 }
0x1541   :  { %5345 = vmatmul.mubr.msk.f32.vlgmr.msra.gmra.mxu1 %vm1486_vm15, %v7130_v46 }
0x1542   :  { %5359 = vmatpush3.msra.mxu1 %v6975_v22  ;;  %5366 = vmatprep.mubr.msk.f32.mxu1 %vm5704_vm1, %v5703_v36 }
0x1543   :  { %5360 = vmatprep.subr.mxu1 %v5703_v36 }
0x1544   :  { %5361 = vmatpush3.msra.mxu1 %v6981_v58 }
0x1545   :  { %5362 = vmatprep.subr.mxu1 %v5703_v36 }
0x1546   :  { %5363 = vmatpush3.msra.mxu1 %v6990_v45 }
0x1547   :  { %5364 = vmatprep.subr.mxu1 %v5703_v36 }
0x1548   :  { %5365 = vmatpush3.msra.mxu1 %v6998_v14  ;;  %v2928_v14 = vrot.slane %v2828_v47, 6 }
0x1549   :  { %5380 = vmatprep.subr.mxu1 %v5703_v36 }
0x1601   :  { %v2912_v1 = vpop.f32.mrf.mxu1 }
0x1602   :  { %v2917_v57 = vrot.slane %v2912_v1, 6 }
0x1603   :  { %v5346_v22 = vpop.f32.mrf.mxu1 }
0x1604   :  { %v2919_v0 = vadd.f32 %v2917_v57, %v7050_v52  ;;  %v3181_v57 = vld [vmem:[%s7661_s8 + $0x30] sm:$0xff]  ;;  %v3180_v22 = vld [vmem:[%s7661_s8 + $0x28] sm:$0xff] }
0x1606   :  { %5583 = vtanh.f32 %v2919_v0  ;;  %v4801_v58 = vmul.f32 -1.442695, %v2919_v0  ;;  %v7199_v0 = vld [vmem:[%s7662_s9 + $0x38] sm:$0xff] }
0x1608   :  { %5585 = vpow2.f32 %v4801_v58 }
0x1613   :  { %v5584_v37 = vpop.eup %5583 }
0x1614   :  { %2932 = vrot.lane.b32.xlu0 %v5584_v37, %s5705_s29  ;;  %v7204_v37 = vld [vmem:[%s7662_s9 + $0x30] sm:$0xff] }
0x1615   :  { %v5586_v60 = vpop.eup %5585 }
0x1616   :  { %v2923_v48 = vadd.f32 1.0, %v5586_v60 }
0x1618   :  { %5587 = vrcp.f32 %v2923_v48  ;;  %v7212_v48 = vld [vmem:[%s7662_s9 + $0x28] sm:$0xff] }
0x1625   :  { %v5588_v45 = vpop.eup %5587 }
0x1626   :  { %v2930_v7 = vmul.f32 %v5588_v45, %v2928_v14 }
0x1686   :  { %v2933_v41 = vpop.permute.xlu0 %2932 }
0x1687   :  { %v2935_v17 = vmul.f32 %v5588_v45, %v2933_v41 }
0x1689   :  { %2937 = vrot.lane.b32.xlu1 %v2935_v17, %s5701_s25 }
0x16fb   :  { %v2938_v49 = vpop.permute.xlu1 %2937 }
0x16fc   :  { %v2940_v43 = vadd.f32 %v2938_v49, %v2930_v7 }
0x16fe   :  { %5589 = vtanh.f32 %v2940_v43  ;;  %v3040_v31 = vrot.slane %v2940_v43, 6 }
0x170b   :  { %v5590_v32 = vpop.eup %5589 }
0x170c   :  { %2943 = vrot.lane.b32.xlu0 %v5590_v32, %s5705_s29 }
0x177e   :  { %v2944_v28 = vpop.permute.xlu0 %2943 }
0x177f   :  { %v7148_v13 = vmul.f32 %v5588_v45, %v2944_v28  ;;  %v7220_v45 = vld [vmem:[%s7662_s9 + $0x20] sm:$0xff]  ;;  %s4730_s9 = sshll.u32 %s5708_s4, 4  ;;  %s4731_s9 = int_to_ptr.vmem [resolvable:$true] %s4730_s9 }
0x1780   :  { %v4806_v28 = vld [vmem:[%s7663_s10 + $0x1] ss:$0 sm:$0xff]  ;;  %s5707_s10 = smov 96   ;;  %s5672_s20 = scalar_lea.vmem %s4731_s9, 32 }
0x1781   :  { %v2953_v26 = vrot.slane %v7148_v13, 2  ;;  %p5673_p0 = scmp.ne.s32.totalorder %s4731_s9, %s5672_s20  ;;  %p5677_p1 = scmp.lt.s32.totalorder %s4731_s9, %s4731_s9 }
0x1782   :  { %p5678_p2 = scmp.lt.s32.totalorder %s5672_s20, %s5672_s20 }
0x1783   :  { %2954 = vrot.lane.b32.xlu1 %v2953_v26, %s5701_s25 }
0x1784   :  { %p5679_p3 = por %p5678_p2, %p5677_p1 }
0x1786   :  { %p5680_p4 = pnand %p5679_p3, %p5673_p0 }
0x17f5   :  { %v2955_v16 = vpop.permute.xlu1 %2954 }
0x17f6   :  { %5356 = vmatmul.mubr.msk.f32.vlgmr.msra.gmra.mxu0 %vm1486_vm15, %v2955_v16 }
0x18b6   :  { %v3024_v55 = vpop.f32.mrf.mxu0 }
0x18b7   :  { %v3029_v3 = vrot.slane %v3024_v55, 4 }
0x18b8   :  { %v5357_v8 = vpop.f32.mrf.mxu0 }
0x18b9   :  { %v3031_v30 = vadd.f32 %v3029_v3, %v7048_v62 }
0x18bb   :  { %5591 = vtanh.f32 %v3031_v30  ;;  %v4803_v15 = vmul.f32 -1.442695, %v3031_v30 }
0x18bd   :  { %5593 = vpow2.f32 %v4803_v15 }
0x18c8   :  { %v5592_v10 = vpop.eup %5591 }
0x18c9   :  { %3044 = vrot.lane.b32.xlu0 %v5592_v10, %s5705_s29 }
0x18ca   :  { %v5594_v21 = vpop.eup %5593 }
0x18cb   :  { %v3035_v25 = vadd.f32 1.0, %v5594_v21 }
0x18cd   :  { %5595 = vrcp.f32 %v3035_v25 }
0x18da   :  { %v5596_v12 = vpop.eup %5595 }
0x18db   :  { %v3042_v9 = vmul.f32 %v5596_v12, %v3040_v31 }
0x193b   :  { %v3045_v54 = vpop.permute.xlu0 %3044 }
0x193c   :  { %v3047_v33 = vmul.f32 %v5596_v12, %v3045_v54 }
0x193e   :  { %3049 = vrot.lane.b32.xlu1 %v3047_v33, %s5701_s25 }
0x19b0   :  { %v3050_v11 = vpop.permute.xlu1 %3049 }
0x19b1   :  { %v3052_v2 = vadd.f32 %v3050_v11, %v3042_v9 }
0x19b3   :  { %5597 = vtanh.f32 %v3052_v2 }
0x19c0   :  { %v5598_v62 = vpop.eup %5597 }
0x19c1   :  { %3055 = vrot.lane.b32.xlu0 %v5598_v62, %s5705_s29 }
0x1a33   :  { %v3056_v24 = vpop.permute.xlu0 %3055 }
0x1a34   :  { %v3058_v20 = vmul.f32 %v5596_v12, %v3056_v24 }
0x1a36   :  { %v3065_v35 = vrot.slane %v3058_v20, 4 }
0x1a38   :  { %3066 = vrot.lane.b32.xlu1 %v3065_v35, %s5701_s25 }
0x1aaa   :  { %v3067_v29 = vpop.permute.xlu1 %3066 }
0x1aab   :  { %5367 = vmatmul.mubr.msk.f32.vlgmr.msra.gmra.mxu1 %vm1486_vm15, %v3067_v29 }
0x1aac   :  { %5388 = vmatprep.mubr.msk.f32.mxu1 %vm5704_vm1, %v5703_v36  ;;  %5381 = vmatpush3.msra.mxu1 %v7199_v0 }
0x1aad   :  { %5382 = vmatprep.subr.mxu1 %v5703_v36 }
0x1aae   :  { %5383 = vmatpush3.msra.mxu1 %v7204_v37 }
0x1aaf   :  { %5384 = vmatprep.subr.mxu1 %v5703_v36 }
0x1ab0   :  { %5385 = vmatpush3.msra.mxu1 %v7212_v48 }
0x1ab1   :  { %5386 = vmatprep.subr.mxu1 %v5703_v36 }
0x1ab2   :  { %5387 = vmatpush3.msra.mxu1 %v7220_v45 }
0x1ab3   :  { %5389 = vmatmul.mubr.f32.vlgmr.msra.gmra.mxu1 %v5703_v36  ;;  %5402 = vmatprep.subr.mxu1 %v5703_v36 }
0x1ab4   :  { %5403 = vmatpush3.msra.mxu1 %v7199_v0  ;;  %5410 = vmatprep.mubr.msk.f32.mxu1 %vm5704_vm1, %v5703_v36 }
0x1ab5   :  { %5404 = vmatprep.subr.mxu1 %v5703_v36 }
0x1ab6   :  { %5405 = vmatpush3.msra.mxu1 %v7204_v37 }
0x1ab7   :  { %5406 = vmatprep.subr.mxu1 %v5703_v36 }
0x1ab8   :  { %5407 = vmatpush3.msra.mxu1 %v7212_v48 }
0x1ab9   :  { %5408 = vmatprep.subr.mxu1 %v5703_v36 }
0x1aba   :  { %5409 = vmatpush3.msra.mxu1 %v7220_v45 }
0x1abb   :  { %5424 = vmatprep.subr.mxu1 %v5703_v36 }
0x1b6b   :  { %v3136_v38 = vpop.f32.mrf.mxu1 }
0x1b6c   :  { %v3141_v34 = vrot.slane %v3136_v38, 2 }
0x1b6d   :  { %v5368_v39 = vpop.f32.mrf.mxu1 }
0x1b6e   :  { %v3143_v27 = vadd.f32 %v3141_v34, %v7050_v52  ;;  %v3152_v52 = vrot.slane %v3052_v2, 6 }
0x1b70   :  { %5599 = vtanh.f32 %v3143_v27  ;;  %v4805_v56 = vmul.f32 -1.442695, %v3143_v27 }
0x1b72   :  { %5601 = vpow2.f32 %v4805_v56 }
0x1b73   :  { %v3345_v43 = vpop.f32.mrf.mxu1 }
0x1b75   :  { %v5390_v32 = vpop.f32.mrf.mxu1 }
0x1b7d   :  { %v5600_v18 = vpop.eup %5599 }
0x1b7e   :  { %3156 = vrot.lane.b32.xlu0 %v5600_v18, %s5705_s29 }
0x1b7f   :  { %v5602_v50 = vpop.eup %5601 }
0x1b80   :  { %v3147_v23 = vadd.f32 1.0, %v5602_v50 }
0x1b82   :  { %5603 = vrcp.f32 %v3147_v23 }
0x1b8f   :  { %v5604_v53 = vpop.eup %5603 }
0x1b90   :  { %v3154_v47 = vmul.f32 %v5604_v53, %v3152_v52 }
0x1bf0   :  { %v3157_v61 = vpop.permute.xlu0 %3156 }
0x1bf1   :  { %v3159_v19 = vmul.f32 %v5604_v53, %v3157_v61 }
0x1bf3   :  { %3161 = vrot.lane.b32.xlu1 %v3159_v19, %s5701_s25 }
0x1bf7   :  { %2491 = vrot.lane.b32.xlu1 %v7073_v59, %s5701_s25 }
0x1bfb   :  { %2719 = vrot.lane.b32.xlu1 %v7111_v40, %s5701_s25 }
0x1bff   :  { %3060 = vrot.lane.b32.xlu1 %v3058_v20, %s5701_s25 }
0x1c65   :  { %v3162_v44 = vpop.permute.xlu1 %3161 }
0x1c66   :  { %v3164_v4 = vadd.f32 %v3162_v44, %v3154_v47 }
0x1c68   :  { %5605 = vtanh.f32 %v3164_v4 }
0x1c69   :  { %v2492_v63 = vpop.permute.xlu1 %2491 }
0x1c6a   :  { %2495 = vst.msk [vmem:[#allocation2] sm:$0xc] %vm2494_vm6, %v2492_v63 }
0x1c6b   :  { %2497 = vst.msk [vmem:[#allocation2 + $0xa] sm:$0xc] %vm2496_vm7, %v2492_v63 }
0x1c6d   :  { %v2720_v59 = vpop.permute.xlu1 %2719 }
0x1c6e   :  { %2723 = vst.msk [vmem:[#allocation2] sm:$0xc0] %vm2722_vm8, %v2720_v59 }
0x1c6f   :  { %2725 = vst.msk [vmem:[#allocation2 + $0x2] sm:$0xc0] %vm2724_vm9, %v2720_v59 }
0x1c70   :  { %2839 = vst.msk [vmem:[#allocation2 + $0x8] sm:$0x3] %vm2380_vm2, %v7130_v46 }
0x1c71   :  { %2840 = vst.msk [vmem:[#allocation2 + $0x6] sm:$0x3] %vm2382_vm5, %v7130_v46  ;;  %v3061_v40 = vpop.permute.xlu1 %3060  ;;  %v3182_v46 = vld [vmem:[%s7661_s8 + $0x38] sm:$0xff] }
0x1c72   :  { %3063 = vst.msk [vmem:[#allocation2 + $0x8] sm:$0x30] %vm2608_vm10, %v3061_v40  ;;  %5369 = vmatprep.subr.mxu0 %v3182_v46 }
0x1c73   :  { %3064 = vst.msk [vmem:[#allocation2 - $0x2] sm:$0x30] %vm2610_vm11, %v3061_v40  ;;  %5370 = vmatpush3.msra.mxu0 %v3182_v46 }
0x1c74   :  { %5371 = vmatprep.subr.mxu0 %v3181_v57 }
0x1c75   :  { %v5606_v1 = vpop.eup %5605  ;;  %5372 = vmatpush3.msra.mxu0 %v3181_v57 }
0x1c76   :  { %3167 = vrot.lane.b32.xlu0 %v5606_v1, %s5705_s29  ;;  %5373 = vmatprep.subr.mxu0 %v3180_v22 }
0x1c77   :  { %5374 = vmatpush3.msra.mxu0 %v3180_v22 }
0x1c7a   :  { %2605 = vrot.lane.b32.xlu0 %v7092_v51, %s5701_s25  ;;  %v3179_v51 = vld [vmem:[%s7661_s8 + $0x20] sm:$0xff] }
0x1c7b   :  { %5375 = vmatprep.subr.mxu0 %v3179_v51 }
0x1c7c   :  { %5376 = vmatpush3.msra.mxu0 %v3179_v51 }
0x1c7d   :  { %5391 = vmatprep.subr.mxu0 %v5703_v36 }
0x1c7e   :  { %2948 = vrot.lane.b32.xlu0 %v7148_v13, %s5701_s25 }
0x1ce8   :  { %v3168_v58 = vpop.permute.xlu0 %3167 }
0x1ce9   :  { %v3170_v60 = vmul.f32 %v5604_v53, %v3168_v58 }
0x1ceb   :  { %3172 = vrot.lane.b32.xlu0 %v3170_v60, %s5701_s25 }
0x1cec   :  { %v2606_v41 = vpop.permute.xlu0 %2605 }
0x1ced   :  { %2609 = vst.msk [vmem:[#allocation2] sm:$0x30] %vm2608_vm10, %v2606_v41 }
0x1cee   :  { %2611 = vst.msk [vmem:[#allocation2 + $0x6] sm:$0x30] %vm2610_vm11, %v2606_v41 }
0x1cf0   :  { %v2949_v17 = vpop.permute.xlu0 %2948 }
0x1cf1   :  { %2951 = vst.msk [vmem:[#allocation2 + $0x8] sm:$0xc] %vm2494_vm6, %v2949_v17  ;;  %vm3765_vm6 = vcmask 911104  }
0x1cf2   :  { %2952 = vst.msk [vmem:[#allocation2 + $0x2] sm:$0xc] %vm2496_vm7, %v2949_v17 }
0x1d5d   :  { %v3173_v14 = vpop.permute.xlu0 %3172 }
0x1d5e   :  { %3175 = vst.msk [vmem:[#allocation2 + $0x8] sm:$0xc0] %vm2722_vm8, %v3173_v14 }
0x1d5f   :  { %3176 = vst.msk [vmem:[#allocation2 - $0x6] sm:$0xc0] %vm2724_vm9, %v3173_v14 }
0x1d65   :  { %v3178_v49 = vld [vmem:[#allocation2 + $0x8] sm:$0xff] }
0x1d66   :  { %v3177_v7 = vld [vmem:[#allocation2] sm:$0xff] }
0x1d67   :  { %5377 = vmatprep.mubr.msk.f32.mxu0 %vm1486_vm15, %v3177_v7 }
0x1d68   :  { %5378 = vmatmul.mubr.msk.f32.vlgmr.msra.gmra.mxu0 %vm1486_vm15, %v3178_v49 }
0x1d69   :  { %5392 = vmatpush3.msra.mxu0 %v7199_v0  ;;  %5399 = vmatprep.mubr.msk.f32.mxu0 %vm5704_vm1, %v5703_v36 }
0x1d6a   :  { %5393 = vmatprep.subr.mxu0 %v5703_v36 }
0x1d6b   :  { %5394 = vmatpush3.msra.mxu0 %v7204_v37 }
0x1d6c   :  { %5395 = vmatprep.subr.mxu0 %v5703_v36 }
0x1d6d   :  { %5396 = vmatpush3.msra.mxu0 %v7212_v48 }
0x1d6e   :  { %5397 = vmatprep.subr.mxu0 %v5703_v36 }
0x1d6f   :  { %5398 = vmatpush3.msra.mxu0 %v7220_v45 }
0x1d70   :  { %5413 = vmatprep.subr.mxu0 %v5703_v36 }
0x1e28   :  { %v5379_v13 = vpop.f32.mrf.mxu0 }
0x1e29   :  { %v3270_v26 = vadd.f32 %v5379_v13, %v4806_v28 }
0x1e2a   :  { %v3264_v16 = vpop.f32.mrf.mxu0 }
0x1e2b   :  { %v3274_v55 = vmul.f32 %v3270_v26, %v7034_v6  ;;  %v3265_v3 = vadd.f32 %v4806_v28, %v3264_v16  ;;  %v3771_v21 = vmul.f32 %v3270_v26, %v7037_v42 }
0x1e2d   :  { %v3389_v8 = vrot.slane %v3274_v55, 2  ;;  %v3273_v30 = vmul.f32 %v3265_v3, %v7037_v42  ;;  %v3772_v10 = vmul.f32 %v3265_v3, %v7034_v6  ;;  %v3276_v15 = vrot.slane %v3274_v55, 6 }
0x1e2f   :  { %v3893_v25 = vrot.slane %v3772_v10, 2  ;;  %v7262_v12 = vadd.f32 %v3276_v15, %v3273_v30  ;;  %v7264_v54 = vadd.f32 %v3389_v8, %v3273_v30  ;;  %v3774_v33 = vrot.slane %v3772_v10, 6 }
0x1e31   :  { %v3349_v31 = vadd.f32 %v3345_v43, %v7262_v12  ;;  %v7267_v9 = vadd.f32 %v3774_v33, %v3771_v21  ;;  %v7269_v11 = vadd.f32 %v3893_v25, %v3771_v21 }
0x1e33   :  { %5607 = vtanh.f32 %v3349_v31  ;;  %v4809_v6 = vmul.f32 -1.442695, %v3349_v31 }
0x1e35   :  { %5609 = vpow2.f32 %v4809_v6 }
0x1e40   :  { %v5608_v2 = vpop.eup %5607 }
0x1e41   :  { %3359 = vrot.lane.b32.xlu1 %v5608_v2, %s5705_s29 }
0x1e42   :  { %v5610_v62 = vpop.eup %5609 }
0x1e43   :  { %v3353_v42 = vadd.f32 1.0, %v5610_v62 }
0x1e45   :  { %5611 = vrcp.f32 %v3353_v42 }
0x1e52   :  { %v5612_v24 = vpop.eup %5611 }
0x1e53   :  { %v3357_v29 = vmul.f32 0.0, %v5612_v24 }
0x1eb3   :  { %v3360_v20 = vpop.permute.xlu1 %3359 }
0x1eb4   :  { %v3362_v35 = vmul.f32 %v5612_v24, %v3360_v20 }
0x1eb6   :  { %3364 = vrot.lane.b32.xlu0 %v3362_v35, %s5701_s25 }
0x1f28   :  { %v3365_v38 = vpop.permute.xlu0 %3364 }
0x1f29   :  { %v3367_v34 = vadd.f32 %v3365_v38, %v3357_v29 }
0x1f2b   :  { %5613 = vtanh.f32 %v3367_v34  ;;  %v3478_v40 = vrot.slane %v3367_v34, 6 }
0x1f38   :  { %v5614_v39 = vpop.eup %5613 }
0x1f39   :  { %3370 = vrot.lane.b32.xlu1 %v5614_v39, %s5705_s29 }
0x1fab   :  { %v3371_v27 = vpop.permute.xlu1 %3370 }
0x1fac   :  { %v7274_v18 = vmul.f32 %v5612_v24, %v3371_v27 }
0x1fae   :  { %3392 = vrot.lane.b32.xlu0 %v7274_v18, %s5701_s25  ;;  %3388 = vst.msk [vmem:[#allocation3 + $0x2] sm:$0x3] %vm3387_vm12, %v7274_v18 }
0x2020   :  { %v3393_v56 = vpop.permute.xlu0 %3392 }
0x2021   :  { %5400 = vmatmul.mubr.msk.f32.vlgmr.msra.gmra.mxu0 %vm1486_vm15, %v3393_v56 }
0x2022   :  { %5414 = vmatpush3.msra.mxu0 %v7199_v0  ;;  %5421 = vmatprep.mubr.msk.f32.mxu0 %vm5704_vm1, %v5703_v36 }
0x2023   :  { %5415 = vmatprep.subr.mxu0 %v5703_v36 }
0x2024   :  { %5416 = vmatpush3.msra.mxu0 %v7204_v37 }
0x2025   :  { %5417 = vmatprep.subr.mxu0 %v5703_v36 }
0x2026   :  { %5418 = vmatpush3.msra.mxu0 %v7212_v48 }
0x2027   :  { %5419 = vmatprep.subr.mxu0 %v5703_v36 }
0x2028   :  { %5420 = vmatpush3.msra.mxu0 %v7220_v45 }
0x2029   :  { %5435 = vmatprep.subr.mxu0 %v5703_v36 }
0x20e1   :  { %v3462_v50 = vpop.f32.mrf.mxu0 }
0x20e2   :  { %v3467_v23 = vrot.slane %v3462_v50, 6 }
0x20e3   :  { %v5401_v53 = vpop.f32.mrf.mxu0 }
0x20e4   :  { %v3469_v61 = vadd.f32 %v3467_v23, %v7264_v54 }
0x20e6   :  { %5615 = vtanh.f32 %v3469_v61  ;;  %v4811_v52 = vmul.f32 -1.442695, %v3469_v61 }
0x20e8   :  { %5617 = vpow2.f32 %v4811_v52 }
0x20f3   :  { %v5616_v19 = vpop.eup %5615 }
0x20f4   :  { %3482 = vrot.lane.b32.xlu1 %v5616_v19, %s5705_s29 }
0x20f5   :  { %v5618_v47 = vpop.eup %5617 }
0x20f6   :  { %v3473_v44 = vadd.f32 1.0, %v5618_v47 }
0x20f8   :  { %5619 = vrcp.f32 %v3473_v44 }
0x2105   :  { %v5620_v4 = vpop.eup %5619 }
0x2106   :  { %v3480_v1 = vmul.f32 %v5620_v4, %v3478_v40 }
0x2166   :  { %v3483_v63 = vpop.permute.xlu1 %3482 }
0x2167   :  { %v3485_v59 = vmul.f32 %v5620_v4, %v3483_v63 }
0x2169   :  { %3487 = vrot.lane.b32.xlu0 %v3485_v59, %s5701_s25 }
0x21db   :  { %v3488_v46 = vpop.permute.xlu0 %3487 }
0x21dc   :  { %v3490_v57 = vadd.f32 %v3488_v46, %v3480_v1 }
0x21de   :  { %5621 = vtanh.f32 %v3490_v57  ;;  %v3605_v3 = vrot.slane %v3490_v57, 6 }
0x21eb   :  { %v5622_v22 = vpop.eup %5621 }
0x21ec   :  { %3493 = vrot.lane.b32.xlu1 %v5622_v22, %s5705_s29 }
0x225e   :  { %v3494_v51 = vpop.permute.xlu1 %3493 }
0x225f   :  { %v7295_v58 = vmul.f32 %v5620_v4, %v3494_v51 }
0x2261   :  { %v3498_v60 = vrot.slane %v7295_v58, 2 }
0x2263   :  { %3519 = vrot.lane.b32.xlu0 %v3498_v60, %s5701_s25 }
0x22d5   :  { %v3520_v41 = vpop.permute.xlu0 %3519 }
0x22d6   :  { %5411 = vmatmul.mubr.msk.f32.vlgmr.msra.gmra.mxu1 %vm1486_vm15, %v3520_v41 }
0x22d7   :  { %5425 = vmatpush3.msra.mxu1 %v7199_v0  ;;  %5432 = vmatprep.mubr.msk.f32.mxu1 %vm5704_vm1, %v5703_v36 }
0x22d8   :  { %5426 = vmatprep.subr.mxu1 %v5703_v36 }
0x22d9   :  { %5427 = vmatpush3.msra.mxu1 %v7204_v37 }
0x22da   :  { %5428 = vmatprep.subr.mxu1 %v5703_v36 }
0x22db   :  { %5429 = vmatpush3.msra.mxu1 %v7212_v48 }
0x22dc   :  { %5430 = vmatprep.subr.mxu1 %v5703_v36 }
0x22dd   :  { %5431 = vmatpush3.msra.mxu1 %v7220_v45 }
0x22de   :  { %5446 = vmatprep.subr.mxu1 %v5703_v36 }
0x2396   :  { %v3589_v17 = vpop.f32.mrf.mxu1 }
0x2397   :  { %v3594_v14 = vrot.slane %v3589_v17, 4 }
0x2398   :  { %v5412_v7 = vpop.f32.mrf.mxu1 }
0x2399   :  { %v3596_v49 = vadd.f32 %v3594_v14, %v7262_v12  ;;  %v3500_v12 = vadd.f32 %v3498_v60, %v7274_v18 }
0x239b   :  { %5623 = vtanh.f32 %v3596_v49  ;;  %v4813_v32 = vmul.f32 -1.442695, %v3596_v49 }
0x239d   :  { %5625 = vpow2.f32 %v4813_v32 }
0x23a8   :  { %v5624_v43 = vpop.eup %5623 }
0x23a9   :  { %3609 = vrot.lane.b32.xlu1 %v5624_v43, %s5705_s29 }
0x23aa   :  { %v5626_v28 = vpop.eup %5625 }
0x23ab   :  { %v3600_v13 = vadd.f32 1.0, %v5626_v28 }
0x23ad   :  { %5627 = vrcp.f32 %v3600_v13 }
0x23ba   :  { %v5628_v26 = vpop.eup %5627 }
0x23bb   :  { %v3607_v8 = vmul.f32 %v5628_v26, %v3605_v3 }
0x241b   :  { %v3610_v16 = vpop.permute.xlu1 %3609 }
0x241c   :  { %v3612_v55 = vmul.f32 %v5628_v26, %v3610_v16 }
0x241e   :  { %3614 = vrot.lane.b32.xlu0 %v3612_v55, %s5701_s25 }
0x2490   :  { %v3615_v30 = vpop.permute.xlu0 %3614 }
0x2491   :  { %v3617_v10 = vadd.f32 %v3615_v30, %v3607_v8 }
0x2493   :  { %5629 = vtanh.f32 %v3617_v10  ;;  %v3732_v56 = vrot.slane %v3617_v10, 6 }
0x24a0   :  { %v5630_v15 = vpop.eup %5629 }
0x24a1   :  { %3620 = vrot.lane.b32.xlu1 %v5630_v15, %s5705_s29 }
0x2513   :  { %v3621_v21 = vpop.permute.xlu1 %3620 }
0x2514   :  { %v7314_v25 = vmul.f32 %v5628_v26, %v3621_v21 }
0x2516   :  { %v3625_v33 = vrot.slane %v7314_v25, 4 }
0x2518   :  { %v3627_v31 = vadd.f32 %v3625_v33, %v3500_v12  ;;  %3646 = vrot.lane.b32.xlu0 %v3625_v33, %s5701_s25 }
0x258a   :  { %v3647_v2 = vpop.permute.xlu0 %3646 }
0x258b   :  { %5422 = vmatmul.mubr.msk.f32.vlgmr.msra.gmra.mxu0 %vm1486_vm15, %v3647_v2 }
0x258c   :  { %5436 = vmatpush3.msra.mxu0 %v7199_v0  ;;  %5443 = vmatprep.mubr.msk.f32.mxu0 %vm5704_vm1, %v5703_v36 }
0x258d   :  { %5437 = vmatprep.subr.mxu0 %v5703_v36 }
0x258e   :  { %5438 = vmatpush3.msra.mxu0 %v7204_v37 }
0x258f   :  { %5439 = vmatprep.subr.mxu0 %v5703_v36 }
0x2590   :  { %5440 = vmatpush3.msra.mxu0 %v7212_v48 }
0x2591   :  { %5441 = vmatprep.subr.mxu0 %v5703_v36 }
0x2592   :  { %5442 = vmatpush3.msra.mxu0 %v7220_v45 }
0x2593   :  { %5457 = vmatprep.subr.mxu0 %v5703_v36 }
0x264b   :  { %v3716_v6 = vpop.f32.mrf.mxu0 }
0x264c   :  { %v3721_v62 = vrot.slane %v3716_v6, 2 }
0x264d   :  { %v5423_v42 = vpop.f32.mrf.mxu0 }
0x264e   :  { %v3723_v24 = vadd.f32 %v3721_v62, %v7264_v54 }
0x2650   :  { %5631 = vtanh.f32 %v3723_v24  ;;  %v4815_v35 = vmul.f32 -1.442695, %v3723_v24 }
0x2652   :  { %5633 = vpow2.f32 %v4815_v35 }
0x265d   :  { %v5632_v20 = vpop.eup %5631 }
0x265e   :  { %3736 = vrot.lane.b32.xlu1 %v5632_v20, %s5705_s29 }
0x265f   :  { %v5634_v29 = vpop.eup %5633 }
0x2660   :  { %v3727_v38 = vadd.f32 1.0, %v5634_v29 }
0x2662   :  { %5635 = vrcp.f32 %v3727_v38 }
0x266f   :  { %v5636_v34 = vpop.eup %5635 }
0x2670   :  { %v3734_v50 = vmul.f32 %v5636_v34, %v3732_v56 }
0x26d0   :  { %v3737_v39 = vpop.permute.xlu1 %3736 }
0x26d1   :  { %v3739_v27 = vmul.f32 %v5636_v34, %v3737_v39 }
0x26d3   :  { %3741 = vrot.lane.b32.xlu0 %v3739_v27, %s5701_s25 }
0x2745   :  { %v3742_v23 = vpop.permute.xlu0 %3741 }
0x2746   :  { %v3744_v53 = vadd.f32 %v3742_v23, %v3734_v50 }
0x2748   :  { %5637 = vtanh.f32 %v3744_v53  ;;  %v3860_v41 = vrot.slane %v3744_v53, 6 }
0x2755   :  { %v5638_v54 = vpop.eup %5637 }
0x2756   :  { %3747 = vrot.lane.b32.xlu1 %v5638_v54, %s5705_s29 }
0x27c8   :  { %v3748_v61 = vpop.permute.xlu1 %3747 }
0x27c9   :  { %v7334_v19 = vmul.f32 %v5636_v34, %v3748_v61 }
0x27cb   :  { %v3752_v52 = vrot.slane %v7334_v19, 6 }
0x27cd   :  { %v7337_v47 = vadd.f32 %v3752_v52, %v3627_v31  ;;  %3777 = vrot.lane.b32.xlu0 %v3752_v52, %s5701_s25 }
0x283f   :  { %v3778_v44 = vpop.permute.xlu0 %3777 }
0x2840   :  { %5433 = vmatmul.mubr.msk.f32.vlgmr.msra.gmra.mxu1 %vm1486_vm15, %v3778_v44 }
0x2841   :  { %5447 = vmatpush3.msra.mxu1 %v7199_v0  ;;  %5454 = vmatprep.mubr.msk.f32.mxu1 %vm5704_vm1, %v5703_v36 }
0x2842   :  { %5448 = vmatprep.subr.mxu1 %v5703_v36 }
0x2843   :  { %5449 = vmatpush3.msra.mxu1 %v7204_v37 }
0x2844   :  { %5450 = vmatprep.subr.mxu1 %v5703_v36 }
0x2845   :  { %5451 = vmatpush3.msra.mxu1 %v7212_v48 }
0x2846   :  { %5452 = vmatprep.subr.mxu1 %v5703_v36 }
0x2847   :  { %5453 = vmatpush3.msra.mxu1 %v7220_v45 }
0x2848   :  { %5468 = vmatprep.subr.mxu1 %v5703_v36 }
0x2900   :  { %v3847_v4 = vpop.f32.mrf.mxu1 }
0x2901   :  { %v3851_v63 = vadd.f32 %v3847_v4, %v7267_v9 }
0x2902   :  { %v5434_v59 = vpop.f32.mrf.mxu1 }
0x2903   :  { %5639 = vtanh.f32 %v3851_v63  ;;  %v4817_v1 = vmul.f32 -1.442695, %v3851_v63 }
0x2905   :  { %5641 = vpow2.f32 %v4817_v1 }
0x2910   :  { %v5640_v40 = vpop.eup %5639 }
0x2911   :  { %3864 = vrot.lane.b32.xlu1 %v5640_v40, %s5705_s29 }
0x2912   :  { %v5642_v46 = vpop.eup %5641 }
0x2913   :  { %v3855_v57 = vadd.f32 1.0, %v5642_v46 }
0x2915   :  { %5643 = vrcp.f32 %v3855_v57 }
0x2922   :  { %v5644_v22 = vpop.eup %5643 }
0x2923   :  { %v3862_v17 = vmul.f32 %v5644_v22, %v3860_v41 }
0x2983   :  { %v3865_v51 = vpop.permute.xlu1 %3864 }
0x2984   :  { %v3867_v60 = vmul.f32 %v5644_v22, %v3865_v51 }
0x2986   :  { %3869 = vrot.lane.b32.xlu0 %v3867_v60, %s5701_s25 }
0x29f8   :  { %v3870_v14 = vpop.permute.xlu0 %3869 }
0x29f9   :  { %v3872_v7 = vadd.f32 %v3870_v14, %v3862_v17 }
0x29fb   :  { %5645 = vtanh.f32 %v3872_v7 }
0x2a08   :  { %v5646_v49 = vpop.eup %5645 }
0x2a09   :  { %3875 = vrot.lane.b32.xlu1 %v5646_v49, %s5705_s29 }
0x2a7b   :  { %v3876_v43 = vpop.permute.xlu1 %3875 }
0x2a7c   :  { %v7355_v32 = vmul.f32 %v5644_v22, %v3876_v43 }
0x2a7e   :  { %3896 = vrot.lane.b32.xlu0 %v7355_v32, %s5701_s25  ;;  %v3879_v6 = vadd.f32 %v7355_v32, %v7337_v47 }
0x2af0   :  { %v3897_v28 = vpop.permute.xlu0 %3896 }
0x2af1   :  { %5444 = vmatmul.mubr.msk.f32.vlgmr.msra.gmra.mxu0 %vm1486_vm15, %v3897_v28 }
0x2af2   :  { %5458 = vmatpush3.msra.mxu0 %v7199_v0  ;;  %5465 = vmatprep.mubr.msk.f32.mxu0 %vm5704_vm1, %v5703_v36 }
0x2af3   :  { %5459 = vmatprep.subr.mxu0 %v5703_v36 }
0x2af4   :  { %5460 = vmatpush3.msra.mxu0 %v7204_v37 }
0x2af5   :  { %5461 = vmatprep.subr.mxu0 %v5703_v36 }
0x2af6   :  { %5462 = vmatpush3.msra.mxu0 %v7212_v48 }
0x2af7   :  { %5463 = vmatprep.subr.mxu0 %v5703_v36 }
0x2af8   :  { %5464 = vmatpush3.msra.mxu0 %v7220_v45  ;;  %v3982_v45 = vrot.slane %v3872_v7, 6 }
0x2af9   :  { %5479 = vmatprep.subr.mxu0 %v5703_v36 }
0x2bb1   :  { %v3966_v13 = vpop.f32.mrf.mxu0 }
0x2bb2   :  { %v3971_v26 = vrot.slane %v3966_v13, 6 }
0x2bb3   :  { %v5445_v0 = vpop.f32.mrf.mxu0 }
0x2bb4   :  { %v3973_v16 = vadd.f32 %v3971_v26, %v7269_v11 }
0x2bb6   :  { %5647 = vtanh.f32 %v3973_v16  ;;  %v4819_v37 = vmul.f32 -1.442695, %v3973_v16 }
0x2bb8   :  { %5649 = vpow2.f32 %v4819_v37 }
0x2bc3   :  { %v5648_v55 = vpop.eup %5647 }
0x2bc4   :  { %3986 = vrot.lane.b32.xlu1 %v5648_v55, %s5705_s29 }
0x2bc5   :  { %v5650_v3 = vpop.eup %5649 }
0x2bc6   :  { %v3977_v8 = vadd.f32 1.0, %v5650_v3 }
0x2bc8   :  { %5651 = vrcp.f32 %v3977_v8 }
0x2bd5   :  { %v5652_v48 = vpop.eup %5651 }
0x2bd6   :  { %v3984_v15 = vmul.f32 %v5652_v48, %v3982_v45 }
0x2c36   :  { %v3987_v30 = vpop.permute.xlu1 %3986 }
0x2c37   :  { %v3989_v10 = vmul.f32 %v5652_v48, %v3987_v30  ;;  %v3628_v30 = vcombine.high %v7314_v25, %v7314_v25  ;;  %v4273_v25 = vld [vmem:[%s7664_s11 + $0x10] sm:$0xff] }
0x2c39   :  { %3991 = vrot.lane.b32.xlu0 %v3989_v10, %s5701_s25 }
0x2cab   :  { %v3992_v21 = vpop.permute.xlu0 %3991 }
0x2cac   :  { %v3994_v12 = vadd.f32 %v3992_v21, %v3984_v15  ;;  %v4274_v15 = vld [vmem:[%s7664_s11 + $0x18] sm:$0xff]  ;;  %v4272_v21 = vld [vmem:[%s7664_s11 + $0x8] sm:$0xff] }
0x2cae   :  { %5653 = vtanh.f32 %v3994_v12  ;;  %v4107_v54 = vrot.slane %v3994_v12, 6 }
0x2cbb   :  { %v5654_v33 = vpop.eup %5653 }
0x2cbc   :  { %3997 = vrot.lane.b32.xlu1 %v5654_v33, %s5705_s29  ;;  %v4271_v33 = vld [vmem:[%s7664_s11] sm:$0xff] }
0x2d2e   :  { %v3998_v31 = vpop.permute.xlu1 %3997 }
0x2d2f   :  { %v7374_v2 = vmul.f32 %v5652_v48, %v3998_v31 }
0x2d31   :  { %v4002_v62 = vrot.slane %v7374_v2, 2 }
0x2d33   :  { %v4004_v42 = vadd.f32 %v4002_v62, %v3879_v6  ;;  %4021 = vrot.lane.b32.xlu0 %v4002_v62, %s5701_s25 }
0x2da5   :  { %v4022_v24 = vpop.permute.xlu0 %4021 }
0x2da6   :  { %5455 = vmatmul.mubr.msk.f32.vlgmr.msra.gmra.mxu1 %vm1486_vm15, %v4022_v24 }
0x2da7   :  { %5476 = vmatprep.mubr.msk.f32.mxu1 %vm5704_vm1, %v5703_v36  ;;  %5469 = vmatpush3.msra.mxu1 %v4274_v15  ;;  %v4441_v15 = vld [vmem:[%s7666_s13 + $0x18] sm:$0xff] }
0x2da8   :  { %5470 = vmatprep.subr.mxu1 %v5703_v36 }
0x2da9   :  { %5471 = vmatpush3.msra.mxu1 %v4273_v25  ;;  %v4456_v25 = vld [vmem:[%s7666_s13 + $0x90] sm:$0xff] }
0x2daa   :  { %5472 = vmatprep.subr.mxu1 %v5703_v36 }
0x2dab   :  { %5473 = vmatpush3.msra.mxu1 %v4272_v21  ;;  %v4440_v21 = vld [vmem:[%s7666_s13 + $0x10] sm:$0xff] }
0x2dac   :  { %5474 = vmatprep.subr.mxu1 %v5703_v36 }
0x2dad   :  { %5475 = vmatpush3.msra.mxu1 %v4271_v33  ;;  %v4439_v33 = vld [vmem:[%s7666_s13 + $0x8] sm:$0xff] }
0x2dae   :  { %5486 = vmatprep.subr.mxu1 %v5703_v36 }
0x2e66   :  { %v4091_v20 = vpop.f32.mrf.mxu1 }
0x2e67   :  { %v4096_v35 = vrot.slane %v4091_v20, 4 }
0x2e68   :  { %v5456_v29 = vpop.f32.mrf.mxu1 }
0x2e69   :  { %v4098_v38 = vadd.f32 %v4096_v35, %v7267_v9  ;;  %v3755_v35 = vcombine.high %v7334_v19, %v7334_v19 }
0x2e6b   :  { %5655 = vtanh.f32 %v4098_v38  ;;  %v4821_v39 = vmul.f32 -1.442695, %v4098_v38 }
0x2e6d   :  { %5657 = vpow2.f32 %v4821_v39 }
0x2e78   :  { %v5656_v34 = vpop.eup %5655 }
0x2e79   :  { %4111 = vrot.lane.b32.xlu1 %v5656_v34, %s5705_s29 }
0x2e7a   :  { %v5658_v27 = vpop.eup %5657 }
0x2e7b   :  { %v4102_v56 = vadd.f32 1.0, %v5658_v27 }
0x2e7d   :  { %5659 = vrcp.f32 %v4102_v56 }
0x2e8a   :  { %v5660_v50 = vpop.eup %5659 }
0x2e8b   :  { %v4109_v61 = vmul.f32 %v5660_v50, %v4107_v54 }
0x2eeb   :  { %v4112_v23 = vpop.permute.xlu1 %4111 }
0x2eec   :  { %v4114_v53 = vmul.f32 %v5660_v50, %v4112_v23 }
0x2eee   :  { %4116 = vrot.lane.b32.xlu0 %v4114_v53, %s5701_s25 }
0x2f60   :  { %v4117_v52 = vpop.permute.xlu0 %4116 }
0x2f61   :  { %v4119_v47 = vadd.f32 %v4117_v52, %v4109_v61 }
0x2f63   :  { %5661 = vtanh.f32 %v4119_v47  ;;  %v4232_v43 = vrot.slane %v4119_v47, 6 }
0x2f70   :  { %v5662_v9 = vpop.eup %5661 }
0x2f71   :  { %4122 = vrot.lane.b32.xlu1 %v5662_v9, %s5705_s29 }
0x2fe3   :  { %v4123_v44 = vpop.permute.xlu1 %4122 }
0x2fe4   :  { %v4125_v4 = vmul.f32 %v5660_v50, %v4123_v44 }
0x2fe6   :  { %v4127_v63 = vrot.slane %v4125_v4, 4 }
0x2fe8   :  { %v7387_v59 = vadd.f32 %v4127_v63, %v4004_v42  ;;  %4146 = vrot.lane.b32.xlu0 %v4127_v63, %s5701_s25  ;;  %v4469_v63 = vld [vmem:[%s7666_s13 + $0xf8] sm:$0xff] }
0x305a   :  { %v4147_v40 = vpop.permute.xlu0 %4146 }
0x305b   :  { %5466 = vmatmul.mubr.msk.f32.vlgmr.msra.gmra.mxu0 %vm1486_vm15, %v4147_v40 }
0x305c   :  { %5483 = vmatprep.mubr.msk.f32.mxu0 %vm5704_vm1, %v5703_v36 }
0x311b   :  { %v4216_v1 = vpop.f32.mrf.mxu0 }
0x311c   :  { %v4221_v46 = vrot.slane %v4216_v1, 2 }
0x311d   :  { %v5467_v57 = vpop.f32.mrf.mxu0 }
0x311e   :  { %v4223_v22 = vadd.f32 %v4221_v46, %v7269_v11  ;;  %v5706_v11 = vmov 1983009808  }
0x311f   :  { %v3377_v0 = vunpack.c.l.s4 %v5706_v11  ;;  %v4448_v11 = vld [vmem:[%s7666_s13 + $0x50] sm:$0xff] }
0x3120   :  { %5663 = vtanh.f32 %v4223_v22  ;;  %v4823_v60 = vmul.f32 -1.442695, %v4223_v22 }
0x3121   :  { %v3378_v16 = vunpack.c.0.s8 %v3377_v0  ;;  %v4463_v0 = vld [vmem:[%s7666_s13 + $0xc8] sm:$0xff] }
0x3122   :  { %5665 = vpow2.f32 %v4823_v60  ;;  %v4468_v60 = vld [vmem:[%s7666_s13 + $0xf0] sm:$0xff] }
0x3123   :  { %v3381_v55 = vsub.s32 %v3378_v16, %v6460_v5  ;;  %v4447_v16 = vld [vmem:[%s7666_s13 + $0x48] sm:$0xff] }
0x3125   :  { %v3507_v3 = vrot.slane %v7295_v58, %v3381_v55  ;;  %v3382_v8 = vrot.slane %v7274_v18, %v3381_v55  ;;  %v3635_v10 = vrot.slane %v3628_v30, %v3381_v55  ;;  %v4011_v5 = vrot.slane %v7374_v2, %v3381_v55  ;;  %v4444_v30 = vld [vmem:[%s7666_s13 + $0x30] sm:$0xff] }
0x3126   :  { %v3887_v45 = vrot.slane %v7355_v32, %v3381_v55  ;;  %v4130_v18 = vcombine.high %v4125_v4, %v4125_v4  ;;  %v3762_v38 = vrot.slane %v3755_v35, %v3381_v55  ;;  %v4356_v4 = vld [vmem:[%s7664_s11 + $0x20] sm:$0xff]  ;;  %v4567_v35 = vld [vmem:[%s7667_s14 + $0x50] sm:$0xff] }
0x3127   :  { %v3508_v48 = vcombine.high %v3507_v3, %v3507_v3  ;;  %v4012_v58 = vcombine.high %v4011_v5, %v4011_v5  ;;  %v4461_v3 = vld [vmem:[%s7666_s13 + $0xb8] sm:$0xff]  ;;  %v4443_v5 = vld [vmem:[%s7666_s13 + $0x28] sm:$0xff] }
0x3128   :  { %v4137_v12 = vrot.slane %v4130_v18, %v3381_v55  ;;  %v3763_v34 = vcombine.high %v3762_v38, %v3762_v38  ;;  %v4457_v18 = vld [vmem:[%s7666_s13 + $0x98] sm:$0xff]  ;;  %v4565_v38 = vld [vmem:[%s7667_s14 + $0x40] sm:$0xff] }
0x312d   :  { %v5664_v51 = vpop.eup %5663 }
0x312e   :  { %4236 = vrot.lane.b32.xlu1 %v5664_v51, %s5705_s29  ;;  %v4453_v51 = vld [vmem:[%s7666_s13 + $0x78] sm:$0xff] }
0x312f   :  { %v5666_v41 = vpop.eup %5665 }
0x3130   :  { %v4227_v17 = vadd.f32 1.0, %v5666_v41 }
0x3132   :  { %5667 = vrcp.f32 %v4227_v17  ;;  %v4452_v17 = vld [vmem:[%s7666_s13 + $0x70] sm:$0xff] }
0x313f   :  { %v5668_v14 = vpop.eup %5667 }
0x3140   :  { %v4234_v28 = vmul.f32 %v5668_v14, %v4232_v43  ;;  %v4450_v43 = vld [vmem:[%s7666_s13 + $0x60] sm:$0xff] }
0x31a0   :  { %v4237_v7 = vpop.permute.xlu1 %4236 }
0x31a1   :  { %v4239_v49 = vmul.f32 %v5668_v14, %v4237_v7  ;;  %v4451_v7 = vld [vmem:[%s7666_s13 + $0x68] sm:$0xff] }
0x31a3   :  { %4241 = vrot.lane.b32.xlu0 %v4239_v49, %s5701_s25  ;;  %v4466_v49 = vld [vmem:[%s7666_s13 + $0xe0] sm:$0xff] }
0x3215   :  { %v4242_v13 = vpop.permute.xlu0 %4241 }
0x3216   :  { %v4244_v26 = vadd.f32 %v4242_v13, %v4234_v28  ;;  %v4465_v28 = vld [vmem:[%s7666_s13 + $0xd8] sm:$0xff] }
0x3217   :  { %v4449_v13 = vld [vmem:[%s7666_s13 + $0x58] sm:$0xff] }
0x3218   :  { %5669 = vtanh.f32 %v4244_v26  ;;  %v4464_v26 = vld [vmem:[%s7666_s13 + $0xd0] sm:$0xff] }
0x3225   :  { %v5670_v37 = vpop.eup %5669 }
0x3226   :  { %4247 = vrot.lane.b32.xlu1 %v5670_v37, %s5705_s29  ;;  %v4446_v37 = vld [vmem:[%s7666_s13 + $0x40] sm:$0xff] }
0x322a   :  { %3383 = vrot.lane.b32.xlu1 %v3382_v8, %s5701_s25  ;;  %v4445_v8 = vld [vmem:[%s7666_s13 + $0x38] sm:$0xff] }
0x322e   :  { %3514 = vrot.lane.b32.xlu1 %v3508_v48, %s5707_s10 }
0x3232   :  { %3641 = vrot.lane.b32.xlu1 %v3635_v10, %s5705_s29 }
0x3236   :  { %3888 = vrot.lane.b32.xlu1 %v3887_v45, %s5701_s25  ;;  %v4458_v45 = vld [vmem:[%s7666_s13 + $0xa0] sm:$0xff] }
0x323a   :  { %4017 = vrot.lane.b32.xlu1 %v4012_v58, %s5707_s10 }
0x323e   :  { %4142 = vrot.lane.b32.xlu1 %v4137_v12, %s5705_s29 }
0x3298   :  { %v4248_v31 = vpop.permute.xlu1 %4247 }
0x3299   :  { %v4250_v2 = vmul.f32 %v5668_v14, %v4248_v31  ;;  %v4467_v14 = vld [vmem:[%s7666_s13 + $0xe8] sm:$0xff]  ;;  %v4454_v31 = vld [vmem:[%s7666_s13 + $0x80] sm:$0xff] }
0x329b   :  { %v4252_v6 = vrot.slane %v4250_v2, 6  ;;  %v4255_v39 = vcombine.high %v4250_v2, %v4250_v2  ;;  %v4438_v2 = vld [vmem:[%s7666_s13] sm:$0xff] }
0x329c   :  { %v3384_v62 = vpop.permute.xlu1 %3383 }
0x329d   :  { %v4254_v42 = vadd.f32 %v4252_v6, %v7387_v59  ;;  %3386 = vst.msk [vmem:[#allocation3] sm:$0x3] %vm2380_vm2, %v3384_v62  ;;  %v4262_v27 = vrot.slane %v4255_v39, %v3381_v55  ;;  %v4824_v59 = vld [vmem:[%s7665_s12] ss:$0 sm:$0xff]  ;;  %v4572_v6 = vld [vmem:[%s7667_s14 + $0x78] sm:$0xff]  ;;  %v4571_v62 = vld [vmem:[%s7667_s14 + $0x70] sm:$0xff] }
0x329e   :  { %v4462_v55 = vld [vmem:[%s7666_s13 + $0xc0] sm:$0xff]  ;;  %v4563_v39 = vld [vmem:[%s7667_s14 + $0x30] sm:$0xff] }
0x329f   :  { %v4270_v24 = vmul.f32 0.125, %v4254_v42  ;;  %v4263_v56 = vcombine.high %v4262_v27, %v4262_v27  ;;  %v4570_v42 = vld [vmem:[%s7667_s14 + $0x68] sm:$0xff] }
0x32a0   :  { %v3515_v20 = vpop.permute.xlu1 %3514  ;;  %v4562_v27 = vld [vmem:[%s7667_s14 + $0x28] sm:$0xff] }
0x32a1   :  { %3518 = vst.msk [vmem:[#allocation3 + $0x2] sm:$0x3] %vm3517_vm14, %v3515_v20  ;;  %4281 = vrot.lane.b32.xlu0 %v4270_v24, %s5701_s25  ;;  %v4569_v24 = vld [vmem:[%s7667_s14 + $0x60] sm:$0xff]  ;;  %v4568_v20 = vld [vmem:[%s7667_s14 + $0x58] sm:$0xff] }
0x32a4   :  { %v3642_v29 = vpop.permute.xlu1 %3641 }
0x32a5   :  { %3645 = vst.msk [vmem:[#allocation3 + $0x2] sm:$0x3] %vm3644_vm3, %v3642_v29  ;;  %3509 = vrot.lane.b32.xlu0 %v3508_v48, %s5705_s29  ;;  %v4460_v48 = vld [vmem:[%s7666_s13 + $0xb0] sm:$0xff]  ;;  %v4566_v29 = vld [vmem:[%s7667_s14 + $0x48] sm:$0xff] }
0x32a8   :  { %v3889_v19 = vpop.permute.xlu1 %3888 }
0x32a9   :  { %3636 = vrot.lane.b32.xlu0 %v3635_v10, %s5707_s10  ;;  %v4459_v10 = vld [vmem:[%s7666_s13 + $0xa8] sm:$0xff] }
0x32ac   :  { %v4018_v53 = vpop.permute.xlu1 %4017 }
0x32ad   :  { %3767 = vrot.lane.b32.xlu0 %v3763_v34, %s5701_s25 }
0x32b0   :  { %v4143_v61 = vpop.permute.xlu1 %4142 }
0x32b1   :  { %4013 = vrot.lane.b32.xlu0 %v4012_v58, %s5705_s29  ;;  %v4442_v58 = vld [vmem:[%s7666_s13 + $0x20] sm:$0xff] }
0x32b5   :  { %4138 = vrot.lane.b32.xlu0 %v4137_v12, %s5707_s10  ;;  %v4455_v12 = vld [vmem:[%s7666_s13 + $0x88] sm:$0xff] }
0x32b9   :  { %4266 = vrot.lane.b32.xlu0 %v4263_v56, %s5701_s25 }
0x3313   :  { %v4282_v50 = vpop.permute.xlu0 %4281 }
0x3314   :  { %5477 = vmatmul.mubr.msk.f32.vlgmr.msra.gmra.mxu1 %vm1486_vm15, %v4282_v50  ;;  %v4559_v50 = vld [vmem:[%s7667_s14 + $0x10] sm:$0xff] }
0x3315   :  { %5518 = vmatprep.mubr.msk.f32.mxu1 %vm5704_vm1, %v5703_v36  ;;  %5487 = vmatpush3.msra.mxu1 %v4572_v6 }
0x3316   :  { %5488 = vmatprep.subr.mxu1 %v5703_v36 }
0x3317   :  { %v3510_v23 = vpop.permute.xlu0 %3509  ;;  %5489 = vmatpush3.msra.mxu1 %v4571_v62 }
0x3318   :  { %3513 = vst.msk [vmem:[#allocation3] sm:$0x3] %vm3512_vm4, %v3510_v23  ;;  %5490 = vmatprep.subr.mxu1 %v5703_v36  ;;  %v4558_v23 = vld [vmem:[%s7667_s14 + $0x8] sm:$0xff] }
0x3319   :  { %5491 = vmatpush3.msra.mxu1 %v4570_v42 }
0x331a   :  { %5492 = vmatprep.subr.mxu1 %v5703_v36 }
0x331b   :  { %v3637_v54 = vpop.permute.xlu0 %3636  ;;  %5493 = vmatpush3.msra.mxu1 %v4569_v24 }
0x331c   :  { %3640 = vst.msk [vmem:[#allocation3] sm:$0x3] %vm3639_vm0, %v3637_v54  ;;  %5494 = vmatprep.subr.mxu1 %v5703_v36  ;;  %v4826_v54 = vld [vmem:[%s7665_s12 + $0x1] ss:$0 sm:$0xff] }
0x331d   :  { %3766 = vst.msk [vmem:[#allocation3] sm:$0x3] %vm3765_vm6, %v3763_v34  ;;  %5495 = vmatpush3.msra.mxu1 %v4568_v20  ;;  %v4564_v34 = vld [vmem:[%s7667_s14 + $0x38] sm:$0xff] }
0x331e   :  { %3892 = vst.msk [vmem:[#allocation3] sm:$0x3] %vm3387_vm12, %v7355_v32  ;;  %v4357_v32 = vld [vmem:[%s7664_s11 + $0x28] sm:$0xff]  ;;  %5496 = vmatprep.subr.mxu1 %v5703_v36 }
0x331f   :  { %4020 = vst.msk [vmem:[#allocation3] sm:$0x3] %vm3517_vm14, %v4018_v53  ;;  %v3768_v52 = vpop.permute.xlu0 %3767  ;;  %5480 = vmatpush3.msra.mxu0 %v4357_v32  ;;  %5497 = vmatpush3.msra.mxu1 %v4567_v35  ;;  %v4557_v53 = vld [vmem:[%s7667_s14] sm:$0xff] }
0x3320   :  { %3770 = vst.msk [vmem:[#allocation3 + $0x2] sm:$0x3] %vm2382_vm5, %v3768_v52  ;;  %5481 = vmatprep.subr.mxu0 %v5703_v36  ;;  %5498 = vmatprep.subr.mxu1 %v5703_v36 }
0x3321   :  { %4145 = vst.msk [vmem:[#allocation3] sm:$0x3] %vm3644_vm3, %v4143_v61  ;;  %5482 = vmatpush3.msra.mxu0 %v4356_v4  ;;  %5499 = vmatpush3.msra.mxu1 %v4566_v29 }
0x3322   :  { %3891 = vst.msk [vmem:[#allocation3 + $0x2] sm:$0x3] %vm2380_vm2, %v3889_v19  ;;  %5037 = vmatprep.subr.mxu0 %v4469_v63  ;;  %5500 = vmatprep.subr.mxu1 %v5703_v36  ;;  %v4560_v19 = vld [vmem:[%s7667_s14 + $0x18] sm:$0xff] }
0x3323   :  { %v4014_v47 = vpop.permute.xlu0 %4013  ;;  %5501 = vmatpush3.msra.mxu1 %v4565_v38 }
0x3324   :  { %4016 = vst.msk [vmem:[#allocation3 + $0x2] sm:$0x3] %vm3512_vm4, %v4014_v47  ;;  %5502 = vmatprep.subr.mxu1 %v5703_v36 }
0x3325   :  { %5503 = vmatpush3.msra.mxu1 %v4564_v34 }
0x3326   :  { %5504 = vmatprep.subr.mxu1 %v5703_v36 }
0x3327   :  { %v4139_v9 = vpop.permute.xlu0 %4138  ;;  %5505 = vmatpush3.msra.mxu1 %v4563_v39 }
0x3328   :  { %4141 = vst.msk [vmem:[#allocation3 + $0x2] sm:$0x3] %vm3639_vm0, %v4139_v9  ;;  %5506 = vmatprep.subr.mxu1 %v5703_v36 }
0x3329   :  { %4265 = vst.msk [vmem:[#allocation3 + $0x2] sm:$0x3] %vm3765_vm6, %v4263_v56  ;;  %5507 = vmatpush3.msra.mxu1 %v4562_v27  ;;  %v4561_v56 = vld [vmem:[%s7667_s14 + $0x20] sm:$0xff] }
0x332a   :  { %5508 = vmatprep.subr.mxu1 %v5703_v36 }
0x332b   :  { %v4267_v44 = vpop.permute.xlu0 %4266  ;;  %5509 = vmatpush3.msra.mxu1 %v4561_v56 }
0x332c   :  { %4269 = vst.msk [vmem:[#allocation3] sm:$0x3] %vm2382_vm5, %v4267_v44  ;;  %5510 = vmatprep.subr.mxu1 %v5703_v36  ;;  %v4828_v44 = vld [vmem:[%s7668_s15] ss:$0 sm:$0xff] }
0x332d   :  { %5511 = vmatpush3.msra.mxu1 %v4560_v19 }
0x332e   :  { %5512 = vmatprep.subr.mxu1 %v5703_v36 }
0x332f   :  { %5513 = vmatpush3.msra.mxu1 %v4559_v50 }
0x3330   :  { %5514 = vmatprep.subr.mxu1 %v5703_v36 }
0x3331   :  { %5515 = vmatpush3.msra.mxu1 %v4558_v23 }
0x3332   :  { %5516 = vmatprep.subr.mxu1 %v5703_v36 }
0x3333   :  { %v7464_v46 = vld.sshfl [vmem:[#allocation3] sm:$0x33 pattern:$0x76325410]  ;;  %5517 = vmatpush3.msra.mxu1 %v4557_v53 }
0x3334   :  { %v4483_v41 = vcombine.high %v7464_v46, %v7464_v46 }
0x33d4   :  { %v4351_v40 = vpop.f32.mrf.mxu1 }
0x33d5   :  { %v4352_v1 = vadd.f32 %v4824_v59, %v4351_v40  ;;  %v4649_v40 = vld [vmem:[%s7669_s16 + $0x8] sm:$0xff] }
0x33d6   :  { %v5478_v57 = vpop.f32.mrf.mxu1 }
0x33d7   :  { %v4355_v22 = vmax.f32 %v4352_v1, 0.0  ;;  %v4648_v1 = vld [vmem:[%s7669_s16] sm:$0xff] }
0x33d9   :  { %5484 = vmatmul.mubr.msk.f32.vlgmr.msra.gmra.mxu0 %vm1464_vm13, %v4355_v22 }
0x33da   :  { %5038 = vmatpush3.msra.mxu0 %v4453_v51  ;;  %4550 = vmatprep.mubr.f32.mxu0 %v4483_v41 }
0x33db   :  { %5039 = vmatprep.subr.mxu0 %v4468_v60 }
0x33dc   :  { %5040 = vmatpush3.msra.mxu0 %v4452_v17 }
0x33dd   :  { %5041 = vmatprep.subr.mxu0 %v4467_v14 }
0x33de   :  { %5042 = vmatpush3.msra.mxu0 %v4451_v7 }
0x33df   :  { %5043 = vmatprep.subr.mxu0 %v4466_v49 }
0x33e0   :  { %5044 = vmatpush3.msra.mxu0 %v4450_v43 }
0x33e1   :  { %5045 = vmatprep.subr.mxu0 %v4465_v28 }
0x33e2   :  { %5046 = vmatpush3.msra.mxu0 %v4449_v13 }
0x33e3   :  { %5047 = vmatprep.subr.mxu0 %v4464_v26 }
0x33e4   :  { %5048 = vmatpush3.msra.mxu0 %v4448_v11 }
0x33e5   :  { %5049 = vmatprep.subr.mxu0 %v4463_v0 }
0x33e6   :  { %5050 = vmatpush3.msra.mxu0 %v4447_v16 }
0x33e7   :  { %5051 = vmatprep.subr.mxu0 %v4462_v55 }
0x33e8   :  { %5052 = vmatpush3.msra.mxu0 %v4446_v37 }
0x33e9   :  { %5053 = vmatprep.subr.mxu0 %v4461_v3 }
0x33ea   :  { %5054 = vmatpush3.msra.mxu0 %v4445_v8 }
0x33eb   :  { %5055 = vmatprep.subr.mxu0 %v4460_v48 }
0x33ec   :  { %5056 = vmatpush3.msra.mxu0 %v4444_v30 }
0x33ed   :  { %5057 = vmatprep.subr.mxu0 %v4459_v10 }
0x33ee   :  { %5058 = vmatpush3.msra.mxu0 %v4443_v5 }
0x33ef   :  { %5059 = vmatprep.subr.mxu0 %v4458_v45 }
0x33f0   :  { %5060 = vmatpush3.msra.mxu0 %v4442_v58 }
0x33f1   :  { %5061 = vmatprep.subr.mxu0 %v4457_v18 }
0x33f2   :  { %5062 = vmatpush3.msra.mxu0 %v4441_v15 }
0x33f3   :  { %5063 = vmatprep.subr.mxu0 %v4456_v25 }
0x33f4   :  { %5064 = vmatpush3.msra.mxu0 %v4440_v21 }
0x33f5   :  { %5065 = vmatprep.subr.mxu0 %v4455_v12 }
0x33f6   :  { %5066 = vmatpush3.msra.mxu0 %v4439_v33 }
0x33f7   :  { %5067 = vmatprep.subr.mxu0 %v4454_v31 }
0x33f8   :  { %5068 = vmatpush3.msra.mxu0 %v4438_v2 }
0x33f9   :  { %4551 = vmatmul.mubr.f32.vlgmr.msra.gmra.mxu0 %v7464_v46  ;;  %5521 = vmatprep.subr.mxu0 %v5703_v36  ;;  %v4830_v46 = vld [vmem:[%s7668_s15 + $0x1] ss:$0 sm:$0xff] }
0x33fa   :  { %5525 = vmatprep.mubr.msk.f32.mxu0 %vm5704_vm1, %v5703_v36  ;;  %5522 = vmatpush3.msra.mxu0 %v4649_v40 }
0x33fb   :  { %5523 = vmatprep.subr.mxu0 %v5703_v36 }
0x33fc   :  { %5524 = vmatpush3.msra.mxu0 %v4648_v1 }
0x3499   :  { %v4432_v61 = vpop.f32.mrf.mxu0 }
0x349a   :  { %v4433_v52 = vadd.f32 %v4826_v54, %v4432_v61 }
0x349b   :  { %v5485_v47 = vpop.f32.mrf.mxu0 }
0x349c   :  { %4436 = vst.msk [vmem:[#allocation4] sm:$0x3] %vm2380_vm2, %v4433_v52 }
0x34b9   :  { %v5069_v9 = vpop.f32.mrf.mxu0 }
0x34bb   :  { %v5070_v32 = vpop.f32.mrf.mxu0 }
0x34bc   :  { %v5071_v4 = vadd.f32 %v5070_v32, %v5069_v9 }
0x34be   :  { %v4553_v63 = vadd.f32 %v5071_v4, %v4828_v44 }
0x34c0   :  { %v4556_v59 = vmax.f32 %v4553_v63, 0.0 }
0x34c2   :  { %5519 = vmatmul.mubr.f32.vlgmr.msra.gmra.mxu1 %v4556_v59 }
0x3582   :  { %v4644_v57 = vpop.f32.mrf.mxu1 }
0x3583   :  { %v4645_v22 = vadd.f32 %v4830_v46, %v4644_v57 }
0x3584   :  { %v5520_v51 = vpop.f32.mrf.mxu1 }
0x3585   :  { %5526 = vmatmul.mubr.msk.f32.vlgmr.msra.gmra.mxu0 %vm1464_vm13, %v4645_v22 }
0x3586   :  { %5683 = shalt.err (!%p5680_p4)
}
0x3587   :  { %4733 = dma.vmem_to_hbm [thread:$0]  %s4731_s9, 32, %s7670_s17, [#allocation5]  }
0x3645   :  { %v4719_v36 = vpop.f32.mrf.mxu0 }
0x3646   :  { %4723 = vst [vmem:[%s7671_s18] sm:$0x3] %v4719_v36 }
0x3647   :  { %v5527_v60 = vpop.f32.mrf.mxu0 }
0x3648   :  { %5692 = dma.done.wait [#allocation5], 32  }
0x3649   :  { %5693 = vsyncadd [#allocation5], 4294967264 }
0x364a   :  { %4741 = vsyncpa [#allocation5], 1 }

</bundles_post_ra>
